<compile_context>
chip_gen: v6e
topology: v6e:2x2x1
jax: 0.10.0
libtpu: 0.0.40
codegen_flags: <defaults>
</compile_context>

<pallas_src>
import jax
import jax.numpy as jnp
from jax.experimental import pallas as pl
from jax.experimental.pallas import tpu as pltpu

_OUT_LANES = 128  # lane-dense classifier output width


# ----------------------------------------------------------------------------
# Fused Discriminator kernel: embedding gather + 2-layer biLSTM + classifier.
# Runs once (no grid); all operands are whole-array VMEM/SMEM blocks.
# ----------------------------------------------------------------------------
def _discriminator_kernel(tok_ref, emb_ref,
                          wih0_ref, b0_ref, whh0_ref,
                          wih1_ref, b1_ref, whh1_ref,
                          wc1_ref, bc1_ref, wc2_ref, bc2_ref,
                          o_ref):
    B = o_ref.shape[0]
    V, H = emb_ref.shape
    T = tok_ref.shape[0] // B
    H4 = 4 * H

    def lstm_gates(gates, c_prev):
        # Full-width EUP nonlinearities on the (B, 4H) gates, then static lane
        # slices of the results.  Gate order matches PyTorch: i | f | g | o.
        sig = jax.nn.sigmoid(gates)
        th = jnp.tanh(gates)
        i_g = sig[:, 0:H]
        f_g = sig[:, H:2 * H]
        g_g = th[:, 2 * H:3 * H]
        o_g = sig[:, 3 * H:4 * H]
        c_new = f_g * c_prev + i_g * g_g
        h_new = o_g * jnp.tanh(c_new)
        return h_new, c_new

    # ---------------- Embedding gather: each token fetched exactly once ------
    # tok_ref is the flattened (B*T,) token array in SMEM (row-major (B,T),
    # so token (b, t) lives at b*T + t).  Staging rows are ordered t*B + b to
    # match the gate-slab row layout used by both time loops.
    rows = []
    for t in range(T):
        for b in range(B):
            tok = jnp.clip(tok_ref[b * T + t], 0, V - 1)
            rows.append(emb_ref[pl.ds(tok, 1), :])            # (1, H)
    x0 = jnp.concatenate(rows, axis=0)                        # (T*B, H)

    # ---------------- Layer 0 ------------------------------------------------
    # Hoisted input projection: fwd|bwd W_ih lane-packed, bias folded in once.
    g0 = (jnp.dot(x0, wih0_ref[...], preferred_element_type=jnp.float32)
          + b0_ref[...])                                       # (T*B, 8H)

    zero = jnp.zeros((B, H), jnp.float32)
    whh0_f = whh0_ref[0]
    whh0_b = whh0_ref[1]

    hf, cf, hb, cb = zero, zero, zero, zero
    y0f = [None] * T
    y0b = [None] * T
    for t in range(T):
        r = T - 1 - t
        gates_f = g0[t * B:(t + 1) * B, 0:H4] + jnp.dot(
            hf, whh0_f, preferred_element_type=jnp.float32)
        hf, cf = lstm_gates(gates_f, cf)
        y0f[t] = hf
        gates_b = g0[r * B:(r + 1) * B, H4:2 * H4] + jnp.dot(
            hb, whh0_b, preferred_element_type=jnp.float32)
        hb, cb = lstm_gates(gates_b, cb)
        y0b[r] = hb
    # TODO(synk): inter-layer LSTM dropout (p=0.2) is identity in eval mode.

    # ---------------- Layer 1 ------------------------------------------------
    # Layer-1 input is concat(y0f_t, y0b_t); layer-0 outputs never leave vregs.
    x1 = jnp.concatenate([jnp.concatenate(y0f, axis=0),
                          jnp.concatenate(y0b, axis=0)], axis=1)   # (T*B, 2H)
    g1 = (jnp.dot(x1, wih1_ref[...], preferred_element_type=jnp.float32)
          + b1_ref[...])                                           # (T*B, 8H)

    whh1_f = whh1_ref[0]
    whh1_b = whh1_ref[1]
    hf, cf, hb, cb = zero, zero, zero, zero
    for t in range(T):
        r = T - 1 - t
        gates_f = g1[t * B:(t + 1) * B, 0:H4] + jnp.dot(
            hf, whh1_f, preferred_element_type=jnp.float32)
        hf, cf = lstm_gates(gates_f, cf)
        gates_b = g1[r * B:(r + 1) * B, H4:2 * H4] + jnp.dot(
            hb, whh1_b, preferred_element_type=jnp.float32)
        hb, cb = lstm_gates(gates_b, cb)

    # ---------------- Classifier head (dropout p=0.3 = identity in eval) -----
    # final_hidden = cat(hidden[-2], hidden[-1]) handled by the split wc1.
    hidden = jnp.maximum(
        jnp.dot(hf, wc1_ref[0], preferred_element_type=jnp.float32)
        + jnp.dot(hb, wc1_ref[1], preferred_element_type=jnp.float32)
        + bc1_ref[...], 0.0)
    logits = (jnp.dot(hidden, wc2_ref[...], preferred_element_type=jnp.float32)
              + bc2_ref[...])                   # (B, 128), columns replicated
    o_ref[...] = jax.nn.sigmoid(logits)


# ----------------------------------------------------------------------------
# Wrapper
# ----------------------------------------------------------------------------
def discriminator_forward(kparams, tokens):
    """tokens: (B, T) int32 token indices -> (B,) probabilities."""
    B, T = tokens.shape

    def vmem():
        return pl.BlockSpec(memory_space=pltpu.MemorySpace.VMEM)

    probs = pl.pallas_call(
        _discriminator_kernel,
        out_shape=jax.ShapeDtypeStruct((B, _OUT_LANES), jnp.float32),
        in_specs=[
            pl.BlockSpec(memory_space=pltpu.MemorySpace.SMEM),   # tokens (B*T,)
            vmem(),                                              # embedding
            vmem(), vmem(), vmem(),                              # layer-0 w_ih/b/w_hh
            vmem(), vmem(), vmem(),                              # layer-1 w_ih/b/w_hh
            vmem(), vmem(), vmem(), vmem(),                      # classifier
        ],
        out_specs=vmem(),
    )(tokens.reshape(-1).astype(jnp.int32), kparams["emb"],
      kparams["wih0"], kparams["b0"], kparams["whh0"],
      kparams["wih1"], kparams["b1"], kparams["whh1"],
      kparams["wc1"], kparams["bc1"], kparams["wc2"], kparams["bc2"])
    return probs[:, 0]


# ----------------------------------------------------------------------------
# Parameters: PyTorch-layout init + one-time repack into kernel layout.
# ----------------------------------------------------------------------------
def init_params(key, vocab_size, hidden_dim):
    H = hidden_dim
    k = 1.0 / jnp.sqrt(jnp.float32(H))

    def uni(key, shape):
        return jax.random.uniform(key, shape, jnp.float32, -k, k)

    keys = iter(jax.random.split(key, 32))
    p = {"embedding": jax.random.normal(next(keys), (vocab_size, H), jnp.float32),
         "lstm": []}
    for layer in range(2):
        din = H if layer == 0 else 2 * H
        lp = {}
        for d in ("fwd", "bwd"):
            lp[d] = dict(w_ih=uni(next(keys), (4 * H, din)),   # PyTorch layout
                         w_hh=uni(next(keys), (4 * H, H)),
                         b_ih=uni(next(keys), (4 * H,)),
                         b_hh=uni(next(keys), (4 * H,)))
        p["lstm"].append(lp)
    p["clf_w1"] = uni(next(keys), (H, 2 * H))    # Linear(2H -> H).weight
    p["clf_b1"] = uni(next(keys), (H,))
    p["clf_w2"] = uni(next(keys), (1, H))        # Linear(H -> 1).weight
    p["clf_b2"] = uni(next(keys), (1,))
    return p


def prepare_params(p):
    """Repack torch-layout params into the MXU-friendly kernel layout (run once).

    W_ih of both directions are transposed and lane-packed into one (Din, 8H)
    matrix per layer (so the hoisted input projection is a single dot) with the
    combined b_ih+b_hh bias in the same lane order; W_hh are transposed to
    (H, 4H) and stacked per direction; the classifier input weight is split by
    input half so no lane concat is needed inside the kernel.
    """
    H = p["clf_w1"].shape[0]

    def packed_layer(layer):
        f = p["lstm"][layer]["fwd"]
        b = p["lstm"][layer]["bwd"]
        wih = jnp.concatenate([f["w_ih"].T, b["w_ih"].T], axis=1)       # (Din, 8H)
        bias = jnp.concatenate([f["b_ih"] + f["b_hh"],
                                b["b_ih"] + b["b_hh"]]).reshape(1, 8 * H)
        whh = jnp.stack([f["w_hh"].T, b["w_hh"].T])                     # (2, H, 4H)
        return wih, bias, whh

    wih0, b0, whh0 = packed_layer(0)
    wih1, b1, whh1 = packed_layer(1)
    wc1_t = p["clf_w1"].T                                               # (2H, H)
    return {
        "emb":  p["embedding"],                                         # (V, H)
        "wih0": wih0, "b0": b0, "whh0": whh0,                           # layer 0
        "wih1": wih1, "b1": b1, "whh1": whh1,                           # layer 1
        "wc1":  jnp.stack([wc1_t[:H], wc1_t[H:]]),                      # (2, H, H)
        "bc1":  p["clf_b1"].reshape(1, H),                              # (1, H)
        # lane-dense head: replicate the single output column across 128 lanes
        "wc2":  jnp.tile(p["clf_w2"].T, (1, _OUT_LANES)),               # (H, 128)
        "bc2":  jnp.tile(p["clf_b2"].reshape(1, 1), (1, _OUT_LANES)),   # (1, 128)
    }


if __name__ == "__main__":
    vocab_size, hidden_dim, max_length, batch = 50, 32, 8, 2

    key = jax.random.PRNGKey(0)
    pkey, dkey = jax.random.split(key)
    raw_params = init_params(pkey, vocab_size, hidden_dim)
    kparams = prepare_params(raw_params)        # one-time repack (outside kernel)
    tokens = jax.random.randint(dkey, (batch, max_length), 0, vocab_size,
                                dtype=jnp.int32)

    fwd = jax.jit(discriminator_forward)
    out = jax.block_until_ready(fwd(kparams, tokens))

    assert out.shape == (batch,), out.shape
    assert bool(jnp.all(jnp.isfinite(out)))
    assert bool(jnp.all((out >= 0.0) & (out <= 1.0)))
    print("KERNEL_OK")
</pallas_src>

<mosaic_0001>
module attributes {stable_mosaic.version = 11 : i64} {
  func.func @_discriminator_kernel(%arg0: memref<16xi32, #tpu.memory_space<smem>>, %arg1: memref<50x32xf32, #tpu.memory_space<vmem>>, %arg2: memref<32x256xf32, #tpu.memory_space<vmem>>, %arg3: memref<1x256xf32, #tpu.memory_space<vmem>>, %arg4: memref<2x32x128xf32, #tpu.memory_space<vmem>>, %arg5: memref<64x256xf32, #tpu.memory_space<vmem>>, %arg6: memref<1x256xf32, #tpu.memory_space<vmem>>, %arg7: memref<2x32x128xf32, #tpu.memory_space<vmem>>, %arg8: memref<2x32x32xf32, #tpu.memory_space<vmem>>, %arg9: memref<1x32xf32, #tpu.memory_space<vmem>>, %arg10: memref<32x128xf32, #tpu.memory_space<vmem>>, %arg11: memref<1x128xf32, #tpu.memory_space<vmem>>, %arg12: memref<2x128xf32, #tpu.memory_space<vmem>>) attributes {dimension_semantics = [], scalar_prefetch = 0 : i64, scratch_operands = 0 : i64, tpu.core_type = #tpu.core_type<tc>} {
    %c0 = arith.constant 0 : index
    %0 = memref.load %arg0[%c0] : memref<16xi32, #tpu.memory_space<smem>>
    %c0_i32 = arith.constant 0 : i32
    %c49_i32 = arith.constant 49 : i32
    %1 = arith.maxsi %c0_i32, %0 : i32
    %2 = arith.minsi %c49_i32, %1 : i32
    %3 = arith.index_cast %2 : i32 to index
    %c0_0 = arith.constant 0 : index
    %4 = vector.load %arg1[%3, %c0_0] : memref<50x32xf32, #tpu.memory_space<vmem>>, vector<1x32xf32>
    %c8 = arith.constant 8 : index
    %5 = memref.load %arg0[%c8] : memref<16xi32, #tpu.memory_space<smem>>
    %c0_i32_1 = arith.constant 0 : i32
    %c49_i32_2 = arith.constant 49 : i32
    %6 = arith.maxsi %c0_i32_1, %5 : i32
    %7 = arith.minsi %c49_i32_2, %6 : i32
    %8 = arith.index_cast %7 : i32 to index
    %c0_3 = arith.constant 0 : index
    %9 = vector.load %arg1[%8, %c0_3] : memref<50x32xf32, #tpu.memory_space<vmem>>, vector<1x32xf32>
    %c1 = arith.constant 1 : index
    %10 = memref.load %arg0[%c1] : memref<16xi32, #tpu.memory_space<smem>>
    %c0_i32_4 = arith.constant 0 : i32
    %c49_i32_5 = arith.constant 49 : i32
    %11 = arith.maxsi %c0_i32_4, %10 : i32
    %12 = arith.minsi %c49_i32_5, %11 : i32
    %13 = arith.index_cast %12 : i32 to index
    %c0_6 = arith.constant 0 : index
    %14 = vector.load %arg1[%13, %c0_6] : memref<50x32xf32, #tpu.memory_space<vmem>>, vector<1x32xf32>
    %c9 = arith.constant 9 : index
    %15 = memref.load %arg0[%c9] : memref<16xi32, #tpu.memory_space<smem>>
    %c0_i32_7 = arith.constant 0 : i32
    %c49_i32_8 = arith.constant 49 : i32
    %16 = arith.maxsi %c0_i32_7, %15 : i32
    %17 = arith.minsi %c49_i32_8, %16 : i32
    %18 = arith.index_cast %17 : i32 to index
    %c0_9 = arith.constant 0 : index
    %19 = vector.load %arg1[%18, %c0_9] : memref<50x32xf32, #tpu.memory_space<vmem>>, vector<1x32xf32>
    %c2 = arith.constant 2 : index
    %20 = memref.load %arg0[%c2] : memref<16xi32, #tpu.memory_space<smem>>
    %c0_i32_10 = arith.constant 0 : i32
    %c49_i32_11 = arith.constant 49 : i32
    %21 = arith.maxsi %c0_i32_10, %20 : i32
    %22 = arith.minsi %c49_i32_11, %21 : i32
    %23 = arith.index_cast %22 : i32 to index
    %c0_12 = arith.constant 0 : index
    %24 = vector.load %arg1[%23, %c0_12] : memref<50x32xf32, #tpu.memory_space<vmem>>, vector<1x32xf32>
    %c10 = arith.constant 10 : index
    %25 = memref.load %arg0[%c10] : memref<16xi32, #tpu.memory_space<smem>>
    %c0_i32_13 = arith.constant 0 : i32
    %c49_i32_14 = arith.constant 49 : i32
    %26 = arith.maxsi %c0_i32_13, %25 : i32
    %27 = arith.minsi %c49_i32_14, %26 : i32
    %28 = arith.index_cast %27 : i32 to index
    %c0_15 = arith.constant 0 : index
    %29 = vector.load %arg1[%28, %c0_15] : memref<50x32xf32, #tpu.memory_space<vmem>>, vector<1x32xf32>
    %c3 = arith.constant 3 : index
    %30 = memref.load %arg0[%c3] : memref<16xi32, #tpu.memory_space<smem>>
    %c0_i32_16 = arith.constant 0 : i32
    %c49_i32_17 = arith.constant 49 : i32
    %31 = arith.maxsi %c0_i32_16, %30 : i32
    %32 = arith.minsi %c49_i32_17, %31 : i32
    %33 = arith.index_cast %32 : i32 to index
    %c0_18 = arith.constant 0 : index
    %34 = vector.load %arg1[%33, %c0_18] : memref<50x32xf32, #tpu.memory_space<vmem>>, vector<1x32xf32>
    %c11 = arith.constant 11 : index
    %35 = memref.load %arg0[%c11] : memref<16xi32, #tpu.memory_space<smem>>
    %c0_i32_19 = arith.constant 0 : i32
    %c49_i32_20 = arith.constant 49 : i32
    %36 = arith.maxsi %c0_i32_19, %35 : i32
    %37 = arith.minsi %c49_i32_20, %36 : i32
    %38 = arith.index_cast %37 : i32 to index
    %c0_21 = arith.constant 0 : index
    %39 = vector.load %arg1[%38, %c0_21] : memref<50x32xf32, #tpu.memory_space<vmem>>, vector<1x32xf32>
    %c4 = arith.constant 4 : index
    %40 = memref.load %arg0[%c4] : memref<16xi32, #tpu.memory_space<smem>>
    %c0_i32_22 = arith.constant 0 : i32
    %c49_i32_23 = arith.constant 49 : i32
    %41 = arith.maxsi %c0_i32_22, %40 : i32
    %42 = arith.minsi %c49_i32_23, %41 : i32
    %43 = arith.index_cast %42 : i32 to index
    %c0_24 = arith.constant 0 : index
    %44 = vector.load %arg1[%43, %c0_24] : memref<50x32xf32, #tpu.memory_space<vmem>>, vector<1x32xf32>
    %c12 = arith.constant 12 : index
    %45 = memref.load %arg0[%c12] : memref<16xi32, #tpu.memory_space<smem>>
    %c0_i32_25 = arith.constant 0 : i32
    %c49_i32_26 = arith.constant 49 : i32
    %46 = arith.maxsi %c0_i32_25, %45 : i32
    %47 = arith.minsi %c49_i32_26, %46 : i32
    %48 = arith.index_cast %47 : i32 to index
    %c0_27 = arith.constant 0 : index
    %49 = vector.load %arg1[%48, %c0_27] : memref<50x32xf32, #tpu.memory_space<vmem>>, vector<1x32xf32>
    %c5 = arith.constant 5 : index
    %50 = memref.load %arg0[%c5] : memref<16xi32, #tpu.memory_space<smem>>
    %c0_i32_28 = arith.constant 0 : i32
    %c49_i32_29 = arith.constant 49 : i32
    %51 = arith.maxsi %c0_i32_28, %50 : i32
    %52 = arith.minsi %c49_i32_29, %51 : i32
    %53 = arith.index_cast %52 : i32 to index
    %c0_30 = arith.constant 0 : index
    %54 = vector.load %arg1[%53, %c0_30] : memref<50x32xf32, #tpu.memory_space<vmem>>, vector<1x32xf32>
    %c13 = arith.constant 13 : index
    %55 = memref.load %arg0[%c13] : memref<16xi32, #tpu.memory_space<smem>>
    %c0_i32_31 = arith.constant 0 : i32
    %c49_i32_32 = arith.constant 49 : i32
    %56 = arith.maxsi %c0_i32_31, %55 : i32
    %57 = arith.minsi %c49_i32_32, %56 : i32
    %58 = arith.index_cast %57 : i32 to index
    %c0_33 = arith.constant 0 : index
    %59 = vector.load %arg1[%58, %c0_33] : memref<50x32xf32, #tpu.memory_space<vmem>>, vector<1x32xf32>
    %c6 = arith.constant 6 : index
    %60 = memref.load %arg0[%c6] : memref<16xi32, #tpu.memory_space<smem>>
    %c0_i32_34 = arith.constant 0 : i32
    %c49_i32_35 = arith.constant 49 : i32
    %61 = arith.maxsi %c0_i32_34, %60 : i32
    %62 = arith.minsi %c49_i32_35, %61 : i32
    %63 = arith.index_cast %62 : i32 to index
    %c0_36 = arith.constant 0 : index
    %64 = vector.load %arg1[%63, %c0_36] : memref<50x32xf32, #tpu.memory_space<vmem>>, vector<1x32xf32>
    %c14 = arith.constant 14 : index
    %65 = memref.load %arg0[%c14] : memref<16xi32, #tpu.memory_space<smem>>
    %c0_i32_37 = arith.constant 0 : i32
    %c49_i32_38 = arith.constant 49 : i32
    %66 = arith.maxsi %c0_i32_37, %65 : i32
    %67 = arith.minsi %c49_i32_38, %66 : i32
    %68 = arith.index_cast %67 : i32 to index
    %c0_39 = arith.constant 0 : index
    %69 = vector.load %arg1[%68, %c0_39] : memref<50x32xf32, #tpu.memory_space<vmem>>, vector<1x32xf32>
    %c7 = arith.constant 7 : index
    %70 = memref.load %arg0[%c7] : memref<16xi32, #tpu.memory_space<smem>>
    %c0_i32_40 = arith.constant 0 : i32
    %c49_i32_41 = arith.constant 49 : i32
    %71 = arith.maxsi %c0_i32_40, %70 : i32
    %72 = arith.minsi %c49_i32_41, %71 : i32
    %73 = arith.index_cast %72 : i32 to index
    %c0_42 = arith.constant 0 : index
    %74 = vector.load %arg1[%73, %c0_42] : memref<50x32xf32, #tpu.memory_space<vmem>>, vector<1x32xf32>
    %c15 = arith.constant 15 : index
    %75 = memref.load %arg0[%c15] : memref<16xi32, #tpu.memory_space<smem>>
    %c0_i32_43 = arith.constant 0 : i32
    %c49_i32_44 = arith.constant 49 : i32
    %76 = arith.maxsi %c0_i32_43, %75 : i32
    %77 = arith.minsi %c49_i32_44, %76 : i32
    %78 = arith.index_cast %77 : i32 to index
    %c0_45 = arith.constant 0 : index
    %79 = vector.load %arg1[%78, %c0_45] : memref<50x32xf32, #tpu.memory_space<vmem>>, vector<1x32xf32>
    %80 = tpu.concatenate %4, %9, %14, %19, %24, %29, %34, %39, %44, %49, %54, %59, %64, %69, %74, %79 in 0 : vector<1x32xf32>, vector<1x32xf32>, vector<1x32xf32>, vector<1x32xf32>, vector<1x32xf32>, vector<1x32xf32>, vector<1x32xf32>, vector<1x32xf32>, vector<1x32xf32>, vector<1x32xf32>, vector<1x32xf32>, vector<1x32xf32>, vector<1x32xf32>, vector<1x32xf32>, vector<1x32xf32>, vector<1x32xf32> -> vector<16x32xf32>
    %c0_46 = arith.constant 0 : index
    %c0_47 = arith.constant 0 : index
    %81 = vector.load %arg2[%c0_46, %c0_47] : memref<32x256xf32, #tpu.memory_space<vmem>>, vector<32x256xf32>
    %cst = arith.constant dense<0.000000e+00> : vector<16x256xf32>
    %82 = tpu.matmul %80, %81, %cst {dimension_numbers = #tpu.dot_dimension_numbers<[1], [0], [0], [1], [0, 0, 1, 1], [], []>} : vector<16x32xf32>, vector<32x256xf32>, vector<16x256xf32> -> vector<16x256xf32>
    %c0_48 = arith.constant 0 : index
    %c0_49 = arith.constant 0 : index
    %83 = vector.load %arg3[%c0_48, %c0_49] : memref<1x256xf32, #tpu.memory_space<vmem>>, vector<1x256xf32>
    %84 = vector.broadcast %83 : vector<1x256xf32> to vector<16x256xf32>
    %85 = arith.addf %82, %84 : vector<16x256xf32>
    %cst_50 = arith.constant 0.000000e+00 : f32
    %86 = vector.broadcast %cst_50 : f32 to vector<2x32xf32>
    %c0_51 = arith.constant 0 : index
    %c0_52 = arith.constant 0 : index
    %c0_53 = arith.constant 0 : index
    %87 = vector.load %arg4[%c0_51, %c0_52, %c0_53] : memref<2x32x128xf32, #tpu.memory_space<vmem>>, vector<1x32x128xf32>
    %88 = vector.shape_cast %87 : vector<1x32x128xf32> to vector<32x128xf32>
    %c1_54 = arith.constant 1 : index
    %c0_55 = arith.constant 0 : index
    %c0_56 = arith.constant 0 : index
    %89 = vector.load %arg4[%c1_54, %c0_55, %c0_56] : memref<2x32x128xf32, #tpu.memory_space<vmem>>, vector<1x32x128xf32>
    %90 = vector.shape_cast %89 : vector<1x32x128xf32> to vector<32x128xf32>
    %91 = vector.extract_strided_slice %85 {offsets = [0, 0], sizes = [2, 128], strides = [1, 1]} : vector<16x256xf32> to vector<2x128xf32>
    %cst_57 = arith.constant dense<0.000000e+00> : vector<2x128xf32>
    %92 = tpu.matmul %86, %88, %cst_57 {dimension_numbers = #tpu.dot_dimension_numbers<[1], [0], [0], [1], [0, 0, 1, 1], [], []>} : vector<2x32xf32>, vector<32x128xf32>, vector<2x128xf32> -> vector<2x128xf32>
    %93 = arith.addf %91, %92 : vector<2x128xf32>
    %94 = arith.negf %93 : vector<2x128xf32>
    %95 = math.exp %94 : vector<2x128xf32>
    %cst_58 = arith.constant 1.000000e+00 : f32
    %96 = vector.broadcast %cst_58 : f32 to vector<2x128xf32>
    %97 = arith.addf %96, %95 : vector<2x128xf32>
    %98 = arith.divf %96, %97 : vector<2x128xf32>
    %99 = math.tanh %93 : vector<2x128xf32>
    %100 = vector.extract_strided_slice %98 {offsets = [0, 0], sizes = [2, 32], strides = [1, 1]} : vector<2x128xf32> to vector<2x32xf32>
    %101 = vector.extract_strided_slice %98 {offsets = [0, 32], sizes = [2, 32], strides = [1, 1]} : vector<2x128xf32> to vector<2x32xf32>
    %102 = vector.extract_strided_slice %99 {offsets = [0, 64], sizes = [2, 32], strides = [1, 1]} : vector<2x128xf32> to vector<2x32xf32>
    %103 = vector.extract_strided_slice %98 {offsets = [0, 96], sizes = [2, 32], strides = [1, 1]} : vector<2x128xf32> to vector<2x32xf32>
    %104 = arith.mulf %101, %86 : vector<2x32xf32>
    %105 = arith.mulf %100, %102 : vector<2x32xf32>
    %106 = arith.addf %104, %105 : vector<2x32xf32>
    %107 = math.tanh %106 : vector<2x32xf32>
    %108 = arith.mulf %103, %107 : vector<2x32xf32>
    %109 = vector.extract_strided_slice %85 {offsets = [14, 128], sizes = [2, 128], strides = [1, 1]} : vector<16x256xf32> to vector<2x128xf32>
    %cst_59 = arith.constant dense<0.000000e+00> : vector<2x128xf32>
    %110 = tpu.matmul %86, %90, %cst_59 {dimension_numbers = #tpu.dot_dimension_numbers<[1], [0], [0], [1], [0, 0, 1, 1], [], []>} : vector<2x32xf32>, vector<32x128xf32>, vector<2x128xf32> -> vector<2x128xf32>
    %111 = arith.addf %109, %110 : vector<2x128xf32>
    %112 = arith.negf %111 : vector<2x128xf32>
    %113 = math.exp %112 : vector<2x128xf32>
    %cst_60 = arith.constant 1.000000e+00 : f32
    %114 = vector.broadcast %cst_60 : f32 to vector<2x128xf32>
    %115 = arith.addf %114, %113 : vector<2x128xf32>
    %116 = arith.divf %114, %115 : vector<2x128xf32>
    %117 = math.tanh %111 : vector<2x128xf32>
    %118 = vector.extract_strided_slice %116 {offsets = [0, 0], sizes = [2, 32], strides = [1, 1]} : vector<2x128xf32> to vector<2x32xf32>
    %119 = vector.extract_strided_slice %116 {offsets = [0, 32], sizes = [2, 32], strides = [1, 1]} : vector<2x128xf32> to vector<2x32xf32>
    %120 = vector.extract_strided_slice %117 {offsets = [0, 64], sizes = [2, 32], strides = [1, 1]} : vector<2x128xf32> to vector<2x32xf32>
    %121 = vector.extract_strided_slice %116 {offsets = [0, 96], sizes = [2, 32], strides = [1, 1]} : vector<2x128xf32> to vector<2x32xf32>
    %122 = arith.mulf %119, %86 : vector<2x32xf32>
    %123 = arith.mulf %118, %120 : vector<2x32xf32>
    %124 = arith.addf %122, %123 : vector<2x32xf32>
    %125 = math.tanh %124 : vector<2x32xf32>
    %126 = arith.mulf %121, %125 : vector<2x32xf32>
    %127 = vector.extract_strided_slice %85 {offsets = [2, 0], sizes = [2, 128], strides = [1, 1]} : vector<16x256xf32> to vector<2x128xf32>
    %cst_61 = arith.constant dense<0.000000e+00> : vector<2x128xf32>
    %128 = tpu.matmul %108, %88, %cst_61 {dimension_numbers = #tpu.dot_dimension_numbers<[1], [0], [0], [1], [0, 0, 1, 1], [], []>} : vector<2x32xf32>, vector<32x128xf32>, vector<2x128xf32> -> vector<2x128xf32>
    %129 = arith.addf %127, %128 : vector<2x128xf32>
    %130 = arith.negf %129 : vector<2x128xf32>
    %131 = math.exp %130 : vector<2x128xf32>
    %cst_62 = arith.constant 1.000000e+00 : f32
    %132 = vector.broadcast %cst_62 : f32 to vector<2x128xf32>
    %133 = arith.addf %132, %131 : vector<2x128xf32>
    %134 = arith.divf %132, %133 : vector<2x128xf32>
    %135 = math.tanh %129 : vector<2x128xf32>
    %136 = vector.extract_strided_slice %134 {offsets = [0, 0], sizes = [2, 32], strides = [1, 1]} : vector<2x128xf32> to vector<2x32xf32>
    %137 = vector.extract_strided_slice %134 {offsets = [0, 32], sizes = [2, 32], strides = [1, 1]} : vector<2x128xf32> to vector<2x32xf32>
    %138 = vector.extract_strided_slice %135 {offsets = [0, 64], sizes = [2, 32], strides = [1, 1]} : vector<2x128xf32> to vector<2x32xf32>
    %139 = vector.extract_strided_slice %134 {offsets = [0, 96], sizes = [2, 32], strides = [1, 1]} : vector<2x128xf32> to vector<2x32xf32>
    %140 = arith.mulf %137, %106 : vector<2x32xf32>
    %141 = arith.mulf %136, %138 : vector<2x32xf32>
    %142 = arith.addf %140, %141 : vector<2x32xf32>
    %143 = math.tanh %142 : vector<2x32xf32>
    %144 = arith.mulf %139, %143 : vector<2x32xf32>
    %145 = vector.extract_strided_slice %85 {offsets = [12, 128], sizes = [2, 128], strides = [1, 1]} : vector<16x256xf32> to vector<2x128xf32>
    %cst_63 = arith.constant dense<0.000000e+00> : vector<2x128xf32>
    %146 = tpu.matmul %126, %90, %cst_63 {dimension_numbers = #tpu.dot_dimension_numbers<[1], [0], [0], [1], [0, 0, 1, 1], [], []>} : vector<2x32xf32>, vector<32x128xf32>, vector<2x128xf32> -> vector<2x128xf32>
    %147 = arith.addf %145, %146 : vector<2x128xf32>
    %148 = arith.negf %147 : vector<2x128xf32>
    %149 = math.exp %148 : vector<2x128xf32>
    %cst_64 = arith.constant 1.000000e+00 : f32
    %150 = vector.broadcast %cst_64 : f32 to vector<2x128xf32>
    %151 = arith.addf %150, %149 : vector<2x128xf32>
    %152 = arith.divf %150, %151 : vector<2x128xf32>
    %153 = math.tanh %147 : vector<2x128xf32>
    %154 = vector.extract_strided_slice %152 {offsets = [0, 0], sizes = [2, 32], strides = [1, 1]} : vector<2x128xf32> to vector<2x32xf32>
    %155 = vector.extract_strided_slice %152 {offsets = [0, 32], sizes = [2, 32], strides = [1, 1]} : vector<2x128xf32> to vector<2x32xf32>
    %156 = vector.extract_strided_slice %153 {offsets = [0, 64], sizes = [2, 32], strides = [1, 1]} : vector<2x128xf32> to vector<2x32xf32>
    %157 = vector.extract_strided_slice %152 {offsets = [0, 96], sizes = [2, 32], strides = [1, 1]} : vector<2x128xf32> to vector<2x32xf32>
    %158 = arith.mulf %155, %124 : vector<2x32xf32>
    %159 = arith.mulf %154, %156 : vector<2x32xf32>
    %160 = arith.addf %158, %159 : vector<2x32xf32>
    %161 = math.tanh %160 : vector<2x32xf32>
    %162 = arith.mulf %157, %161 : vector<2x32xf32>
    %163 = vector.extract_strided_slice %85 {offsets = [4, 0], sizes = [2, 128], strides = [1, 1]} : vector<16x256xf32> to vector<2x128xf32>
    %cst_65 = arith.constant dense<0.000000e+00> : vector<2x128xf32>
    %164 = tpu.matmul %144, %88, %cst_65 {dimension_numbers = #tpu.dot_dimension_numbers<[1], [0], [0], [1], [0, 0, 1, 1], [], []>} : vector<2x32xf32>, vector<32x128xf32>, vector<2x128xf32> -> vector<2x128xf32>
    %165 = arith.addf %163, %164 : vector<2x128xf32>
    %166 = arith.negf %165 : vector<2x128xf32>
    %167 = math.exp %166 : vector<2x128xf32>
    %cst_66 = arith.constant 1.000000e+00 : f32
    %168 = vector.broadcast %cst_66 : f32 to vector<2x128xf32>
    %169 = arith.addf %168, %167 : vector<2x128xf32>
    %170 = arith.divf %168, %169 : vector<2x128xf32>
    %171 = math.tanh %165 : vector<2x128xf32>
    %172 = vector.extract_strided_slice %170 {offsets = [0, 0], sizes = [2, 32], strides = [1, 1]} : vector<2x128xf32> to vector<2x32xf32>
    %173 = vector.extract_strided_slice %170 {offsets = [0, 32], sizes = [2, 32], strides = [1, 1]} : vector<2x128xf32> to vector<2x32xf32>
    %174 = vector.extract_strided_slice %171 {offsets = [0, 64], sizes = [2, 32], strides = [1, 1]} : vector<2x128xf32> to vector<2x32xf32>
    %175 = vector.extract_strided_slice %170 {offsets = [0, 96], sizes = [2, 32], strides = [1, 1]} : vector<2x128xf32> to vector<2x32xf32>
    %176 = arith.mulf %173, %142 : vector<2x32xf32>
    %177 = arith.mulf %172, %174 : vector<2x32xf32>
    %178 = arith.addf %176, %177 : vector<2x32xf32>
    %179 = math.tanh %178 : vector<2x32xf32>
    %180 = arith.mulf %175, %179 : vector<2x32xf32>
    %181 = vector.extract_strided_slice %85 {offsets = [10, 128], sizes = [2, 128], strides = [1, 1]} : vector<16x256xf32> to vector<2x128xf32>
    %cst_67 = arith.constant dense<0.000000e+00> : vector<2x128xf32>
    %182 = tpu.matmul %162, %90, %cst_67 {dimension_numbers = #tpu.dot_dimension_numbers<[1], [0], [0], [1], [0, 0, 1, 1], [], []>} : vector<2x32xf32>, vector<32x128xf32>, vector<2x128xf32> -> vector<2x128xf32>
    %183 = arith.addf %181, %182 : vector<2x128xf32>
    %184 = arith.negf %183 : vector<2x128xf32>
    %185 = math.exp %184 : vector<2x128xf32>
    %cst_68 = arith.constant 1.000000e+00 : f32
    %186 = vector.broadcast %cst_68 : f32 to vector<2x128xf32>
    %187 = arith.addf %186, %185 : vector<2x128xf32>
    %188 = arith.divf %186, %187 : vector<2x128xf32>
    %189 = math.tanh %183 : vector<2x128xf32>
    %190 = vector.extract_strided_slice %188 {offsets = [0, 0], sizes = [2, 32], strides = [1, 1]} : vector<2x128xf32> to vector<2x32xf32>
    %191 = vector.extract_strided_slice %188 {offsets = [0, 32], sizes = [2, 32], strides = [1, 1]} : vector<2x128xf32> to vector<2x32xf32>
    %192 = vector.extract_strided_slice %189 {offsets = [0, 64], sizes = [2, 32], strides = [1, 1]} : vector<2x128xf32> to vector<2x32xf32>
    %193 = vector.extract_strided_slice %188 {offsets = [0, 96], sizes = [2, 32], strides = [1, 1]} : vector<2x128xf32> to vector<2x32xf32>
    %194 = arith.mulf %191, %160 : vector<2x32xf32>
    %195 = arith.mulf %190, %192 : vector<2x32xf32>
    %196 = arith.addf %194, %195 : vector<2x32xf32>
    %197 = math.tanh %196 : vector<2x32xf32>
    %198 = arith.mulf %193, %197 : vector<2x32xf32>
    %199 = vector.extract_strided_slice %85 {offsets = [6, 0], sizes = [2, 128], strides = [1, 1]} : vector<16x256xf32> to vector<2x128xf32>
    %cst_69 = arith.constant dense<0.000000e+00> : vector<2x128xf32>
    %200 = tpu.matmul %180, %88, %cst_69 {dimension_numbers = #tpu.dot_dimension_numbers<[1], [0], [0], [1], [0, 0, 1, 1], [], []>} : vector<2x32xf32>, vector<32x128xf32>, vector<2x128xf32> -> vector<2x128xf32>
    %201 = arith.addf %199, %200 : vector<2x128xf32>
    %202 = arith.negf %201 : vector<2x128xf32>
    %203 = math.exp %202 : vector<2x128xf32>
    %cst_70 = arith.constant 1.000000e+00 : f32
    %204 = vector.broadcast %cst_70 : f32 to vector<2x128xf32>
    %205 = arith.addf %204, %203 : vector<2x128xf32>
    %206 = arith.divf %204, %205 : vector<2x128xf32>
    %207 = math.tanh %201 : vector<2x128xf32>
    %208 = vector.extract_strided_slice %206 {offsets = [0, 0], sizes = [2, 32], strides = [1, 1]} : vector<2x128xf32> to vector<2x32xf32>
    %209 = vector.extract_strided_slice %206 {offsets = [0, 32], sizes = [2, 32], strides = [1, 1]} : vector<2x128xf32> to vector<2x32xf32>
    %210 = vector.extract_strided_slice %207 {offsets = [0, 64], sizes = [2, 32], strides = [1, 1]} : vector<2x128xf32> to vector<2x32xf32>
    %211 = vector.extract_strided_slice %206 {offsets = [0, 96], sizes = [2, 32], strides = [1, 1]} : vector<2x128xf32> to vector<2x32xf32>
    %212 = arith.mulf %209, %178 : vector<2x32xf32>
    %213 = arith.mulf %208, %210 : vector<2x32xf32>
    %214 = arith.addf %212, %213 : vector<2x32xf32>
    %215 = math.tanh %214 : vector<2x32xf32>
    %216 = arith.mulf %211, %215 : vector<2x32xf32>
    %217 = vector.extract_strided_slice %85 {offsets = [8, 128], sizes = [2, 128], strides = [1, 1]} : vector<16x256xf32> to vector<2x128xf32>
    %cst_71 = arith.constant dense<0.000000e+00> : vector<2x128xf32>
    %218 = tpu.matmul %198, %90, %cst_71 {dimension_numbers = #tpu.dot_dimension_numbers<[1], [0], [0], [1], [0, 0, 1, 1], [], []>} : vector<2x32xf32>, vector<32x128xf32>, vector<2x128xf32> -> vector<2x128xf32>
    %219 = arith.addf %217, %218 : vector<2x128xf32>
    %220 = arith.negf %219 : vector<2x128xf32>
    %221 = math.exp %220 : vector<2x128xf32>
    %cst_72 = arith.constant 1.000000e+00 : f32
    %222 = vector.broadcast %cst_72 : f32 to vector<2x128xf32>
    %223 = arith.addf %222, %221 : vector<2x128xf32>
    %224 = arith.divf %222, %223 : vector<2x128xf32>
    %225 = math.tanh %219 : vector<2x128xf32>
    %226 = vector.extract_strided_slice %224 {offsets = [0, 0], sizes = [2, 32], strides = [1, 1]} : vector<2x128xf32> to vector<2x32xf32>
    %227 = vector.extract_strided_slice %224 {offsets = [0, 32], sizes = [2, 32], strides = [1, 1]} : vector<2x128xf32> to vector<2x32xf32>
    %228 = vector.extract_strided_slice %225 {offsets = [0, 64], sizes = [2, 32], strides = [1, 1]} : vector<2x128xf32> to vector<2x32xf32>
    %229 = vector.extract_strided_slice %224 {offsets = [0, 96], sizes = [2, 32], strides = [1, 1]} : vector<2x128xf32> to vector<2x32xf32>
    %230 = arith.mulf %227, %196 : vector<2x32xf32>
    %231 = arith.mulf %226, %228 : vector<2x32xf32>
    %232 = arith.addf %230, %231 : vector<2x32xf32>
    %233 = math.tanh %232 : vector<2x32xf32>
    %234 = arith.mulf %229, %233 : vector<2x32xf32>
    %235 = vector.extract_strided_slice %85 {offsets = [8, 0], sizes = [2, 128], strides = [1, 1]} : vector<16x256xf32> to vector<2x128xf32>
    %cst_73 = arith.constant dense<0.000000e+00> : vector<2x128xf32>
    %236 = tpu.matmul %216, %88, %cst_73 {dimension_numbers = #tpu.dot_dimension_numbers<[1], [0], [0], [1], [0, 0, 1, 1], [], []>} : vector<2x32xf32>, vector<32x128xf32>, vector<2x128xf32> -> vector<2x128xf32>
    %237 = arith.addf %235, %236 : vector<2x128xf32>
    %238 = arith.negf %237 : vector<2x128xf32>
    %239 = math.exp %238 : vector<2x128xf32>
    %cst_74 = arith.constant 1.000000e+00 : f32
    %240 = vector.broadcast %cst_74 : f32 to vector<2x128xf32>
    %241 = arith.addf %240, %239 : vector<2x128xf32>
    %242 = arith.divf %240, %241 : vector<2x128xf32>
    %243 = math.tanh %237 : vector<2x128xf32>
    %244 = vector.extract_strided_slice %242 {offsets = [0, 0], sizes = [2, 32], strides = [1, 1]} : vector<2x128xf32> to vector<2x32xf32>
    %245 = vector.extract_strided_slice %242 {offsets = [0, 32], sizes = [2, 32], strides = [1, 1]} : vector<2x128xf32> to vector<2x32xf32>
    %246 = vector.extract_strided_slice %243 {offsets = [0, 64], sizes = [2, 32], strides = [1, 1]} : vector<2x128xf32> to vector<2x32xf32>
    %247 = vector.extract_strided_slice %242 {offsets = [0, 96], sizes = [2, 32], strides = [1, 1]} : vector<2x128xf32> to vector<2x32xf32>
    %248 = arith.mulf %245, %214 : vector<2x32xf32>
    %249 = arith.mulf %244, %246 : vector<2x32xf32>
    %250 = arith.addf %248, %249 : vector<2x32xf32>
    %251 = math.tanh %250 : vector<2x32xf32>
    %252 = arith.mulf %247, %251 : vector<2x32xf32>
    %253 = vector.extract_strided_slice %85 {offsets = [6, 128], sizes = [2, 128], strides = [1, 1]} : vector<16x256xf32> to vector<2x128xf32>
    %cst_75 = arith.constant dense<0.000000e+00> : vector<2x128xf32>
    %254 = tpu.matmul %234, %90, %cst_75 {dimension_numbers = #tpu.dot_dimension_numbers<[1], [0], [0], [1], [0, 0, 1, 1], [], []>} : vector<2x32xf32>, vector<32x128xf32>, vector<2x128xf32> -> vector<2x128xf32>
    %255 = arith.addf %253, %254 : vector<2x128xf32>
    %256 = arith.negf %255 : vector<2x128xf32>
    %257 = math.exp %256 : vector<2x128xf32>
    %cst_76 = arith.constant 1.000000e+00 : f32
    %258 = vector.broadcast %cst_76 : f32 to vector<2x128xf32>
    %259 = arith.addf %258, %257 : vector<2x128xf32>
    %260 = arith.divf %258, %259 : vector<2x128xf32>
    %261 = math.tanh %255 : vector<2x128xf32>
    %262 = vector.extract_strided_slice %260 {offsets = [0, 0], sizes = [2, 32], strides = [1, 1]} : vector<2x128xf32> to vector<2x32xf32>
    %263 = vector.extract_strided_slice %260 {offsets = [0, 32], sizes = [2, 32], strides = [1, 1]} : vector<2x128xf32> to vector<2x32xf32>
    %264 = vector.extract_strided_slice %261 {offsets = [0, 64], sizes = [2, 32], strides = [1, 1]} : vector<2x128xf32> to vector<2x32xf32>
    %265 = vector.extract_strided_slice %260 {offsets = [0, 96], sizes = [2, 32], strides = [1, 1]} : vector<2x128xf32> to vector<2x32xf32>
    %266 = arith.mulf %263, %232 : vector<2x32xf32>
    %267 = arith.mulf %262, %264 : vector<2x32xf32>
    %268 = arith.addf %266, %267 : vector<2x32xf32>
    %269 = math.tanh %268 : vector<2x32xf32>
    %270 = arith.mulf %265, %269 : vector<2x32xf32>
    %271 = vector.extract_strided_slice %85 {offsets = [10, 0], sizes = [2, 128], strides = [1, 1]} : vector<16x256xf32> to vector<2x128xf32>
    %cst_77 = arith.constant dense<0.000000e+00> : vector<2x128xf32>
    %272 = tpu.matmul %252, %88, %cst_77 {dimension_numbers = #tpu.dot_dimension_numbers<[1], [0], [0], [1], [0, 0, 1, 1], [], []>} : vector<2x32xf32>, vector<32x128xf32>, vector<2x128xf32> -> vector<2x128xf32>
    %273 = arith.addf %271, %272 : vector<2x128xf32>
    %274 = arith.negf %273 : vector<2x128xf32>
    %275 = math.exp %274 : vector<2x128xf32>
    %cst_78 = arith.constant 1.000000e+00 : f32
    %276 = vector.broadcast %cst_78 : f32 to vector<2x128xf32>
    %277 = arith.addf %276, %275 : vector<2x128xf32>
    %278 = arith.divf %276, %277 : vector<2x128xf32>
    %279 = math.tanh %273 : vector<2x128xf32>
    %280 = vector.extract_strided_slice %278 {offsets = [0, 0], sizes = [2, 32], strides = [1, 1]} : vector<2x128xf32> to vector<2x32xf32>
    %281 = vector.extract_strided_slice %278 {offsets = [0, 32], sizes = [2, 32], strides = [1, 1]} : vector<2x128xf32> to vector<2x32xf32>
    %282 = vector.extract_strided_slice %279 {offsets = [0, 64], sizes = [2, 32], strides = [1, 1]} : vector<2x128xf32> to vector<2x32xf32>
    %283 = vector.extract_strided_slice %278 {offsets = [0, 96], sizes = [2, 32], strides = [1, 1]} : vector<2x128xf32> to vector<2x32xf32>
    %284 = arith.mulf %281, %250 : vector<2x32xf32>
    %285 = arith.mulf %280, %282 : vector<2x32xf32>
    %286 = arith.addf %284, %285 : vector<2x32xf32>
    %287 = math.tanh %286 : vector<2x32xf32>
    %288 = arith.mulf %283, %287 : vector<2x32xf32>
    %289 = vector.extract_strided_slice %85 {offsets = [4, 128], sizes = [2, 128], strides = [1, 1]} : vector<16x256xf32> to vector<2x128xf32>
    %cst_79 = arith.constant dense<0.000000e+00> : vector<2x128xf32>
    %290 = tpu.matmul %270, %90, %cst_79 {dimension_numbers = #tpu.dot_dimension_numbers<[1], [0], [0], [1], [0, 0, 1, 1], [], []>} : vector<2x32xf32>, vector<32x128xf32>, vector<2x128xf32> -> vector<2x128xf32>
    %291 = arith.addf %289, %290 : vector<2x128xf32>
    %292 = arith.negf %291 : vector<2x128xf32>
    %293 = math.exp %292 : vector<2x128xf32>
    %cst_80 = arith.constant 1.000000e+00 : f32
    %294 = vector.broadcast %cst_80 : f32 to vector<2x128xf32>
    %295 = arith.addf %294, %293 : vector<2x128xf32>
    %296 = arith.divf %294, %295 : vector<2x128xf32>
    %297 = math.tanh %291 : vector<2x128xf32>
    %298 = vector.extract_strided_slice %296 {offsets = [0, 0], sizes = [2, 32], strides = [1, 1]} : vector<2x128xf32> to vector<2x32xf32>
    %299 = vector.extract_strided_slice %296 {offsets = [0, 32], sizes = [2, 32], strides = [1, 1]} : vector<2x128xf32> to vector<2x32xf32>
    %300 = vector.extract_strided_slice %297 {offsets = [0, 64], sizes = [2, 32], strides = [1, 1]} : vector<2x128xf32> to vector<2x32xf32>
    %301 = vector.extract_strided_slice %296 {offsets = [0, 96], sizes = [2, 32], strides = [1, 1]} : vector<2x128xf32> to vector<2x32xf32>
    %302 = arith.mulf %299, %268 : vector<2x32xf32>
    %303 = arith.mulf %298, %300 : vector<2x32xf32>
    %304 = arith.addf %302, %303 : vector<2x32xf32>
    %305 = math.tanh %304 : vector<2x32xf32>
    %306 = arith.mulf %301, %305 : vector<2x32xf32>
    %307 = vector.extract_strided_slice %85 {offsets = [12, 0], sizes = [2, 128], strides = [1, 1]} : vector<16x256xf32> to vector<2x128xf32>
    %cst_81 = arith.constant dense<0.000000e+00> : vector<2x128xf32>
    %308 = tpu.matmul %288, %88, %cst_81 {dimension_numbers = #tpu.dot_dimension_numbers<[1], [0], [0], [1], [0, 0, 1, 1], [], []>} : vector<2x32xf32>, vector<32x128xf32>, vector<2x128xf32> -> vector<2x128xf32>
    %309 = arith.addf %307, %308 : vector<2x128xf32>
    %310 = arith.negf %309 : vector<2x128xf32>
    %311 = math.exp %310 : vector<2x128xf32>
    %cst_82 = arith.constant 1.000000e+00 : f32
    %312 = vector.broadcast %cst_82 : f32 to vector<2x128xf32>
    %313 = arith.addf %312, %311 : vector<2x128xf32>
    %314 = arith.divf %312, %313 : vector<2x128xf32>
    %315 = math.tanh %309 : vector<2x128xf32>
    %316 = vector.extract_strided_slice %314 {offsets = [0, 0], sizes = [2, 32], strides = [1, 1]} : vector<2x128xf32> to vector<2x32xf32>
    %317 = vector.extract_strided_slice %314 {offsets = [0, 32], sizes = [2, 32], strides = [1, 1]} : vector<2x128xf32> to vector<2x32xf32>
    %318 = vector.extract_strided_slice %315 {offsets = [0, 64], sizes = [2, 32], strides = [1, 1]} : vector<2x128xf32> to vector<2x32xf32>
    %319 = vector.extract_strided_slice %314 {offsets = [0, 96], sizes = [2, 32], strides = [1, 1]} : vector<2x128xf32> to vector<2x32xf32>
    %320 = arith.mulf %317, %286 : vector<2x32xf32>
    %321 = arith.mulf %316, %318 : vector<2x32xf32>
    %322 = arith.addf %320, %321 : vector<2x32xf32>
    %323 = math.tanh %322 : vector<2x32xf32>
    %324 = arith.mulf %319, %323 : vector<2x32xf32>
    %325 = vector.extract_strided_slice %85 {offsets = [2, 128], sizes = [2, 128], strides = [1, 1]} : vector<16x256xf32> to vector<2x128xf32>
    %cst_83 = arith.constant dense<0.000000e+00> : vector<2x128xf32>
    %326 = tpu.matmul %306, %90, %cst_83 {dimension_numbers = #tpu.dot_dimension_numbers<[1], [0], [0], [1], [0, 0, 1, 1], [], []>} : vector<2x32xf32>, vector<32x128xf32>, vector<2x128xf32> -> vector<2x128xf32>
    %327 = arith.addf %325, %326 : vector<2x128xf32>
    %328 = arith.negf %327 : vector<2x128xf32>
    %329 = math.exp %328 : vector<2x128xf32>
    %cst_84 = arith.constant 1.000000e+00 : f32
    %330 = vector.broadcast %cst_84 : f32 to vector<2x128xf32>
    %331 = arith.addf %330, %329 : vector<2x128xf32>
    %332 = arith.divf %330, %331 : vector<2x128xf32>
    %333 = math.tanh %327 : vector<2x128xf32>
    %334 = vector.extract_strided_slice %332 {offsets = [0, 0], sizes = [2, 32], strides = [1, 1]} : vector<2x128xf32> to vector<2x32xf32>
    %335 = vector.extract_strided_slice %332 {offsets = [0, 32], sizes = [2, 32], strides = [1, 1]} : vector<2x128xf32> to vector<2x32xf32>
    %336 = vector.extract_strided_slice %333 {offsets = [0, 64], sizes = [2, 32], strides = [1, 1]} : vector<2x128xf32> to vector<2x32xf32>
    %337 = vector.extract_strided_slice %332 {offsets = [0, 96], sizes = [2, 32], strides = [1, 1]} : vector<2x128xf32> to vector<2x32xf32>
    %338 = arith.mulf %335, %304 : vector<2x32xf32>
    %339 = arith.mulf %334, %336 : vector<2x32xf32>
    %340 = arith.addf %338, %339 : vector<2x32xf32>
    %341 = math.tanh %340 : vector<2x32xf32>
    %342 = arith.mulf %337, %341 : vector<2x32xf32>
    %343 = vector.extract_strided_slice %85 {offsets = [14, 0], sizes = [2, 128], strides = [1, 1]} : vector<16x256xf32> to vector<2x128xf32>
    %cst_85 = arith.constant dense<0.000000e+00> : vector<2x128xf32>
    %344 = tpu.matmul %324, %88, %cst_85 {dimension_numbers = #tpu.dot_dimension_numbers<[1], [0], [0], [1], [0, 0, 1, 1], [], []>} : vector<2x32xf32>, vector<32x128xf32>, vector<2x128xf32> -> vector<2x128xf32>
    %345 = arith.addf %343, %344 : vector<2x128xf32>
    %346 = arith.negf %345 : vector<2x128xf32>
    %347 = math.exp %346 : vector<2x128xf32>
    %cst_86 = arith.constant 1.000000e+00 : f32
    %348 = vector.broadcast %cst_86 : f32 to vector<2x128xf32>
    %349 = arith.addf %348, %347 : vector<2x128xf32>
    %350 = arith.divf %348, %349 : vector<2x128xf32>
    %351 = math.tanh %345 : vector<2x128xf32>
    %352 = vector.extract_strided_slice %350 {offsets = [0, 0], sizes = [2, 32], strides = [1, 1]} : vector<2x128xf32> to vector<2x32xf32>
    %353 = vector.extract_strided_slice %350 {offsets = [0, 32], sizes = [2, 32], strides = [1, 1]} : vector<2x128xf32> to vector<2x32xf32>
    %354 = vector.extract_strided_slice %351 {offsets = [0, 64], sizes = [2, 32], strides = [1, 1]} : vector<2x128xf32> to vector<2x32xf32>
    %355 = vector.extract_strided_slice %350 {offsets = [0, 96], sizes = [2, 32], strides = [1, 1]} : vector<2x128xf32> to vector<2x32xf32>
    %356 = arith.mulf %353, %322 : vector<2x32xf32>
    %357 = arith.mulf %352, %354 : vector<2x32xf32>
    %358 = arith.addf %356, %357 : vector<2x32xf32>
    %359 = math.tanh %358 : vector<2x32xf32>
    %360 = arith.mulf %355, %359 : vector<2x32xf32>
    %361 = vector.extract_strided_slice %85 {offsets = [0, 128], sizes = [2, 128], strides = [1, 1]} : vector<16x256xf32> to vector<2x128xf32>
    %cst_87 = arith.constant dense<0.000000e+00> : vector<2x128xf32>
    %362 = tpu.matmul %342, %90, %cst_87 {dimension_numbers = #tpu.dot_dimension_numbers<[1], [0], [0], [1], [0, 0, 1, 1], [], []>} : vector<2x32xf32>, vector<32x128xf32>, vector<2x128xf32> -> vector<2x128xf32>
    %363 = arith.addf %361, %362 : vector<2x128xf32>
    %364 = arith.negf %363 : vector<2x128xf32>
    %365 = math.exp %364 : vector<2x128xf32>
    %cst_88 = arith.constant 1.000000e+00 : f32
    %366 = vector.broadcast %cst_88 : f32 to vector<2x128xf32>
    %367 = arith.addf %366, %365 : vector<2x128xf32>
    %368 = arith.divf %366, %367 : vector<2x128xf32>
    %369 = math.tanh %363 : vector<2x128xf32>
    %370 = vector.extract_strided_slice %368 {offsets = [0, 0], sizes = [2, 32], strides = [1, 1]} : vector<2x128xf32> to vector<2x32xf32>
    %371 = vector.extract_strided_slice %368 {offsets = [0, 32], sizes = [2, 32], strides = [1, 1]} : vector<2x128xf32> to vector<2x32xf32>
    %372 = vector.extract_strided_slice %369 {offsets = [0, 64], sizes = [2, 32], strides = [1, 1]} : vector<2x128xf32> to vector<2x32xf32>
    %373 = vector.extract_strided_slice %368 {offsets = [0, 96], sizes = [2, 32], strides = [1, 1]} : vector<2x128xf32> to vector<2x32xf32>
    %374 = arith.mulf %371, %340 : vector<2x32xf32>
    %375 = arith.mulf %370, %372 : vector<2x32xf32>
    %376 = arith.addf %374, %375 : vector<2x32xf32>
    %377 = math.tanh %376 : vector<2x32xf32>
    %378 = arith.mulf %373, %377 : vector<2x32xf32>
    %379 = tpu.concatenate %108, %144, %180, %216, %252, %288, %324, %360 in 0 : vector<2x32xf32>, vector<2x32xf32>, vector<2x32xf32>, vector<2x32xf32>, vector<2x32xf32>, vector<2x32xf32>, vector<2x32xf32>, vector<2x32xf32> -> vector<16x32xf32>
    %380 = tpu.concatenate %378, %342, %306, %270, %234, %198, %162, %126 in 0 : vector<2x32xf32>, vector<2x32xf32>, vector<2x32xf32>, vector<2x32xf32>, vector<2x32xf32>, vector<2x32xf32>, vector<2x32xf32>, vector<2x32xf32> -> vector<16x32xf32>
    %381 = tpu.concatenate %379, %380 in 1 : vector<16x32xf32>, vector<16x32xf32> -> vector<16x64xf32>
    %c0_89 = arith.constant 0 : index
    %c0_90 = arith.constant 0 : index
    %382 = vector.load %arg5[%c0_89, %c0_90] : memref<64x256xf32, #tpu.memory_space<vmem>>, vector<64x256xf32>
    %cst_91 = arith.constant dense<0.000000e+00> : vector<16x256xf32>
    %383 = tpu.matmul %381, %382, %cst_91 {dimension_numbers = #tpu.dot_dimension_numbers<[1], [0], [0], [1], [0, 0, 1, 1], [], []>} : vector<16x64xf32>, vector<64x256xf32>, vector<16x256xf32> -> vector<16x256xf32>
    %c0_92 = arith.constant 0 : index
    %c0_93 = arith.constant 0 : index
    %384 = vector.load %arg6[%c0_92, %c0_93] : memref<1x256xf32, #tpu.memory_space<vmem>>, vector<1x256xf32>
    %385 = vector.broadcast %384 : vector<1x256xf32> to vector<16x256xf32>
    %386 = arith.addf %383, %385 : vector<16x256xf32>
    %c0_94 = arith.constant 0 : index
    %c0_95 = arith.constant 0 : index
    %c0_96 = arith.constant 0 : index
    %387 = vector.load %arg7[%c0_94, %c0_95, %c0_96] : memref<2x32x128xf32, #tpu.memory_space<vmem>>, vector<1x32x128xf32>
    %388 = vector.shape_cast %387 : vector<1x32x128xf32> to vector<32x128xf32>
    %c1_97 = arith.constant 1 : index
    %c0_98 = arith.constant 0 : index
    %c0_99 = arith.constant 0 : index
    %389 = vector.load %arg7[%c1_97, %c0_98, %c0_99] : memref<2x32x128xf32, #tpu.memory_space<vmem>>, vector<1x32x128xf32>
    %390 = vector.shape_cast %389 : vector<1x32x128xf32> to vector<32x128xf32>
    %391 = vector.extract_strided_slice %386 {offsets = [0, 0], sizes = [2, 128], strides = [1, 1]} : vector<16x256xf32> to vector<2x128xf32>
    %cst_100 = arith.constant dense<0.000000e+00> : vector<2x128xf32>
    %392 = tpu.matmul %86, %388, %cst_100 {dimension_numbers = #tpu.dot_dimension_numbers<[1], [0], [0], [1], [0, 0, 1, 1], [], []>} : vector<2x32xf32>, vector<32x128xf32>, vector<2x128xf32> -> vector<2x128xf32>
    %393 = arith.addf %391, %392 : vector<2x128xf32>
    %394 = arith.negf %393 : vector<2x128xf32>
    %395 = math.exp %394 : vector<2x128xf32>
    %cst_101 = arith.constant 1.000000e+00 : f32
    %396 = vector.broadcast %cst_101 : f32 to vector<2x128xf32>
    %397 = arith.addf %396, %395 : vector<2x128xf32>
    %398 = arith.divf %396, %397 : vector<2x128xf32>
    %399 = math.tanh %393 : vector<2x128xf32>
    %400 = vector.extract_strided_slice %398 {offsets = [0, 0], sizes = [2, 32], strides = [1, 1]} : vector<2x128xf32> to vector<2x32xf32>
    %401 = vector.extract_strided_slice %398 {offsets = [0, 32], sizes = [2, 32], strides = [1, 1]} : vector<2x128xf32> to vector<2x32xf32>
    %402 = vector.extract_strided_slice %399 {offsets = [0, 64], sizes = [2, 32], strides = [1, 1]} : vector<2x128xf32> to vector<2x32xf32>
    %403 = vector.extract_strided_slice %398 {offsets = [0, 96], sizes = [2, 32], strides = [1, 1]} : vector<2x128xf32> to vector<2x32xf32>
    %404 = arith.mulf %401, %86 : vector<2x32xf32>
    %405 = arith.mulf %400, %402 : vector<2x32xf32>
    %406 = arith.addf %404, %405 : vector<2x32xf32>
    %407 = math.tanh %406 : vector<2x32xf32>
    %408 = arith.mulf %403, %407 : vector<2x32xf32>
    %409 = vector.extract_strided_slice %386 {offsets = [14, 128], sizes = [2, 128], strides = [1, 1]} : vector<16x256xf32> to vector<2x128xf32>
    %cst_102 = arith.constant dense<0.000000e+00> : vector<2x128xf32>
    %410 = tpu.matmul %86, %390, %cst_102 {dimension_numbers = #tpu.dot_dimension_numbers<[1], [0], [0], [1], [0, 0, 1, 1], [], []>} : vector<2x32xf32>, vector<32x128xf32>, vector<2x128xf32> -> vector<2x128xf32>
    %411 = arith.addf %409, %410 : vector<2x128xf32>
    %412 = arith.negf %411 : vector<2x128xf32>
    %413 = math.exp %412 : vector<2x128xf32>
    %cst_103 = arith.constant 1.000000e+00 : f32
    %414 = vector.broadcast %cst_103 : f32 to vector<2x128xf32>
    %415 = arith.addf %414, %413 : vector<2x128xf32>
    %416 = arith.divf %414, %415 : vector<2x128xf32>
    %417 = math.tanh %411 : vector<2x128xf32>
    %418 = vector.extract_strided_slice %416 {offsets = [0, 0], sizes = [2, 32], strides = [1, 1]} : vector<2x128xf32> to vector<2x32xf32>
    %419 = vector.extract_strided_slice %416 {offsets = [0, 32], sizes = [2, 32], strides = [1, 1]} : vector<2x128xf32> to vector<2x32xf32>
    %420 = vector.extract_strided_slice %417 {offsets = [0, 64], sizes = [2, 32], strides = [1, 1]} : vector<2x128xf32> to vector<2x32xf32>
    %421 = vector.extract_strided_slice %416 {offsets = [0, 96], sizes = [2, 32], strides = [1, 1]} : vector<2x128xf32> to vector<2x32xf32>
    %422 = arith.mulf %419, %86 : vector<2x32xf32>
    %423 = arith.mulf %418, %420 : vector<2x32xf32>
    %424 = arith.addf %422, %423 : vector<2x32xf32>
    %425 = math.tanh %424 : vector<2x32xf32>
    %426 = arith.mulf %421, %425 : vector<2x32xf32>
    %427 = vector.extract_strided_slice %386 {offsets = [2, 0], sizes = [2, 128], strides = [1, 1]} : vector<16x256xf32> to vector<2x128xf32>
    %cst_104 = arith.constant dense<0.000000e+00> : vector<2x128xf32>
    %428 = tpu.matmul %408, %388, %cst_104 {dimension_numbers = #tpu.dot_dimension_numbers<[1], [0], [0], [1], [0, 0, 1, 1], [], []>} : vector<2x32xf32>, vector<32x128xf32>, vector<2x128xf32> -> vector<2x128xf32>
    %429 = arith.addf %427, %428 : vector<2x128xf32>
    %430 = arith.negf %429 : vector<2x128xf32>
    %431 = math.exp %430 : vector<2x128xf32>
    %cst_105 = arith.constant 1.000000e+00 : f32
    %432 = vector.broadcast %cst_105 : f32 to vector<2x128xf32>
    %433 = arith.addf %432, %431 : vector<2x128xf32>
    %434 = arith.divf %432, %433 : vector<2x128xf32>
    %435 = math.tanh %429 : vector<2x128xf32>
    %436 = vector.extract_strided_slice %434 {offsets = [0, 0], sizes = [2, 32], strides = [1, 1]} : vector<2x128xf32> to vector<2x32xf32>
    %437 = vector.extract_strided_slice %434 {offsets = [0, 32], sizes = [2, 32], strides = [1, 1]} : vector<2x128xf32> to vector<2x32xf32>
    %438 = vector.extract_strided_slice %435 {offsets = [0, 64], sizes = [2, 32], strides = [1, 1]} : vector<2x128xf32> to vector<2x32xf32>
    %439 = vector.extract_strided_slice %434 {offsets = [0, 96], sizes = [2, 32], strides = [1, 1]} : vector<2x128xf32> to vector<2x32xf32>
    %440 = arith.mulf %437, %406 : vector<2x32xf32>
    %441 = arith.mulf %436, %438 : vector<2x32xf32>
    %442 = arith.addf %440, %441 : vector<2x32xf32>
    %443 = math.tanh %442 : vector<2x32xf32>
    %444 = arith.mulf %439, %443 : vector<2x32xf32>
    %445 = vector.extract_strided_slice %386 {offsets = [12, 128], sizes = [2, 128], strides = [1, 1]} : vector<16x256xf32> to vector<2x128xf32>
    %cst_106 = arith.constant dense<0.000000e+00> : vector<2x128xf32>
    %446 = tpu.matmul %426, %390, %cst_106 {dimension_numbers = #tpu.dot_dimension_numbers<[1], [0], [0], [1], [0, 0, 1, 1], [], []>} : vector<2x32xf32>, vector<32x128xf32>, vector<2x128xf32> -> vector<2x128xf32>
    %447 = arith.addf %445, %446 : vector<2x128xf32>
    %448 = arith.negf %447 : vector<2x128xf32>
    %449 = math.exp %448 : vector<2x128xf32>
    %cst_107 = arith.constant 1.000000e+00 : f32
    %450 = vector.broadcast %cst_107 : f32 to vector<2x128xf32>
    %451 = arith.addf %450, %449 : vector<2x128xf32>
    %452 = arith.divf %450, %451 : vector<2x128xf32>
    %453 = math.tanh %447 : vector<2x128xf32>
    %454 = vector.extract_strided_slice %452 {offsets = [0, 0], sizes = [2, 32], strides = [1, 1]} : vector<2x128xf32> to vector<2x32xf32>
    %455 = vector.extract_strided_slice %452 {offsets = [0, 32], sizes = [2, 32], strides = [1, 1]} : vector<2x128xf32> to vector<2x32xf32>
    %456 = vector.extract_strided_slice %453 {offsets = [0, 64], sizes = [2, 32], strides = [1, 1]} : vector<2x128xf32> to vector<2x32xf32>
    %457 = vector.extract_strided_slice %452 {offsets = [0, 96], sizes = [2, 32], strides = [1, 1]} : vector<2x128xf32> to vector<2x32xf32>
    %458 = arith.mulf %455, %424 : vector<2x32xf32>
    %459 = arith.mulf %454, %456 : vector<2x32xf32>
    %460 = arith.addf %458, %459 : vector<2x32xf32>
    %461 = math.tanh %460 : vector<2x32xf32>
    %462 = arith.mulf %457, %461 : vector<2x32xf32>
    %463 = vector.extract_strided_slice %386 {offsets = [4, 0], sizes = [2, 128], strides = [1, 1]} : vector<16x256xf32> to vector<2x128xf32>
    %cst_108 = arith.constant dense<0.000000e+00> : vector<2x128xf32>
    %464 = tpu.matmul %444, %388, %cst_108 {dimension_numbers = #tpu.dot_dimension_numbers<[1], [0], [0], [1], [0, 0, 1, 1], [], []>} : vector<2x32xf32>, vector<32x128xf32>, vector<2x128xf32> -> vector<2x128xf32>
    %465 = arith.addf %463, %464 : vector<2x128xf32>
    %466 = arith.negf %465 : vector<2x128xf32>
    %467 = math.exp %466 : vector<2x128xf32>
    %cst_109 = arith.constant 1.000000e+00 : f32
    %468 = vector.broadcast %cst_109 : f32 to vector<2x128xf32>
    %469 = arith.addf %468, %467 : vector<2x128xf32>
    %470 = arith.divf %468, %469 : vector<2x128xf32>
    %471 = math.tanh %465 : vector<2x128xf32>
    %472 = vector.extract_strided_slice %470 {offsets = [0, 0], sizes = [2, 32], strides = [1, 1]} : vector<2x128xf32> to vector<2x32xf32>
    %473 = vector.extract_strided_slice %470 {offsets = [0, 32], sizes = [2, 32], strides = [1, 1]} : vector<2x128xf32> to vector<2x32xf32>
    %474 = vector.extract_strided_slice %471 {offsets = [0, 64], sizes = [2, 32], strides = [1, 1]} : vector<2x128xf32> to vector<2x32xf32>
    %475 = vector.extract_strided_slice %470 {offsets = [0, 96], sizes = [2, 32], strides = [1, 1]} : vector<2x128xf32> to vector<2x32xf32>
    %476 = arith.mulf %473, %442 : vector<2x32xf32>
    %477 = arith.mulf %472, %474 : vector<2x32xf32>
    %478 = arith.addf %476, %477 : vector<2x32xf32>
    %479 = math.tanh %478 : vector<2x32xf32>
    %480 = arith.mulf %475, %479 : vector<2x32xf32>
    %481 = vector.extract_strided_slice %386 {offsets = [10, 128], sizes = [2, 128], strides = [1, 1]} : vector<16x256xf32> to vector<2x128xf32>
    %cst_110 = arith.constant dense<0.000000e+00> : vector<2x128xf32>
    %482 = tpu.matmul %462, %390, %cst_110 {dimension_numbers = #tpu.dot_dimension_numbers<[1], [0], [0], [1], [0, 0, 1, 1], [], []>} : vector<2x32xf32>, vector<32x128xf32>, vector<2x128xf32> -> vector<2x128xf32>
    %483 = arith.addf %481, %482 : vector<2x128xf32>
    %484 = arith.negf %483 : vector<2x128xf32>
    %485 = math.exp %484 : vector<2x128xf32>
    %cst_111 = arith.constant 1.000000e+00 : f32
    %486 = vector.broadcast %cst_111 : f32 to vector<2x128xf32>
    %487 = arith.addf %486, %485 : vector<2x128xf32>
    %488 = arith.divf %486, %487 : vector<2x128xf32>
    %489 = math.tanh %483 : vector<2x128xf32>
    %490 = vector.extract_strided_slice %488 {offsets = [0, 0], sizes = [2, 32], strides = [1, 1]} : vector<2x128xf32> to vector<2x32xf32>
    %491 = vector.extract_strided_slice %488 {offsets = [0, 32], sizes = [2, 32], strides = [1, 1]} : vector<2x128xf32> to vector<2x32xf32>
    %492 = vector.extract_strided_slice %489 {offsets = [0, 64], sizes = [2, 32], strides = [1, 1]} : vector<2x128xf32> to vector<2x32xf32>
    %493 = vector.extract_strided_slice %488 {offsets = [0, 96], sizes = [2, 32], strides = [1, 1]} : vector<2x128xf32> to vector<2x32xf32>
    %494 = arith.mulf %491, %460 : vector<2x32xf32>
    %495 = arith.mulf %490, %492 : vector<2x32xf32>
    %496 = arith.addf %494, %495 : vector<2x32xf32>
    %497 = math.tanh %496 : vector<2x32xf32>
    %498 = arith.mulf %493, %497 : vector<2x32xf32>
    %499 = vector.extract_strided_slice %386 {offsets = [6, 0], sizes = [2, 128], strides = [1, 1]} : vector<16x256xf32> to vector<2x128xf32>
    %cst_112 = arith.constant dense<0.000000e+00> : vector<2x128xf32>
    %500 = tpu.matmul %480, %388, %cst_112 {dimension_numbers = #tpu.dot_dimension_numbers<[1], [0], [0], [1], [0, 0, 1, 1], [], []>} : vector<2x32xf32>, vector<32x128xf32>, vector<2x128xf32> -> vector<2x128xf32>
    %501 = arith.addf %499, %500 : vector<2x128xf32>
    %502 = arith.negf %501 : vector<2x128xf32>
    %503 = math.exp %502 : vector<2x128xf32>
    %cst_113 = arith.constant 1.000000e+00 : f32
    %504 = vector.broadcast %cst_113 : f32 to vector<2x128xf32>
    %505 = arith.addf %504, %503 : vector<2x128xf32>
    %506 = arith.divf %504, %505 : vector<2x128xf32>
    %507 = math.tanh %501 : vector<2x128xf32>
    %508 = vector.extract_strided_slice %506 {offsets = [0, 0], sizes = [2, 32], strides = [1, 1]} : vector<2x128xf32> to vector<2x32xf32>
    %509 = vector.extract_strided_slice %506 {offsets = [0, 32], sizes = [2, 32], strides = [1, 1]} : vector<2x128xf32> to vector<2x32xf32>
    %510 = vector.extract_strided_slice %507 {offsets = [0, 64], sizes = [2, 32], strides = [1, 1]} : vector<2x128xf32> to vector<2x32xf32>
    %511 = vector.extract_strided_slice %506 {offsets = [0, 96], sizes = [2, 32], strides = [1, 1]} : vector<2x128xf32> to vector<2x32xf32>
    %512 = arith.mulf %509, %478 : vector<2x32xf32>
    %513 = arith.mulf %508, %510 : vector<2x32xf32>
    %514 = arith.addf %512, %513 : vector<2x32xf32>
    %515 = math.tanh %514 : vector<2x32xf32>
    %516 = arith.mulf %511, %515 : vector<2x32xf32>
    %517 = vector.extract_strided_slice %386 {offsets = [8, 128], sizes = [2, 128], strides = [1, 1]} : vector<16x256xf32> to vector<2x128xf32>
    %cst_114 = arith.constant dense<0.000000e+00> : vector<2x128xf32>
    %518 = tpu.matmul %498, %390, %cst_114 {dimension_numbers = #tpu.dot_dimension_numbers<[1], [0], [0], [1], [0, 0, 1, 1], [], []>} : vector<2x32xf32>, vector<32x128xf32>, vector<2x128xf32> -> vector<2x128xf32>
    %519 = arith.addf %517, %518 : vector<2x128xf32>
    %520 = arith.negf %519 : vector<2x128xf32>
    %521 = math.exp %520 : vector<2x128xf32>
    %cst_115 = arith.constant 1.000000e+00 : f32
    %522 = vector.broadcast %cst_115 : f32 to vector<2x128xf32>
    %523 = arith.addf %522, %521 : vector<2x128xf32>
    %524 = arith.divf %522, %523 : vector<2x128xf32>
    %525 = math.tanh %519 : vector<2x128xf32>
    %526 = vector.extract_strided_slice %524 {offsets = [0, 0], sizes = [2, 32], strides = [1, 1]} : vector<2x128xf32> to vector<2x32xf32>
    %527 = vector.extract_strided_slice %524 {offsets = [0, 32], sizes = [2, 32], strides = [1, 1]} : vector<2x128xf32> to vector<2x32xf32>
    %528 = vector.extract_strided_slice %525 {offsets = [0, 64], sizes = [2, 32], strides = [1, 1]} : vector<2x128xf32> to vector<2x32xf32>
    %529 = vector.extract_strided_slice %524 {offsets = [0, 96], sizes = [2, 32], strides = [1, 1]} : vector<2x128xf32> to vector<2x32xf32>
    %530 = arith.mulf %527, %496 : vector<2x32xf32>
    %531 = arith.mulf %526, %528 : vector<2x32xf32>
    %532 = arith.addf %530, %531 : vector<2x32xf32>
    %533 = math.tanh %532 : vector<2x32xf32>
    %534 = arith.mulf %529, %533 : vector<2x32xf32>
    %535 = vector.extract_strided_slice %386 {offsets = [8, 0], sizes = [2, 128], strides = [1, 1]} : vector<16x256xf32> to vector<2x128xf32>
    %cst_116 = arith.constant dense<0.000000e+00> : vector<2x128xf32>
    %536 = tpu.matmul %516, %388, %cst_116 {dimension_numbers = #tpu.dot_dimension_numbers<[1], [0], [0], [1], [0, 0, 1, 1], [], []>} : vector<2x32xf32>, vector<32x128xf32>, vector<2x128xf32> -> vector<2x128xf32>
    %537 = arith.addf %535, %536 : vector<2x128xf32>
    %538 = arith.negf %537 : vector<2x128xf32>
    %539 = math.exp %538 : vector<2x128xf32>
    %cst_117 = arith.constant 1.000000e+00 : f32
    %540 = vector.broadcast %cst_117 : f32 to vector<2x128xf32>
    %541 = arith.addf %540, %539 : vector<2x128xf32>
    %542 = arith.divf %540, %541 : vector<2x128xf32>
    %543 = math.tanh %537 : vector<2x128xf32>
    %544 = vector.extract_strided_slice %542 {offsets = [0, 0], sizes = [2, 32], strides = [1, 1]} : vector<2x128xf32> to vector<2x32xf32>
    %545 = vector.extract_strided_slice %542 {offsets = [0, 32], sizes = [2, 32], strides = [1, 1]} : vector<2x128xf32> to vector<2x32xf32>
    %546 = vector.extract_strided_slice %543 {offsets = [0, 64], sizes = [2, 32], strides = [1, 1]} : vector<2x128xf32> to vector<2x32xf32>
    %547 = vector.extract_strided_slice %542 {offsets = [0, 96], sizes = [2, 32], strides = [1, 1]} : vector<2x128xf32> to vector<2x32xf32>
    %548 = arith.mulf %545, %514 : vector<2x32xf32>
    %549 = arith.mulf %544, %546 : vector<2x32xf32>
    %550 = arith.addf %548, %549 : vector<2x32xf32>
    %551 = math.tanh %550 : vector<2x32xf32>
    %552 = arith.mulf %547, %551 : vector<2x32xf32>
    %553 = vector.extract_strided_slice %386 {offsets = [6, 128], sizes = [2, 128], strides = [1, 1]} : vector<16x256xf32> to vector<2x128xf32>
    %cst_118 = arith.constant dense<0.000000e+00> : vector<2x128xf32>
    %554 = tpu.matmul %534, %390, %cst_118 {dimension_numbers = #tpu.dot_dimension_numbers<[1], [0], [0], [1], [0, 0, 1, 1], [], []>} : vector<2x32xf32>, vector<32x128xf32>, vector<2x128xf32> -> vector<2x128xf32>
    %555 = arith.addf %553, %554 : vector<2x128xf32>
    %556 = arith.negf %555 : vector<2x128xf32>
    %557 = math.exp %556 : vector<2x128xf32>
    %cst_119 = arith.constant 1.000000e+00 : f32
    %558 = vector.broadcast %cst_119 : f32 to vector<2x128xf32>
    %559 = arith.addf %558, %557 : vector<2x128xf32>
    %560 = arith.divf %558, %559 : vector<2x128xf32>
    %561 = math.tanh %555 : vector<2x128xf32>
    %562 = vector.extract_strided_slice %560 {offsets = [0, 0], sizes = [2, 32], strides = [1, 1]} : vector<2x128xf32> to vector<2x32xf32>
    %563 = vector.extract_strided_slice %560 {offsets = [0, 32], sizes = [2, 32], strides = [1, 1]} : vector<2x128xf32> to vector<2x32xf32>
    %564 = vector.extract_strided_slice %561 {offsets = [0, 64], sizes = [2, 32], strides = [1, 1]} : vector<2x128xf32> to vector<2x32xf32>
    %565 = vector.extract_strided_slice %560 {offsets = [0, 96], sizes = [2, 32], strides = [1, 1]} : vector<2x128xf32> to vector<2x32xf32>
    %566 = arith.mulf %563, %532 : vector<2x32xf32>
    %567 = arith.mulf %562, %564 : vector<2x32xf32>
    %568 = arith.addf %566, %567 : vector<2x32xf32>
    %569 = math.tanh %568 : vector<2x32xf32>
    %570 = arith.mulf %565, %569 : vector<2x32xf32>
    %571 = vector.extract_strided_slice %386 {offsets = [10, 0], sizes = [2, 128], strides = [1, 1]} : vector<16x256xf32> to vector<2x128xf32>
    %cst_120 = arith.constant dense<0.000000e+00> : vector<2x128xf32>
    %572 = tpu.matmul %552, %388, %cst_120 {dimension_numbers = #tpu.dot_dimension_numbers<[1], [0], [0], [1], [0, 0, 1, 1], [], []>} : vector<2x32xf32>, vector<32x128xf32>, vector<2x128xf32> -> vector<2x128xf32>
    %573 = arith.addf %571, %572 : vector<2x128xf32>
    %574 = arith.negf %573 : vector<2x128xf32>
    %575 = math.exp %574 : vector<2x128xf32>
    %cst_121 = arith.constant 1.000000e+00 : f32
    %576 = vector.broadcast %cst_121 : f32 to vector<2x128xf32>
    %577 = arith.addf %576, %575 : vector<2x128xf32>
    %578 = arith.divf %576, %577 : vector<2x128xf32>
    %579 = math.tanh %573 : vector<2x128xf32>
    %580 = vector.extract_strided_slice %578 {offsets = [0, 0], sizes = [2, 32], strides = [1, 1]} : vector<2x128xf32> to vector<2x32xf32>
    %581 = vector.extract_strided_slice %578 {offsets = [0, 32], sizes = [2, 32], strides = [1, 1]} : vector<2x128xf32> to vector<2x32xf32>
    %582 = vector.extract_strided_slice %579 {offsets = [0, 64], sizes = [2, 32], strides = [1, 1]} : vector<2x128xf32> to vector<2x32xf32>
    %583 = vector.extract_strided_slice %578 {offsets = [0, 96], sizes = [2, 32], strides = [1, 1]} : vector<2x128xf32> to vector<2x32xf32>
    %584 = arith.mulf %581, %550 : vector<2x32xf32>
    %585 = arith.mulf %580, %582 : vector<2x32xf32>
    %586 = arith.addf %584, %585 : vector<2x32xf32>
    %587 = math.tanh %586 : vector<2x32xf32>
    %588 = arith.mulf %583, %587 : vector<2x32xf32>
    %589 = vector.extract_strided_slice %386 {offsets = [4, 128], sizes = [2, 128], strides = [1, 1]} : vector<16x256xf32> to vector<2x128xf32>
    %cst_122 = arith.constant dense<0.000000e+00> : vector<2x128xf32>
    %590 = tpu.matmul %570, %390, %cst_122 {dimension_numbers = #tpu.dot_dimension_numbers<[1], [0], [0], [1], [0, 0, 1, 1], [], []>} : vector<2x32xf32>, vector<32x128xf32>, vector<2x128xf32> -> vector<2x128xf32>
    %591 = arith.addf %589, %590 : vector<2x128xf32>
    %592 = arith.negf %591 : vector<2x128xf32>
    %593 = math.exp %592 : vector<2x128xf32>
    %cst_123 = arith.constant 1.000000e+00 : f32
    %594 = vector.broadcast %cst_123 : f32 to vector<2x128xf32>
    %595 = arith.addf %594, %593 : vector<2x128xf32>
    %596 = arith.divf %594, %595 : vector<2x128xf32>
    %597 = math.tanh %591 : vector<2x128xf32>
    %598 = vector.extract_strided_slice %596 {offsets = [0, 0], sizes = [2, 32], strides = [1, 1]} : vector<2x128xf32> to vector<2x32xf32>
    %599 = vector.extract_strided_slice %596 {offsets = [0, 32], sizes = [2, 32], strides = [1, 1]} : vector<2x128xf32> to vector<2x32xf32>
    %600 = vector.extract_strided_slice %597 {offsets = [0, 64], sizes = [2, 32], strides = [1, 1]} : vector<2x128xf32> to vector<2x32xf32>
    %601 = vector.extract_strided_slice %596 {offsets = [0, 96], sizes = [2, 32], strides = [1, 1]} : vector<2x128xf32> to vector<2x32xf32>
    %602 = arith.mulf %599, %568 : vector<2x32xf32>
    %603 = arith.mulf %598, %600 : vector<2x32xf32>
    %604 = arith.addf %602, %603 : vector<2x32xf32>
    %605 = math.tanh %604 : vector<2x32xf32>
    %606 = arith.mulf %601, %605 : vector<2x32xf32>
    %607 = vector.extract_strided_slice %386 {offsets = [12, 0], sizes = [2, 128], strides = [1, 1]} : vector<16x256xf32> to vector<2x128xf32>
    %cst_124 = arith.constant dense<0.000000e+00> : vector<2x128xf32>
    %608 = tpu.matmul %588, %388, %cst_124 {dimension_numbers = #tpu.dot_dimension_numbers<[1], [0], [0], [1], [0, 0, 1, 1], [], []>} : vector<2x32xf32>, vector<32x128xf32>, vector<2x128xf32> -> vector<2x128xf32>
    %609 = arith.addf %607, %608 : vector<2x128xf32>
    %610 = arith.negf %609 : vector<2x128xf32>
    %611 = math.exp %610 : vector<2x128xf32>
    %cst_125 = arith.constant 1.000000e+00 : f32
    %612 = vector.broadcast %cst_125 : f32 to vector<2x128xf32>
    %613 = arith.addf %612, %611 : vector<2x128xf32>
    %614 = arith.divf %612, %613 : vector<2x128xf32>
    %615 = math.tanh %609 : vector<2x128xf32>
    %616 = vector.extract_strided_slice %614 {offsets = [0, 0], sizes = [2, 32], strides = [1, 1]} : vector<2x128xf32> to vector<2x32xf32>
    %617 = vector.extract_strided_slice %614 {offsets = [0, 32], sizes = [2, 32], strides = [1, 1]} : vector<2x128xf32> to vector<2x32xf32>
    %618 = vector.extract_strided_slice %615 {offsets = [0, 64], sizes = [2, 32], strides = [1, 1]} : vector<2x128xf32> to vector<2x32xf32>
    %619 = vector.extract_strided_slice %614 {offsets = [0, 96], sizes = [2, 32], strides = [1, 1]} : vector<2x128xf32> to vector<2x32xf32>
    %620 = arith.mulf %617, %586 : vector<2x32xf32>
    %621 = arith.mulf %616, %618 : vector<2x32xf32>
    %622 = arith.addf %620, %621 : vector<2x32xf32>
    %623 = math.tanh %622 : vector<2x32xf32>
    %624 = arith.mulf %619, %623 : vector<2x32xf32>
    %625 = vector.extract_strided_slice %386 {offsets = [2, 128], sizes = [2, 128], strides = [1, 1]} : vector<16x256xf32> to vector<2x128xf32>
    %cst_126 = arith.constant dense<0.000000e+00> : vector<2x128xf32>
    %626 = tpu.matmul %606, %390, %cst_126 {dimension_numbers = #tpu.dot_dimension_numbers<[1], [0], [0], [1], [0, 0, 1, 1], [], []>} : vector<2x32xf32>, vector<32x128xf32>, vector<2x128xf32> -> vector<2x128xf32>
    %627 = arith.addf %625, %626 : vector<2x128xf32>
    %628 = arith.negf %627 : vector<2x128xf32>
    %629 = math.exp %628 : vector<2x128xf32>
    %cst_127 = arith.constant 1.000000e+00 : f32
    %630 = vector.broadcast %cst_127 : f32 to vector<2x128xf32>
    %631 = arith.addf %630, %629 : vector<2x128xf32>
    %632 = arith.divf %630, %631 : vector<2x128xf32>
    %633 = math.tanh %627 : vector<2x128xf32>
    %634 = vector.extract_strided_slice %632 {offsets = [0, 0], sizes = [2, 32], strides = [1, 1]} : vector<2x128xf32> to vector<2x32xf32>
    %635 = vector.extract_strided_slice %632 {offsets = [0, 32], sizes = [2, 32], strides = [1, 1]} : vector<2x128xf32> to vector<2x32xf32>
    %636 = vector.extract_strided_slice %633 {offsets = [0, 64], sizes = [2, 32], strides = [1, 1]} : vector<2x128xf32> to vector<2x32xf32>
    %637 = vector.extract_strided_slice %632 {offsets = [0, 96], sizes = [2, 32], strides = [1, 1]} : vector<2x128xf32> to vector<2x32xf32>
    %638 = arith.mulf %635, %604 : vector<2x32xf32>
    %639 = arith.mulf %634, %636 : vector<2x32xf32>
    %640 = arith.addf %638, %639 : vector<2x32xf32>
    %641 = math.tanh %640 : vector<2x32xf32>
    %642 = arith.mulf %637, %641 : vector<2x32xf32>
    %643 = vector.extract_strided_slice %386 {offsets = [14, 0], sizes = [2, 128], strides = [1, 1]} : vector<16x256xf32> to vector<2x128xf32>
    %cst_128 = arith.constant dense<0.000000e+00> : vector<2x128xf32>
    %644 = tpu.matmul %624, %388, %cst_128 {dimension_numbers = #tpu.dot_dimension_numbers<[1], [0], [0], [1], [0, 0, 1, 1], [], []>} : vector<2x32xf32>, vector<32x128xf32>, vector<2x128xf32> -> vector<2x128xf32>
    %645 = arith.addf %643, %644 : vector<2x128xf32>
    %646 = arith.negf %645 : vector<2x128xf32>
    %647 = math.exp %646 : vector<2x128xf32>
    %cst_129 = arith.constant 1.000000e+00 : f32
    %648 = vector.broadcast %cst_129 : f32 to vector<2x128xf32>
    %649 = arith.addf %648, %647 : vector<2x128xf32>
    %650 = arith.divf %648, %649 : vector<2x128xf32>
    %651 = math.tanh %645 : vector<2x128xf32>
    %652 = vector.extract_strided_slice %650 {offsets = [0, 0], sizes = [2, 32], strides = [1, 1]} : vector<2x128xf32> to vector<2x32xf32>
    %653 = vector.extract_strided_slice %650 {offsets = [0, 32], sizes = [2, 32], strides = [1, 1]} : vector<2x128xf32> to vector<2x32xf32>
    %654 = vector.extract_strided_slice %651 {offsets = [0, 64], sizes = [2, 32], strides = [1, 1]} : vector<2x128xf32> to vector<2x32xf32>
    %655 = vector.extract_strided_slice %650 {offsets = [0, 96], sizes = [2, 32], strides = [1, 1]} : vector<2x128xf32> to vector<2x32xf32>
    %656 = arith.mulf %653, %622 : vector<2x32xf32>
    %657 = arith.mulf %652, %654 : vector<2x32xf32>
    %658 = arith.addf %656, %657 : vector<2x32xf32>
    %659 = math.tanh %658 : vector<2x32xf32>
    %660 = arith.mulf %655, %659 : vector<2x32xf32>
    %661 = vector.extract_strided_slice %386 {offsets = [0, 128], sizes = [2, 128], strides = [1, 1]} : vector<16x256xf32> to vector<2x128xf32>
    %cst_130 = arith.constant dense<0.000000e+00> : vector<2x128xf32>
    %662 = tpu.matmul %642, %390, %cst_130 {dimension_numbers = #tpu.dot_dimension_numbers<[1], [0], [0], [1], [0, 0, 1, 1], [], []>} : vector<2x32xf32>, vector<32x128xf32>, vector<2x128xf32> -> vector<2x128xf32>
    %663 = arith.addf %661, %662 : vector<2x128xf32>
    %664 = arith.negf %663 : vector<2x128xf32>
    %665 = math.exp %664 : vector<2x128xf32>
    %cst_131 = arith.constant 1.000000e+00 : f32
    %666 = vector.broadcast %cst_131 : f32 to vector<2x128xf32>
    %667 = arith.addf %666, %665 : vector<2x128xf32>
    %668 = arith.divf %666, %667 : vector<2x128xf32>
    %669 = math.tanh %663 : vector<2x128xf32>
    %670 = vector.extract_strided_slice %668 {offsets = [0, 0], sizes = [2, 32], strides = [1, 1]} : vector<2x128xf32> to vector<2x32xf32>
    %671 = vector.extract_strided_slice %668 {offsets = [0, 32], sizes = [2, 32], strides = [1, 1]} : vector<2x128xf32> to vector<2x32xf32>
    %672 = vector.extract_strided_slice %669 {offsets = [0, 64], sizes = [2, 32], strides = [1, 1]} : vector<2x128xf32> to vector<2x32xf32>
    %673 = vector.extract_strided_slice %668 {offsets = [0, 96], sizes = [2, 32], strides = [1, 1]} : vector<2x128xf32> to vector<2x32xf32>
    %674 = arith.mulf %671, %640 : vector<2x32xf32>
    %675 = arith.mulf %670, %672 : vector<2x32xf32>
    %676 = arith.addf %674, %675 : vector<2x32xf32>
    %677 = math.tanh %676 : vector<2x32xf32>
    %678 = arith.mulf %673, %677 : vector<2x32xf32>
    %c0_132 = arith.constant 0 : index
    %c0_133 = arith.constant 0 : index
    %c0_134 = arith.constant 0 : index
    %679 = vector.load %arg8[%c0_132, %c0_133, %c0_134] : memref<2x32x32xf32, #tpu.memory_space<vmem>>, vector<1x32x32xf32>
    %680 = vector.shape_cast %679 : vector<1x32x32xf32> to vector<32x32xf32>
    %cst_135 = arith.constant dense<0.000000e+00> : vector<2x32xf32>
    %681 = tpu.matmul %660, %680, %cst_135 {dimension_numbers = #tpu.dot_dimension_numbers<[1], [0], [0], [1], [0, 0, 1, 1], [], []>} : vector<2x32xf32>, vector<32x32xf32>, vector<2x32xf32> -> vector<2x32xf32>
    %c1_136 = arith.constant 1 : index
    %c0_137 = arith.constant 0 : index
    %c0_138 = arith.constant 0 : index
    %682 = vector.load %arg8[%c1_136, %c0_137, %c0_138] : memref<2x32x32xf32, #tpu.memory_space<vmem>>, vector<1x32x32xf32>
    %683 = vector.shape_cast %682 : vector<1x32x32xf32> to vector<32x32xf32>
    %cst_139 = arith.constant dense<0.000000e+00> : vector<2x32xf32>
    %684 = tpu.matmul %678, %683, %cst_139 {dimension_numbers = #tpu.dot_dimension_numbers<[1], [0], [0], [1], [0, 0, 1, 1], [], []>} : vector<2x32xf32>, vector<32x32xf32>, vector<2x32xf32> -> vector<2x32xf32>
    %685 = arith.addf %681, %684 : vector<2x32xf32>
    %c0_140 = arith.constant 0 : index
    %c0_141 = arith.constant 0 : index
    %686 = vector.load %arg9[%c0_140, %c0_141] : memref<1x32xf32, #tpu.memory_space<vmem>>, vector<1x32xf32>
    %687 = vector.broadcast %686 : vector<1x32xf32> to vector<2x32xf32>
    %688 = arith.addf %685, %687 : vector<2x32xf32>
    %cst_142 = arith.constant 0.000000e+00 : f32
    %689 = vector.broadcast %cst_142 : f32 to vector<2x32xf32>
    %690 = arith.maximumf %688, %689 : vector<2x32xf32>
    %c0_143 = arith.constant 0 : index
    %c0_144 = arith.constant 0 : index
    %691 = vector.load %arg10[%c0_143, %c0_144] : memref<32x128xf32, #tpu.memory_space<vmem>>, vector<32x128xf32>
    %cst_145 = arith.constant dense<0.000000e+00> : vector<2x128xf32>
    %692 = tpu.matmul %690, %691, %cst_145 {dimension_numbers = #tpu.dot_dimension_numbers<[1], [0], [0], [1], [0, 0, 1, 1], [], []>} : vector<2x32xf32>, vector<32x128xf32>, vector<2x128xf32> -> vector<2x128xf32>
    %c0_146 = arith.constant 0 : index
    %c0_147 = arith.constant 0 : index
    %693 = vector.load %arg11[%c0_146, %c0_147] : memref<1x128xf32, #tpu.memory_space<vmem>>, vector<1x128xf32>
    %694 = vector.broadcast %693 : vector<1x128xf32> to vector<2x128xf32>
    %695 = arith.addf %692, %694 : vector<2x128xf32>
    %696 = arith.negf %695 : vector<2x128xf32>
    %697 = math.exp %696 : vector<2x128xf32>
    %cst_148 = arith.constant 1.000000e+00 : f32
    %698 = vector.broadcast %cst_148 : f32 to vector<2x128xf32>
    %699 = arith.addf %698, %697 : vector<2x128xf32>
    %700 = arith.divf %698, %699 : vector<2x128xf32>
    %c0_149 = arith.constant 0 : index
    %c0_150 = arith.constant 0 : index
    %701 = vector.load %arg12[%c0_149, %c0_150] : memref<2x128xf32, #tpu.memory_space<vmem>>, vector<2x128xf32>
    tpu.vector_store %arg12[%c0_149, %c0_150], %700 {strides = array<i32>} : memref<2x128xf32, #tpu.memory_space<vmem>>, vector<2x128xf32>,
    return
  }
}

</mosaic_0001>

<bundles_post_ra>
// kernel: discriminator_forward.1
= control target key start
LH: loop header
LB: loop body
LE: loop exit
PB: predicated region body
PF: predicated region fallthrough
CT: control target
= control target key end

     0   :  { %17 = vsyncpa [#allocation4], 0  ;;  %s6371_s0 = inlined_call_operand.vmem [shape: s32[16], index: 0, kind: input, shape index: {}]   ;;  %s6372_s1 = inlined_call_operand.vmem [shape: f32[50,32], index: 1, kind: input, shape index: {}]   ;;  %s6373_s2 = inlined_call_operand.vmem [shape: f32[32,256], index: 2, kind: input, shape index: {}]   ;;  %s6374_s3 = inlined_call_operand.vmem [shape: f32[1,256], index: 3, kind: input, shape index: {}]   ;;  %s6375_s4 = inlined_call_operand.hbm [shape: f32[2,32,128], index: 4, kind: input, shape index: {}]   ;;  %s6376_s5 = inlined_call_operand.hbm [shape: f32[64,256], index: 5, kind: input, shape index: {}]   ;;  %s6377_s6 = inlined_call_operand.vmem [shape: f32[1,256], index: 6, kind: input, shape index: {}]   ;;  %s6378_s7 = inlined_call_operand.hbm [shape: f32[2,32,128], index: 7, kind: input, shape index: {}]   ;;  %s6379_s8 = inlined_call_operand.hbm [shape: f32[2,32,32], index: 8, kind: input, shape index: {}]   ;;  %s6380_s9 = inlined_call_operand.vmem [shape: f32[1,32], index: 9, kind: input, shape index: {}]   ;;  %s6381_s10 = inlined_call_operand.vmem [shape: f32[32,128], index: 10, kind: input, shape index: {}]   ;;  %s6382_s11 = inlined_call_operand.vmem [shape: f32[1,128], index: 11, kind: input, shape index: {}]   ;;  %s6383_s12 = inlined_call_operand.vmem [shape: f32[2,128], index: 12, kind: output, shape index: {}]  }
   0x1   :  { %18 = vsyncpa [#allocation3], 0 }
   0x2   :  { %19 = vsyncpa [#allocation7], 0 }
   0x3   :  { %20 = vsyncpa [#allocation10], 0  ;;  %s5336_s21 = smov [#allocation6]   ;;  %s27_s25 = sshll.u32 %s6371_s0, 4  ;;  %s28_s25 = int_to_ptr.vmem [resolvable:$true] %s27_s25 }
   0x4   :  { %s54_s22 = sshll.u32 %s5336_s21, 4  ;;  %s55_s22 = int_to_ptr.vmem [resolvable:$true] %s54_s22 }
   0x5   :  { %s5244_s26 = scalar_lea.vmem %s55_s22, 2048  ;;  %p5249_p1 = scmp.lt.s32.totalorder %s55_s22, %s55_s22 }
   0x6   :  { %p5245_p0 = scmp.ne.s32.totalorder %s55_s22, %s5244_s26  ;;  %p5250_p2 = scmp.lt.s32.totalorder %s5244_s26, %s5244_s26 }
   0x8   :  { %p5251_p3 = por %p5250_p2, %p5249_p1 }
   0xa   :  { %p5252_p4 = pnand %p5251_p3, %p5245_p0 }
   0xc   :  { %5255 = shalt.err (!%p5252_p4)
}
   0xd   :  { %s5337_s27 = smov 256   ;;  %s5338_s28 = smov 16  }
   0xe   :  { %60 = dma.hbm_to_vmem [thread:$0]  %s6376_s5, 2048, %s55_s22, [#allocation7], %s5337_s27, %s5337_s27, %s5338_s28  }
   0xf   :  { %s5256_s13 = scalar_lea.vmem %s28_s25, 16  ;;  %p5261_p6 = scmp.lt.s32.totalorder %s28_s25, %s28_s25 }
  0x10   :  { %p5257_p5 = scmp.ne.s32.totalorder %s28_s25, %s5256_s13  ;;  %p5262_p7 = scmp.lt.s32.totalorder %s5256_s13, %s5256_s13 }
  0x12   :  { %p5263_p8 = por %p5262_p7, %p5261_p6 }
  0x14   :  { %p5264_p9 = pnand %p5263_p8, %p5257_p5 }
  0x16   :  { %5267 = shalt.err (!%p5264_p9)
}
  0x17   :  { %s5339_s0 = smov [#allocation2]   ;;  %s5340_s14 = smov [#allocation5]  }
  0x18   :  { %30 = dma.vmem_to_smem %s28_s25, 16, %s5339_s0, [#allocation4]  }
  0x19   :  { %s42_s15 = sshll.u32 %s5340_s14, 4  ;;  %s43_s15 = int_to_ptr.vmem [resolvable:$true] %s42_s15 }
  0x1a   :  { %s5276_s16 = scalar_lea.vmem %s43_s15, 1024  ;;  %p5281_p11 = scmp.lt.s32.totalorder %s43_s15, %s43_s15 }
  0x1b   :  { %p5277_p10 = scmp.ne.s32.totalorder %s43_s15, %s5276_s16  ;;  %p5282_p12 = scmp.lt.s32.totalorder %s5276_s16, %s5276_s16 }
  0x1d   :  { %p5283_p13 = por %p5282_p12, %p5281_p11 }
  0x1f   :  { %p5284_p0 = pnand %p5283_p13, %p5277_p10 }
  0x21   :  { %5287 = shalt.err (!%p5284_p0)
}
  0x22   :  { %s5341_s5 = smov 128   ;;  %s5342_s17 = smov 8  }
  0x23   :  { %48 = dma.hbm_to_vmem [thread:$0]  %s6375_s4, 1024, %s43_s15, [#allocation3], %s5341_s5, %s5341_s5, %s5342_s17  }
  0x24   :  { %s5343_s20 = smov [#allocation8]   ;;  %s5344_s22 = smov [#allocation9]  }
  0x25   :  { %s68_s21 = sshll.u32 %s5343_s20, 4  ;;  %s80_s23 = sshll.u32 %s5344_s22, 4  ;;  %s69_s21 = int_to_ptr.vmem [resolvable:$true] %s68_s21  ;;  %s81_s23 = int_to_ptr.vmem [resolvable:$true] %s80_s23 }
  0x26   :  { %s5296_s24 = scalar_lea.vmem %s69_s21, 1024  ;;  %p5301_p2 = scmp.lt.s32.totalorder %s69_s21, %s69_s21 }
  0x27   :  { %p5297_p1 = scmp.ne.s32.totalorder %s69_s21, %s5296_s24  ;;  %p5302_p3 = scmp.lt.s32.totalorder %s5296_s24, %s5296_s24 }
  0x29   :  { %p5303_p4 = por %p5302_p3, %p5301_p2 }
  0x2b   :  { %p5304_p5 = pnand %p5303_p4, %p5297_p1 }
  0x2d   :  { %5307 = shalt.err (!%p5304_p5)
}
  0x2e   :  { %74 = dma.hbm_to_vmem [thread:$0]  %s6378_s7, 1024, %s69_s21, [#allocation7], %s5341_s5, %s5341_s5, %s5342_s17  }
  0x2f   :  { %s5316_s27 = scalar_lea.vmem %s81_s23, 1024  ;;  %p5321_p7 = scmp.lt.s32.totalorder %s81_s23, %s81_s23 }
  0x30   :  { %p5317_p6 = scmp.ne.s32.totalorder %s81_s23, %s5316_s27  ;;  %p5322_p8 = scmp.lt.s32.totalorder %s5316_s27, %s5316_s27 }
  0x32   :  { %p5323_p9 = por %p5322_p8, %p5321_p7 }
  0x34   :  { %p5324_p10 = pnand %p5323_p9, %p5317_p6 }
  0x36   :  { %5327 = shalt.err (!%p5324_p10)
}
  0x37   :  { %86 = dma.hbm_to_vmem [thread:$0]  %s6379_s8, 1024, %s81_s23, [#allocation10], %s5341_s5, %s5341_s5, %s5342_s17  }
  0x38   :  { %5328 = dma.done.wait [#allocation4], 16  }
  0x39   :  { %5329 = vsyncadd [#allocation4], 4294967280 }
  0x3a   :  { %5330 = dma.done.wait [#allocation3], 1024  }
  0x3b   :  { %5331 = vsyncadd [#allocation3], 4294966272 }
  0x3c   :  { %5332 = dma.done.wait [#allocation7], 3072  }
  0x3d   :  { %5333 = vsyncadd [#allocation7], 4294964224 }
  0x3e   :  { %5334 = dma.done.wait [#allocation10], 1024  }
  0x3f   :  { %5335 = vsyncadd [#allocation10], 4294966272 }
  0x40   :  { %108 = sfence }
  0x41   :  { %v291_v0 = vld [vmem:[%s6373_s2 + $0x38] sm:$0xff]  ;;  %v290_v1 = vld [vmem:[%s6373_s2 + $0x30] sm:$0xff]  ;;  %v289_v2 = vld [vmem:[%s6373_s2 + $0x28] sm:$0xff]  ;;  %s5438_s8 = sld [smem:[#allocation2]]  ;;  %v5345_v4 = vmov 0.0   ;;  %vm5346_vm0 = vmmov 0   ;;  %v294_v63 = vlaneseq }
  0x42   :  { %335 = vmatprep.subr.mxu0 %v291_v0  ;;  %v288_v3 = vld [vmem:[%s6373_s2 + $0x20] sm:$0xff]  ;;  %4565 = vmatprep.subr.mxu1 %v5345_v4  ;;  %v5444_v5 = vld [vmem:[#allocation5 + $0x18] sm:$0xff]  ;;  %s5446_s5 = sld [smem:[#allocation2 + $0x8]]  ;;  %v5452_v7 = vld [vmem:[#allocation5 + $0x10] sm:$0xff]  ;;  %vm263_vm1 = vcmask 1040384   ;;  %vm265_vm2 = vcmask 1041408  }
  0x43   :  { %336 = vmatpush1.msra.mxu0 %v290_v1  ;;  %v287_v6 = vld [vmem:[%s6373_s2 + $0x18] sm:$0xff]  ;;  %4566 = vmatpush3.msra.mxu1 %v5444_v5  ;;  %s5454_s19 = sld [smem:[#allocation2 + $0x1]]  ;;  %v286_v8 = vld [vmem:[%s6373_s2 + $0x10] sm:$0xff]  ;;  %v285_v9 = vld [vmem:[%s6373_s2 + $0x8] sm:$0xff]  ;;  %vm267_vm3 = vcmask 1042432   ;;  %vm269_vm4 = vcmask 1043456  }
  0x44   :  { %337 = vmatprep.subr.mxu0 %v289_v2  ;;  %4567 = vmatprep.subr.mxu1 %v5345_v4  ;;  %s5460_s22 = sld [smem:[#allocation2 + $0x9]]  ;;  %v5466_v10 = vld [vmem:[#allocation5 + $0x8] sm:$0xff]  ;;  %v284_v11 = vld [vmem:[%s6373_s2] sm:$0xff]  ;;  %vm271_vm5 = vcmask 1044480   ;;  %vm273_vm6 = vcmask 1045504   ;;  %vm275_vm7 = vcmask 1046528  }
  0x45   :  { %338 = vmatpush1.msra.mxu0 %v288_v3  ;;  %4568 = vmatpush3.msra.mxu1 %v5452_v7  ;;  %s5468_s25 = sld [smem:[#allocation2 + $0x2]]  ;;  %v5479_v12 = vld [vmem:[#allocation5] sm:$0xff]  ;;  %vm304_vm8 = vcmask 261120   ;;  %v5563_v34 = vld [vmem:[#allocation5 + $0x38] sm:$0xff]  ;;  %v5569_v36 = vld [vmem:[#allocation5 + $0x30] sm:$0xff]  ;;  %v5635_v0 = vshrl.u32 %v294_v63, 7 }
  0x46   :  { %339 = vmatprep.subr.mxu0 %v287_v6  ;;  %4569 = vmatprep.subr.mxu1 %v5345_v4  ;;  %s5474_s4 = sld [smem:[#allocation2 + $0xa]]  ;;  %v5579_v37 = vld [vmem:[#allocation5 + $0x28] sm:$0xff]  ;;  %v5585_v38 = vld [vmem:[#allocation5 + $0x20] sm:$0xff]  ;;  %vm2137_vm9 = vcmask 523264  }
  0x47   :  { %340 = vmatpush1.msra.mxu0 %v286_v8  ;;  %375 = vmatprep.mubr.f32.mxu0 %v5345_v4  ;;  %p110_p11 = scmp.gt.s32.totalorder %s5438_s8, 0  ;;  %p4193_p12 = scmp.lt.s32.totalorder %s5438_s8, 49  ;;  %v300_v1 = vsub.s32 1, %v5635_v0  ;;  %v292_v2 = vld [vmem:[%s6374_s3] sm:$0x3] }
  0x48   :  { %341 = vmatprep.subr.mxu0 %v285_v9  ;;  %4570 = vmatpush3.msra.mxu1 %v5466_v10  ;;  %p117_p13 = scmp.gt.s32.totalorder %s5446_s5, 0  ;;  %p4199_p0 = scmp.lt.s32.totalorder %s5446_s5, 49 }
  0x49   :  { %342 = vmatpush1.msra.mxu0 %v284_v11  ;;  %s6385_s8 = smov (!%p110_p11, %s5438_s8), 0  ;;  %4571 = vmatprep.subr.mxu1 %v5345_v4  ;;  %p124_p1 = scmp.gt.s32.totalorder %s5454_s19, 0  ;;  %v301_v3 = vrot.slane %v292_v2, %v300_v1  ;;  %v296_v11 = vsub.s32 0, %v5635_v0 }
  0x4a   :  { %4576 = vmatprep.subr.mxu0 %v5345_v4  ;;  %s6387_s5 = smov (!%p117_p13, %s5446_s5), 0  ;;  %4572 = vmatpush3.msra.mxu1 %v5479_v12  ;;  %s6389_s8 = smov (!%p4193_p12, %s6385_s8), 49 }
  0x4b   :  { %4573 = vmatprep.mubr.msk.f32.mxu1 %vm5346_vm0, %v5345_v4  ;;  %4587 = vmatprep.subr.mxu1 %v5345_v4  ;;  %s6391_s5 = smov (!%p4199_p0, %s6387_s5), 49  ;;  %s114_s7 = scalar_lea.vmem %s6372_s1, %s6389_s8 }
  0x4c   :  { %4574 = vmatmul.mubr.f32.vlgmr.msra.gmra.mxu1 %v5345_v4  ;;  %s121_s13 = scalar_lea.vmem %s6372_s1, %s6391_s5  ;;  %p4205_p2 = scmp.lt.s32.totalorder %s5454_s19, 49  ;;  %v115_v16 = vld [vmem:[%s114_s7] sm:$0x1] }
  0x4d   :  { %4588 = vmatpush3.msra.mxu1 %v5444_v5  ;;  %4595 = vmatprep.mubr.msk.f32.mxu1 %vm5346_vm0, %v5345_v4  ;;  %s6393_s19 = smov (!%p124_p1, %s5454_s19), 0  ;;  %p131_p3 = scmp.gt.s32.totalorder %s5460_s22, 0  ;;  %v122_v13 = vld [vmem:[%s121_s13] sm:$0x1] }
  0x4e   :  { %4589 = vmatprep.subr.mxu1 %v5345_v4  ;;  %p4211_p4 = scmp.lt.s32.totalorder %s5460_s22, 49  ;;  %s6395_s19 = smov (!%p4205_p2, %s6393_s19), 49  ;;  %v222_v15 = vrot.slane %v122_v13, 7  ;;  %v297_v13 = vrot.slane %v292_v2, %v296_v11 }
  0x4f   :  { %4590 = vmatpush3.msra.mxu1 %v5452_v7  ;;  %s6397_s22 = smov (!%p131_p3, %s5460_s22), 0  ;;  %s128_s8 = scalar_lea.vmem %s6372_s1, %s6395_s19 }
  0x50   :  { %4591 = vmatprep.subr.mxu1 %v5345_v4  ;;  %p138_p5 = scmp.gt.s32.totalorder %s5468_s25, 0  ;;  %s6399_s22 = smov (!%p4211_p4, %s6397_s22), 49  ;;  %v129_v14 = vld [vmem:[%s128_s8] sm:$0x1]  ;;  %v264_v19 = vsel %vm263_vm1, %v115_v16, %v222_v15 }
  0x51   :  { %4592 = vmatpush3.msra.mxu1 %v5466_v10  ;;  %s135_s17 = scalar_lea.vmem %s6372_s1, %s6399_s22  ;;  %p4217_p6 = scmp.lt.s32.totalorder %s5468_s25, 49  ;;  %v225_v18 = vrot.slane %v129_v14, 6 }
  0x52   :  { %4593 = vmatprep.subr.mxu1 %v5345_v4  ;;  %s139_s15 = scalar_select %p138_p5, %s5468_s25, 0  ;;  %v136_v17 = vld [vmem:[%s135_s17] sm:$0x1] }
  0x53   :  { %4594 = vmatpush3.msra.mxu1 %v5479_v12  ;;  %p145_p7 = scmp.gt.s32.totalorder %s5474_s4, 0  ;;  %p4223_p8 = scmp.lt.s32.totalorder %s5474_s4, 49  ;;  %v228_v21 = vrot.slane %v136_v17, 5  ;;  %v266_v22 = vsel %vm265_vm2, %v264_v19, %v225_v18 }
  0x54   :  { %4609 = vmatprep.subr.mxu1 %v5345_v4  ;;  %s6401_s15 = smov (!%p4217_p6, %s139_s15), 49  ;;  %s4228_s21 = sld [smem:[#allocation2 + $0x3]] }
  0x55   :  { %s6403_s4 = smov (!%p145_p7, %s5474_s4), 0  ;;  %s142_s20 = scalar_lea.vmem %s6372_s1, %s6401_s15  ;;  %v268_v25 = vsel %vm267_vm3, %v266_v22, %v228_v21 }
  0x56   :  { %s6405_s4 = smov (!%p4223_p8, %s6403_s4), 49  ;;  %s4234_s22 = sld [smem:[#allocation2 + $0xb]]  ;;  %v143_v20 = vld [vmem:[%s142_s20] sm:$0x1] }
  0x57   :  { %s149_s25 = scalar_lea.vmem %s6372_s1, %s6405_s4  ;;  %s5537_s26 = sld [smem:[#allocation2 + $0x4]]  ;;  %v231_v24 = vrot.slane %v143_v20, 4 }
  0x58   :  { %s5540_s27 = sld [smem:[#allocation2 + $0xc]]  ;;  %v150_v23 = vld [vmem:[%s149_s25] sm:$0x1]  ;;  %s5347_s3 = smov 64  }
  0x59   :  { %s5542_s2 = sld [smem:[#allocation2 + $0x5]]  ;;  %v234_v26 = vrot.slane %v150_v23, 3  ;;  %v270_v27 = vsel %vm269_vm4, %v268_v25, %v231_v24 }
  0x5a   :  { %p152_p9 = scmp.gt.s32.totalorder %s4228_s21, 0  ;;  %p4229_p10 = scmp.lt.s32.totalorder %s4228_s21, 49 }
  0x5b   :  { %s5545_s28 = sld [smem:[#allocation2 + $0xd]]  ;;  %v272_v29 = vsel %vm271_vm5, %v270_v27, %v234_v26 }
  0x5c   :  { %s6407_s21 = smov (!%p152_p9, %s4228_s21), 0  ;;  %p159_p11 = scmp.gt.s32.totalorder %s4234_s22, 0 }
  0x5d   :  { %p4235_p12 = scmp.lt.s32.totalorder %s4234_s22, 49  ;;  %s6409_s21 = smov (!%p4229_p10, %s6407_s21), 49 }
  0x5e   :  { %s6411_s22 = smov (!%p159_p11, %s4234_s22), 0  ;;  %s156_s29 = scalar_lea.vmem %s6372_s1, %s6409_s21 }
  0x5f   :  { %p166_p13 = scmp.gt.s32.totalorder %s5537_s26, 0  ;;  %v157_v28 = vld [vmem:[%s156_s29] sm:$0x1]  ;;  %s6413_s22 = smov (!%p4235_p12, %s6411_s22), 49 }
  0x60   :  { %v237_v30 = vrot.slane %v157_v28, 2  ;;  %s163_s14 = scalar_lea.vmem %s6372_s1, %s6413_s22  ;;  %p4241_p0 = scmp.lt.s32.totalorder %s5537_s26, 49 }
  0x61   :  { %s167_s30 = scalar_select %p166_p13, %s5537_s26, 0  ;;  %v164_v31 = vld [vmem:[%s163_s14] sm:$0x1] }
  0x62   :  { %v274_v32 = vsel %vm273_vm6, %v272_v29, %v237_v30  ;;  %p173_p1 = scmp.gt.s32.totalorder %s5540_s27, 0  ;;  %p4247_p2 = scmp.lt.s32.totalorder %s5540_s27, 49  ;;  %v240_v33 = vrot.slane %v164_v31, 1 }
  0x63   :  { %s6415_s30 = smov (!%p4241_p0, %s167_s30), 49  ;;  %p180_p3 = scmp.gt.s32.totalorder %s5542_s2, 0 }
  0x64   :  { %s6417_s27 = smov (!%p173_p1, %s5540_s27), 0  ;;  %v276_v35 = vsel %vm275_vm7, %v274_v32, %v240_v33  ;;  %p4253_p4 = scmp.lt.s32.totalorder %s5542_s2, 49 }
  0x65   :  { %4288 = vmatmul.mubr.msk.f32.vlgmr.msra.gmra.mxu0 %vm304_vm8, %v276_v35  ;;  %s6419_s27 = smov (!%p4247_p2, %s6417_s27), 49  ;;  %p187_p5 = scmp.gt.s32.totalorder %s5545_s28, 0 }
  0x66   :  { %4577 = vmatpush3.msra.mxu0 %v5563_v34  ;;  %381 = vmatprep.mubr.f32.mxu0 %v5345_v4  ;;  %s181_s8 = scalar_select %p180_p3, %s5542_s2, 0 }
  0x67   :  { %4578 = vmatprep.subr.mxu0 %v5345_v4  ;;  %s177_s5 = scalar_lea.vmem %s6372_s1, %s6419_s27  ;;  %p4259_p6 = scmp.lt.s32.totalorder %s5545_s28, 49 }
  0x68   :  { %4579 = vmatpush3.msra.mxu0 %v5569_v36  ;;  %s6421_s8 = smov (!%p4253_p4, %s181_s8), 49  ;;  %s6423_s28 = smov (!%p187_p5, %s5545_s28), 0  ;;  %v178_v39 = vld [vmem:[%s177_s5] sm:$0x1] }
  0x69   :  { %4580 = vmatprep.subr.mxu0 %v5345_v4  ;;  %s184_s19 = scalar_lea.vmem %s6372_s1, %s6421_s8  ;;  %s4264_s20 = sld [smem:[#allocation2 + $0x6]]  ;;  %v243_v41 = vrot.slane %v178_v39, 7 }
  0x6a   :  { %4581 = vmatpush3.msra.mxu0 %v5579_v37  ;;  %s6425_s28 = smov (!%p4259_p6, %s6423_s28), 49  ;;  %s170_s23 = scalar_lea.vmem %s6372_s1, %s6415_s30  ;;  %v185_v40 = vld [vmem:[%s184_s19] sm:$0x1] }
  0x6b   :  { %4582 = vmatprep.subr.mxu0 %v5345_v4  ;;  %s4270_s24 = sld [smem:[#allocation2 + $0xe]]  ;;  %s191_s27 = scalar_lea.vmem %s6372_s1, %s6425_s28  ;;  %v171_v42 = vld [vmem:[%s170_s23] sm:$0x1]  ;;  %v246_v44 = vrot.slane %v185_v40, 6 }
  0x6c   :  { %4583 = vmatpush3.msra.mxu0 %v5585_v38  ;;  %s4276_s2 = sld [smem:[#allocation2 + $0x7]]  ;;  %v192_v43 = vld [vmem:[%s191_s27] sm:$0x1]  ;;  %v277_v45 = vsel %vm263_vm1, %v171_v42, %v243_v41 }
  0x6d   :  { %4598 = vmatprep.subr.mxu0 %v5345_v4  ;;  %s4282_s4 = sld [smem:[#allocation2 + $0xf]]  ;;  %v249_v46 = vrot.slane %v192_v43, 5  ;;  %v278_v47 = vsel %vm265_vm2, %v277_v45, %v246_v44 }
  0x6f   :  { %p194_p7 = scmp.gt.s32.totalorder %s4264_s20, 0  ;;  %p4265_p8 = scmp.lt.s32.totalorder %s4264_s20, 49  ;;  %v279_v50 = vsel %vm267_vm3, %v278_v47, %v249_v46 }
  0x71   :  { %s6427_s20 = smov (!%p194_p7, %s4264_s20), 0  ;;  %p201_p9 = scmp.gt.s32.totalorder %s4270_s24, 0 }
  0x72   :  { %p4271_p10 = scmp.lt.s32.totalorder %s4270_s24, 49  ;;  %s6429_s20 = smov (!%p4265_p8, %s6427_s20), 49 }
  0x73   :  { %s6431_s24 = smov (!%p201_p9, %s4270_s24), 0  ;;  %s198_s29 = scalar_lea.vmem %s6372_s1, %s6429_s20 }
  0x74   :  { %p208_p11 = scmp.gt.s32.totalorder %s4276_s2, 0  ;;  %v199_v48 = vld [vmem:[%s198_s29] sm:$0x1]  ;;  %s6433_s24 = smov (!%p4271_p10, %s6431_s24), 49 }
  0x75   :  { %v252_v49 = vrot.slane %v199_v48, 4  ;;  %s205_s14 = scalar_lea.vmem %s6372_s1, %s6433_s24  ;;  %p4277_p12 = scmp.lt.s32.totalorder %s4276_s2, 49 }
  0x76   :  { %s209_s30 = scalar_select %p208_p11, %s4276_s2, 0  ;;  %v206_v51 = vld [vmem:[%s205_s14] sm:$0x1] }
  0x77   :  { %p215_p13 = scmp.gt.s32.totalorder %s4282_s4, 0  ;;  %p4283_p0 = scmp.lt.s32.totalorder %s4282_s4, 49  ;;  %v255_v52 = vrot.slane %v206_v51, 3  ;;  %v280_v53 = vsel %vm269_vm4, %v279_v50, %v252_v49 }
  0x78   :  { %s6435_s30 = smov (!%p4277_p12, %s209_s30), 49  ;;  %s5348_s20 = smov 32  }
  0x79   :  { %s6437_s4 = smov (!%p215_p13, %s4282_s4), 0  ;;  %s212_s16 = scalar_lea.vmem %s6372_s1, %s6435_s30  ;;  %v281_v55 = vsel %vm271_vm5, %v280_v53, %v255_v52 }
  0x7a   :  { %v213_v54 = vld [vmem:[%s212_s16] sm:$0x1]  ;;  %s6439_s4 = smov (!%p4283_p0, %s6437_s4), 49 }
  0x7b   :  { %v258_v56 = vrot.slane %v213_v54, 2  ;;  %s219_s18 = scalar_lea.vmem %s6372_s1, %s6439_s4 }
  0x7c   :  { %v220_v57 = vld [vmem:[%s219_s18] sm:$0x1] }
  0x7d   :  { %v282_v58 = vsel %vm273_vm6, %v281_v55, %v258_v56  ;;  %v261_v59 = vrot.slane %v220_v57, 1 }
  0x7f   :  { %v283_v60 = vsel %vm275_vm7, %v282_v58, %v261_v59 }
  0x80   :  { %4289 = vmatmul.mubr.msk.f32.gmra.mxu0 %vm304_vm8, %v283_v60 }
  0x81   :  { %4584 = vmatprep.mubr.msk.f32.mxu0 %vm5346_vm0, %v5345_v4 }
  0x84   :  { %4585 = vmatmul.mubr.f32.vlgmr.msra.gmra.mxu0 %v5345_v4 }
  0x85   :  { %4599 = vmatpush3.msra.mxu0 %v5563_v34  ;;  %4606 = vmatprep.mubr.msk.f32.mxu0 %vm5346_vm0, %v5345_v4 }
  0x86   :  { %4600 = vmatprep.subr.mxu0 %v5345_v4 }
  0x87   :  { %4601 = vmatpush3.msra.mxu0 %v5569_v36 }
  0x88   :  { %4602 = vmatprep.subr.mxu0 %v5345_v4 }
  0x89   :  { %4603 = vmatpush3.msra.mxu0 %v5579_v37 }
  0x8a   :  { %4604 = vmatprep.subr.mxu0 %v5345_v4 }
  0x8b   :  { %4605 = vmatpush3.msra.mxu0 %v5585_v38 }
  0x8c   :  { %4620 = vmatprep.subr.mxu0 %v5345_v4 }
 0x10c   :  { %v466_v61 = vpop.f32.mrf.mxu1 }
 0x10e   :  { %v4575_v62 = vpop.f32.mrf.mxu1 }
 0x125   :  { %v377_v6 = vpop.f32.mrf.mxu0 }
 0x126   :  { %v5650_v18 = vadd.f32 %v377_v6, %v297_v13 }
 0x127   :  { %v379_v8 = vpop.f32.mrf.mxu0 }
 0x128   :  { %v5643_v9 = vadd.f32 %v379_v8, %v301_v3  ;;  %v470_v23 = vadd.f32 %v466_v61, %v5650_v18 }
 0x12a   :  { %v4290_v27 = vmul.f32 -1.442695, %v470_v23 }
 0x140   :  { %v383_v14 = vpop.f32.mrf.mxu0 }
 0x141   :  { %v5648_v15 = vadd.f32 %v383_v14, %v297_v13 }
 0x142   :  { %v385_v16 = vpop.f32.mrf.mxu0 }
 0x143   :  { %v5652_v19 = vadd.f32 %v385_v16, %v301_v3 }
 0x144   :  { %v561_v17 = vpop.f32.mrf.mxu0 }
 0x145   :  { %v566_v20 = vrot.slane %v561_v17, 2 }
 0x146   :  { %v4586_v21 = vpop.f32.mrf.mxu0 }
 0x147   :  { %v568_v22 = vadd.f32 %v566_v20, %v5652_v19 }
 0x149   :  { %4963 = vtanh.f32 %v568_v22  ;;  %v4291_v26 = vmul.f32 -1.442695, %v568_v22 }
 0x14a   :  { %4965 = vtanh.f32 %v470_v23 }
 0x14b   :  { %4967 = vpow2.f32 %v4291_v26 }
 0x14c   :  { %4969 = vpow2.f32 %v4290_v27 }
 0x156   :  { %v4964_v24 = vpop.eup %4963 }
 0x157   :  { %578 = vrot.lane.b32.xlu0 %v4964_v24, %s5347_s3  ;;  %v4966_v25 = vpop.eup %4965 }
 0x158   :  { %v4968_v28 = vpop.eup %4967 }
 0x159   :  { %v572_v29 = vadd.f32 1.0, %v4968_v28  ;;  %v4970_v30 = vpop.eup %4969 }
 0x15a   :  { %v474_v31 = vadd.f32 1.0, %v4970_v30 }
 0x15b   :  { %480 = vrot.lane.b32.xlu0 %v4966_v25, %s5347_s3  ;;  %4971 = vrcp.f32 %v572_v29 }
 0x15c   :  { %4973 = vrcp.f32 %v474_v31 }
 0x168   :  { %v4972_v32 = vpop.eup %4971 }
 0x169   :  { %v4974_v39 = vpop.eup %4973  ;;  %v576_v42 = vmul.f32 0.0, %v4972_v32 }
 0x16a   :  { %v478_v45 = vmul.f32 0.0, %v4974_v39 }
 0x1c9   :  { %v579_v33 = vpop.permute.xlu0 %578 }
 0x1ca   :  { %v581_v35 = vmul.f32 %v4972_v32, %v579_v33 }
 0x1cc   :  { %583 = vrot.lane.b32.xlu1 %v581_v35, %s5348_s20 }
 0x1cd   :  { %v481_v40 = vpop.permute.xlu0 %480 }
 0x1ce   :  { %v483_v41 = vmul.f32 %v4974_v39, %v481_v40 }
 0x1d0   :  { %485 = vrot.lane.b32.xlu1 %v483_v41, %s5348_s20 }
 0x23e   :  { %v584_v43 = vpop.permute.xlu1 %583 }
 0x23f   :  { %v5660_v44 = vadd.f32 %v584_v43, %v576_v42 }
 0x241   :  { %4975 = vtanh.f32 %v5660_v44  ;;  %v787_v27 = vrot.slane %v5660_v44, 2 }
 0x242   :  { %v486_v46 = vpop.permute.xlu1 %485 }
 0x243   :  { %v5663_v47 = vadd.f32 %v486_v46, %v478_v45 }
 0x245   :  { %4977 = vtanh.f32 %v5663_v47  ;;  %v680_v29 = vrot.slane %v5663_v47, 6 }
 0x24e   :  { %v4976_v48 = vpop.eup %4975 }
 0x24f   :  { %589 = vrot.lane.b32.xlu0 %v4976_v48, %s5347_s3 }
 0x252   :  { %v4978_v49 = vpop.eup %4977 }
 0x253   :  { %491 = vrot.lane.b32.xlu1 %v4978_v49, %s5347_s3 }
 0x2c1   :  { %v590_v50 = vpop.permute.xlu0 %589 }
 0x2c2   :  { %v5668_v51 = vmul.f32 %v4972_v32, %v590_v50 }
 0x2c4   :  { %v700_v52 = vrot.slane %v5668_v51, 6 }
 0x2c5   :  { %v492_v53 = vpop.permute.xlu1 %491 }
 0x2c6   :  { %v5671_v54 = vmul.f32 %v4974_v39, %v492_v53  ;;  %701 = vrot.lane.b32.xlu0 %v700_v52, %s5348_s20 }
 0x2c8   :  { %594 = vrot.lane.b32.xlu1 %v5671_v54, %s5348_s20 }
 0x338   :  { %v702_v55 = vpop.permute.xlu0 %701 }
 0x339   :  { %4607 = vmatmul.mubr.msk.f32.vlgmr.msra.gmra.mxu0 %vm304_vm8, %v702_v55 }
 0x33a   :  { %v595_v56 = vpop.permute.xlu1 %594  ;;  %4621 = vmatpush3.msra.mxu0 %v5563_v34  ;;  %4628 = vmatprep.mubr.msk.f32.mxu0 %vm5346_vm0, %v5345_v4 }
 0x33b   :  { %4596 = vmatmul.mubr.msk.f32.vlgmr.msra.gmra.mxu1 %vm304_vm8, %v595_v56  ;;  %4622 = vmatprep.subr.mxu0 %v5345_v4 }
 0x33c   :  { %4610 = vmatpush3.msra.mxu1 %v5444_v5  ;;  %4623 = vmatpush3.msra.mxu0 %v5569_v36 }
 0x33d   :  { %4611 = vmatprep.subr.mxu1 %v5345_v4  ;;  %4624 = vmatprep.subr.mxu0 %v5345_v4 }
 0x33e   :  { %4612 = vmatpush3.msra.mxu1 %v5452_v7  ;;  %4625 = vmatpush3.msra.mxu0 %v5579_v37 }
 0x33f   :  { %4613 = vmatprep.subr.mxu1 %v5345_v4  ;;  %4626 = vmatprep.subr.mxu0 %v5345_v4 }
 0x340   :  { %4627 = vmatpush3.msra.mxu0 %v5585_v38  ;;  %4614 = vmatpush3.msra.mxu1 %v5466_v10 }
 0x341   :  { %4615 = vmatprep.subr.mxu1 %v5345_v4  ;;  %4617 = vmatprep.mubr.msk.f32.mxu1 %vm5346_vm0, %v5345_v4 }
 0x342   :  { %4616 = vmatpush3.msra.mxu1 %v5479_v12  ;;  %4642 = vmatprep.subr.mxu0 %v5345_v4 }
 0x343   :  { %4631 = vmatprep.subr.mxu1 %v5345_v4 }
 0x3f9   :  { %v771_v57 = vpop.f32.mrf.mxu0 }
 0x3fa   :  { %v776_v58 = vrot.slane %v771_v57, 4 }
 0x3fb   :  { %v664_v59 = vpop.f32.mrf.mxu1  ;;  %v4608_v60 = vpop.f32.mrf.mxu0 }
 0x3fc   :  { %v778_v61 = vadd.f32 %v776_v58, %v5652_v19  ;;  %v669_v62 = vrot.slane %v664_v59, 6 }
 0x3fd   :  { %v4597_v63 = vpop.f32.mrf.mxu1 }
 0x3fe   :  { %4979 = vtanh.f32 %v778_v61  ;;  %v671_v2 = vadd.f32 %v669_v62, %v5650_v18  ;;  %v4295_v8 = vmul.f32 -1.442695, %v778_v61 }
 0x400   :  { %4981 = vtanh.f32 %v671_v2  ;;  %v4293_v13 = vmul.f32 -1.442695, %v671_v2 }
 0x401   :  { %4983 = vpow2.f32 %v4295_v8 }
 0x402   :  { %4985 = vpow2.f32 %v4293_v13 }
 0x40b   :  { %v4980_v3 = vpop.eup %4979 }
 0x40c   :  { %791 = vrot.lane.b32.xlu0 %v4980_v3, %s5347_s3 }
 0x40d   :  { %v4982_v6 = vpop.eup %4981 }
 0x40e   :  { %684 = vrot.lane.b32.xlu1 %v4982_v6, %s5347_s3  ;;  %v4984_v14 = vpop.eup %4983 }
 0x40f   :  { %v4986_v16 = vpop.eup %4985  ;;  %v782_v17 = vadd.f32 1.0, %v4984_v14 }
 0x410   :  { %v675_v20 = vadd.f32 1.0, %v4986_v16 }
 0x411   :  { %4987 = vrcp.f32 %v782_v17 }
 0x412   :  { %4989 = vrcp.f32 %v675_v20 }
 0x41e   :  { %v4988_v21 = vpop.eup %4987 }
 0x41f   :  { %v4990_v24 = vpop.eup %4989  ;;  %v789_v28 = vmul.f32 %v4988_v21, %v787_v27 }
 0x420   :  { %v682_v32 = vmul.f32 %v4990_v24, %v680_v29 }
 0x47e   :  { %v792_v22 = vpop.permute.xlu0 %791 }
 0x47f   :  { %v794_v23 = vmul.f32 %v4988_v21, %v792_v22 }
 0x480   :  { %v685_v25 = vpop.permute.xlu1 %684 }
 0x481   :  { %796 = vrot.lane.b32.xlu0 %v794_v23, %s5348_s20  ;;  %v687_v26 = vmul.f32 %v4990_v24, %v685_v25 }
 0x483   :  { %689 = vrot.lane.b32.xlu1 %v687_v26, %s5348_s20 }
 0x4f3   :  { %v797_v30 = vpop.permute.xlu0 %796 }
 0x4f4   :  { %v5706_v31 = vadd.f32 %v797_v30, %v789_v28 }
 0x4f5   :  { %v690_v33 = vpop.permute.xlu1 %689 }
 0x4f6   :  { %4991 = vtanh.f32 %v5706_v31  ;;  %v5709_v35 = vadd.f32 %v690_v33, %v682_v32 }
 0x4f8   :  { %4993 = vtanh.f32 %v5709_v35  ;;  %v894_v23 = vrot.slane %v5709_v35, 6 }
 0x503   :  { %v4992_v39 = vpop.eup %4991 }
 0x504   :  { %802 = vrot.lane.b32.xlu0 %v4992_v39, %s5347_s3 }
 0x505   :  { %v4994_v40 = vpop.eup %4993 }
 0x506   :  { %695 = vrot.lane.b32.xlu1 %v4994_v40, %s5347_s3 }
 0x576   :  { %v803_v41 = vpop.permute.xlu0 %802 }
 0x577   :  { %v5714_v42 = vmul.f32 %v4988_v21, %v803_v41  ;;  %v1001_v21 = vrot.slane %v5706_v31, 2 }
 0x578   :  { %v696_v44 = vpop.permute.xlu1 %695 }
 0x579   :  { %v914_v43 = vrot.slane %v5714_v42, 4  ;;  %v5717_v45 = vmul.f32 %v4990_v24, %v696_v44 }
 0x57b   :  { %915 = vrot.lane.b32.xlu0 %v914_v43, %s5348_s20  ;;  %v807_v46 = vrot.slane %v5717_v45, 2  ;;  %v2079_v40 = vsel %vm265_vm2, %v5671_v54, %v5717_v45 }
 0x57d   :  { %808 = vrot.lane.b32.xlu1 %v807_v46, %s5348_s20 }
 0x5ed   :  { %v916_v47 = vpop.permute.xlu0 %915 }
 0x5ee   :  { %4629 = vmatmul.mubr.msk.f32.vlgmr.msra.gmra.mxu0 %vm304_vm8, %v916_v47 }
 0x5ef   :  { %4643 = vmatpush3.msra.mxu0 %v5563_v34  ;;  %4650 = vmatprep.mubr.msk.f32.mxu0 %vm5346_vm0, %v5345_v4  ;;  %v809_v48 = vpop.permute.xlu1 %808 }
 0x5f0   :  { %4644 = vmatprep.subr.mxu0 %v5345_v4  ;;  %4618 = vmatmul.mubr.msk.f32.vlgmr.msra.gmra.mxu1 %vm304_vm8, %v809_v48 }
 0x5f1   :  { %4645 = vmatpush3.msra.mxu0 %v5569_v36  ;;  %4632 = vmatpush3.msra.mxu1 %v5444_v5 }
 0x5f2   :  { %4646 = vmatprep.subr.mxu0 %v5345_v4  ;;  %4633 = vmatprep.subr.mxu1 %v5345_v4 }
 0x5f3   :  { %4647 = vmatpush3.msra.mxu0 %v5579_v37  ;;  %4634 = vmatpush3.msra.mxu1 %v5452_v7 }
 0x5f4   :  { %4648 = vmatprep.subr.mxu0 %v5345_v4  ;;  %4635 = vmatprep.subr.mxu1 %v5345_v4 }
 0x5f5   :  { %4649 = vmatpush3.msra.mxu0 %v5585_v38  ;;  %4636 = vmatpush3.msra.mxu1 %v5466_v10 }
 0x5f6   :  { %4639 = vmatprep.mubr.msk.f32.mxu1 %vm5346_vm0, %v5345_v4  ;;  %4637 = vmatprep.subr.mxu1 %v5345_v4 }
 0x5f7   :  { %4664 = vmatprep.subr.mxu0 %v5345_v4  ;;  %4638 = vmatpush3.msra.mxu1 %v5479_v12 }
 0x5f8   :  { %4653 = vmatprep.subr.mxu1 %v5345_v4 }
 0x6ae   :  { %v985_v49 = vpop.f32.mrf.mxu0 }
 0x6af   :  { %v990_v50 = vrot.slane %v985_v49, 6 }
 0x6b0   :  { %v4630_v52 = vpop.f32.mrf.mxu0  ;;  %v878_v55 = vpop.f32.mrf.mxu1 }
 0x6b1   :  { %v992_v53 = vadd.f32 %v990_v50, %v5652_v19  ;;  %v883_v56 = vrot.slane %v878_v55, 4 }
 0x6b2   :  { %v4619_v57 = vpop.f32.mrf.mxu1 }
 0x6b3   :  { %4995 = vtanh.f32 %v992_v53  ;;  %v885_v58 = vadd.f32 %v883_v56, %v5650_v18  ;;  %v4299_v61 = vmul.f32 -1.442695, %v992_v53 }
 0x6b5   :  { %4997 = vtanh.f32 %v885_v58  ;;  %v4297_v62 = vmul.f32 -1.442695, %v885_v58 }
 0x6b6   :  { %4999 = vpow2.f32 %v4299_v61 }
 0x6b7   :  { %5001 = vpow2.f32 %v4297_v62 }
 0x6c0   :  { %v4996_v59 = vpop.eup %4995 }
 0x6c1   :  { %1005 = vrot.lane.b32.xlu0 %v4996_v59, %s5347_s3 }
 0x6c2   :  { %v4998_v60 = vpop.eup %4997 }
 0x6c3   :  { %898 = vrot.lane.b32.xlu1 %v4998_v60, %s5347_s3  ;;  %v5000_v63 = vpop.eup %4999 }
 0x6c4   :  { %v5002_v2 = vpop.eup %5001  ;;  %v996_v3 = vadd.f32 1.0, %v5000_v63 }
 0x6c5   :  { %v889_v6 = vadd.f32 1.0, %v5002_v2 }
 0x6c6   :  { %5003 = vrcp.f32 %v996_v3 }
 0x6c7   :  { %5005 = vrcp.f32 %v889_v6 }
 0x6d3   :  { %v5004_v8 = vpop.eup %5003 }
 0x6d4   :  { %v5006_v16 = vpop.eup %5005  ;;  %v1003_v22 = vmul.f32 %v5004_v8, %v1001_v21 }
 0x6d5   :  { %v896_v26 = vmul.f32 %v5006_v16, %v894_v23 }
 0x733   :  { %v1006_v13 = vpop.permute.xlu0 %1005 }
 0x734   :  { %v1008_v14 = vmul.f32 %v5004_v8, %v1006_v13 }
 0x735   :  { %v899_v17 = vpop.permute.xlu1 %898 }
 0x736   :  { %1010 = vrot.lane.b32.xlu0 %v1008_v14, %s5348_s20  ;;  %v901_v20 = vmul.f32 %v5006_v16, %v899_v17 }
 0x738   :  { %903 = vrot.lane.b32.xlu1 %v901_v20, %s5348_s20 }
 0x7a8   :  { %v1011_v24 = vpop.permute.xlu0 %1010 }
 0x7a9   :  { %v5752_v25 = vadd.f32 %v1011_v24, %v1003_v22 }
 0x7aa   :  { %v904_v27 = vpop.permute.xlu1 %903 }
 0x7ab   :  { %5007 = vtanh.f32 %v5752_v25  ;;  %v5755_v28 = vadd.f32 %v904_v27, %v896_v26  ;;  %v1212_v2 = vrot.slane %v5752_v25, 2 }
 0x7ad   :  { %5009 = vtanh.f32 %v5755_v28  ;;  %v1108_v13 = vrot.slane %v5755_v28, 6 }
 0x7b8   :  { %v5008_v29 = vpop.eup %5007 }
 0x7b9   :  { %1016 = vrot.lane.b32.xlu0 %v5008_v29, %s5347_s3 }
 0x7ba   :  { %v5010_v30 = vpop.eup %5009 }
 0x7bb   :  { %909 = vrot.lane.b32.xlu1 %v5010_v30, %s5347_s3  ;;  %v5829_v30 = vld [vmem:[#allocation5 + $0x18] sm:$0xff] }
 0x82b   :  { %v1017_v31 = vpop.permute.xlu0 %1016 }
 0x82c   :  { %v5760_v32 = vmul.f32 %v5004_v8, %v1017_v31  ;;  %v5836_v31 = vld [vmem:[#allocation5 + $0x10] sm:$0xff] }
 0x82d   :  { %v910_v35 = vpop.permute.xlu1 %909 }
 0x82e   :  { %v1128_v33 = vrot.slane %v5760_v32, 2  ;;  %v912_v39 = vmul.f32 %v5006_v16, %v910_v35 }
 0x830   :  { %1129 = vrot.lane.b32.xlu0 %v1128_v33, %s5348_s20  ;;  %v1021_v41 = vrot.slane %v912_v39, 4  ;;  %v5768_v43 = vsel %vm269_vm4, %v2079_v40, %v912_v39 }
 0x832   :  { %1022 = vrot.lane.b32.xlu1 %v1021_v41, %s5348_s20 }
 0x8a2   :  { %v1130_v44 = vpop.permute.xlu0 %1129 }
 0x8a3   :  { %4651 = vmatmul.mubr.msk.f32.vlgmr.msra.gmra.mxu0 %vm304_vm8, %v1130_v44 }
 0x8a4   :  { %4665 = vmatpush3.msra.mxu0 %v5563_v34  ;;  %4672 = vmatprep.mubr.msk.f32.mxu0 %vm5346_vm0, %v5345_v4  ;;  %v1023_v46 = vpop.permute.xlu1 %1022 }
 0x8a5   :  { %4666 = vmatprep.subr.mxu0 %v5345_v4  ;;  %4640 = vmatmul.mubr.msk.f32.vlgmr.msra.gmra.mxu1 %vm304_vm8, %v1023_v46 }
 0x8a6   :  { %4667 = vmatpush3.msra.mxu0 %v5569_v36  ;;  %4654 = vmatpush3.msra.mxu1 %v5444_v5 }
 0x8a7   :  { %4668 = vmatprep.subr.mxu0 %v5345_v4  ;;  %4655 = vmatprep.subr.mxu1 %v5345_v4 }
 0x8a8   :  { %4669 = vmatpush3.msra.mxu0 %v5579_v37  ;;  %4656 = vmatpush3.msra.mxu1 %v5452_v7 }
 0x8a9   :  { %4670 = vmatprep.subr.mxu0 %v5345_v4  ;;  %4657 = vmatprep.subr.mxu1 %v5345_v4 }
 0x8aa   :  { %4671 = vmatpush3.msra.mxu0 %v5585_v38  ;;  %4658 = vmatpush3.msra.mxu1 %v5466_v10 }
 0x8ab   :  { %4661 = vmatprep.mubr.msk.f32.mxu1 %vm5346_vm0, %v5345_v4  ;;  %4659 = vmatprep.subr.mxu1 %v5345_v4 }
 0x8ac   :  { %4686 = vmatprep.subr.mxu0 %v5345_v4  ;;  %4660 = vmatpush3.msra.mxu1 %v5479_v12 }
 0x8ad   :  { %4675 = vmatprep.subr.mxu1 %v5345_v4 }
 0x963   :  { %v1199_v5 = vpop.f32.mrf.mxu0 }
 0x964   :  { %v1203_v7 = vadd.f32 %v1199_v5, %v5652_v19 }
 0x965   :  { %v4652_v54 = vpop.f32.mrf.mxu0  ;;  %v1092_v45 = vpop.f32.mrf.mxu1 }
 0x966   :  { %5011 = vtanh.f32 %v1203_v7  ;;  %v1097_v47 = vrot.slane %v1092_v45, 2  ;;  %v4303_v53 = vmul.f32 -1.442695, %v1203_v7 }
 0x967   :  { %v4641_v48 = vpop.f32.mrf.mxu1 }
 0x968   :  { %v1099_v49 = vadd.f32 %v1097_v47, %v5650_v18 }
 0x96a   :  { %5013 = vtanh.f32 %v1099_v49  ;;  %v4301_v55 = vmul.f32 -1.442695, %v1099_v49 }
 0x96b   :  { %5015 = vpow2.f32 %v4303_v53 }
 0x96c   :  { %5017 = vpow2.f32 %v4301_v55 }
 0x973   :  { %v5012_v50 = vpop.eup %5011 }
 0x974   :  { %1216 = vrot.lane.b32.xlu0 %v5012_v50, %s5347_s3 }
 0x977   :  { %v5014_v52 = vpop.eup %5013 }
 0x978   :  { %1112 = vrot.lane.b32.xlu1 %v5014_v52, %s5347_s3  ;;  %v5016_v56 = vpop.eup %5015 }
 0x979   :  { %v1207_v19 = vadd.f32 1.0, %v5016_v56  ;;  %v5018_v57 = vpop.eup %5017 }
 0x97a   :  { %v1103_v58 = vadd.f32 1.0, %v5018_v57 }
 0x97b   :  { %5019 = vrcp.f32 %v1207_v19 }
 0x97c   :  { %5021 = vrcp.f32 %v1103_v58 }
 0x988   :  { %v5020_v59 = vpop.eup %5019 }
 0x989   :  { %v5022_v61 = vpop.eup %5021  ;;  %v1214_v3 = vmul.f32 %v5020_v59, %v1212_v2 }
 0x98a   :  { %v1110_v14 = vmul.f32 %v5022_v61, %v1108_v13 }
 0x9e6   :  { %v1217_v60 = vpop.permute.xlu0 %1216 }
 0x9e7   :  { %v1219_v18 = vmul.f32 %v5020_v59, %v1217_v60 }
 0x9e9   :  { %1221 = vrot.lane.b32.xlu0 %v1219_v18, %s5348_s20 }
 0x9ea   :  { %v1113_v62 = vpop.permute.xlu1 %1112 }
 0x9eb   :  { %v1115_v63 = vmul.f32 %v5022_v61, %v1113_v62 }
 0x9ed   :  { %1117 = vrot.lane.b32.xlu1 %v1115_v63, %s5348_s20 }
 0xa5b   :  { %v1222_v6 = vpop.permute.xlu0 %1221 }
 0xa5c   :  { %v5800_v8 = vadd.f32 %v1222_v6, %v1214_v3 }
 0xa5e   :  { %5023 = vtanh.f32 %v5800_v8  ;;  %v1422_v56 = vrot.slane %v5800_v8, 2 }
 0xa5f   :  { %v1118_v16 = vpop.permute.xlu1 %1117 }
 0xa60   :  { %v5804_v17 = vadd.f32 %v1118_v16, %v1110_v14 }
 0xa62   :  { %5025 = vtanh.f32 %v5804_v17 }
 0xa6b   :  { %v5024_v20 = vpop.eup %5023 }
 0xa6c   :  { %1227 = vrot.lane.b32.xlu0 %v5024_v20, %s5347_s3 }
 0xa6f   :  { %v5026_v21 = vpop.eup %5025 }
 0xa70   :  { %1123 = vrot.lane.b32.xlu1 %v5026_v21, %s5347_s3 }
 0xade   :  { %v1228_v22 = vpop.permute.xlu0 %1227 }
 0xadf   :  { %v5809_v23 = vmul.f32 %v5020_v59, %v1228_v22  ;;  %v1316_v59 = vrot.slane %v5804_v17, 6 }
 0xae1   :  { %1336 = vrot.lane.b32.xlu0 %v5809_v23, %s5348_s20 }
 0xae2   :  { %v1124_v24 = vpop.permute.xlu1 %1123 }
 0xae3   :  { %v1126_v25 = vmul.f32 %v5022_v61, %v1124_v24 }
 0xae5   :  { %v1232_v26 = vrot.slane %v1126_v25, 6  ;;  %v5815_v27 = vsel %vm273_vm6, %v5768_v43, %v1126_v25 }
 0xae7   :  { %1233 = vrot.lane.b32.xlu1 %v1232_v26, %s5348_s20 }
 0xb53   :  { %v1337_v28 = vpop.permute.xlu0 %1336 }
 0xb54   :  { %4673 = vmatmul.mubr.msk.f32.vlgmr.msra.gmra.mxu0 %vm304_vm8, %v1337_v28 }
 0xb55   :  { %4687 = vmatpush3.msra.mxu0 %v5563_v34  ;;  %4694 = vmatprep.mubr.msk.f32.mxu0 %vm5346_vm0, %v5345_v4 }
 0xb56   :  { %4688 = vmatprep.subr.mxu0 %v5345_v4 }
 0xb57   :  { %4689 = vmatpush3.msra.mxu0 %v5569_v36 }
 0xb58   :  { %4690 = vmatprep.subr.mxu0 %v5345_v4 }
 0xb59   :  { %4691 = vmatpush3.msra.mxu0 %v5579_v37  ;;  %v1234_v29 = vpop.permute.xlu1 %1233 }
 0xb5a   :  { %4692 = vmatprep.subr.mxu0 %v5345_v4  ;;  %4662 = vmatmul.mubr.msk.f32.vlgmr.msra.gmra.mxu1 %vm304_vm8, %v1234_v29 }
 0xb5b   :  { %4693 = vmatpush3.msra.mxu0 %v5585_v38  ;;  %4676 = vmatpush3.msra.mxu1 %v5829_v30 }
 0xb5c   :  { %4683 = vmatprep.mubr.msk.f32.mxu1 %vm5346_vm0, %v5345_v4  ;;  %4677 = vmatprep.subr.mxu1 %v5345_v4 }
 0xb5d   :  { %4708 = vmatprep.subr.mxu0 %v5345_v4  ;;  %4678 = vmatpush3.msra.mxu1 %v5836_v31 }
 0xb5e   :  { %4679 = vmatprep.subr.mxu1 %v5345_v4 }
 0xb5f   :  { %4680 = vmatpush3.msra.mxu1 %v5466_v10 }
 0xb60   :  { %4681 = vmatprep.subr.mxu1 %v5345_v4 }
 0xb61   :  { %4682 = vmatpush3.msra.mxu1 %v5479_v12 }
 0xb62   :  { %4697 = vmatprep.subr.mxu1 %v5345_v4 }
 0xc14   :  { %v1406_v33 = vpop.f32.mrf.mxu0 }
 0xc15   :  { %v1411_v35 = vrot.slane %v1406_v33, 2 }
 0xc16   :  { %v4674_v39 = vpop.f32.mrf.mxu0 }
 0xc17   :  { %v1413_v40 = vadd.f32 %v1411_v35, %v5643_v9 }
 0xc19   :  { %5027 = vtanh.f32 %v1413_v40  ;;  %v4307_v12 = vmul.f32 -1.442695, %v1413_v40 }
 0xc1a   :  { %v1303_v41 = vpop.f32.mrf.mxu1 }
 0xc1b   :  { %v1307_v43 = vadd.f32 %v1303_v41, %v5648_v15 }
 0xc1c   :  { %v4663_v44 = vpop.f32.mrf.mxu1 }
 0xc1d   :  { %5029 = vtanh.f32 %v1307_v43  ;;  %v4305_v5 = vmul.f32 -1.442695, %v1307_v43 }
 0xc1e   :  { %5031 = vpow2.f32 %v4307_v12 }
 0xc1f   :  { %5033 = vpow2.f32 %v4305_v5 }
 0xc26   :  { %v5028_v46 = vpop.eup %5027 }
 0xc27   :  { %1426 = vrot.lane.b32.xlu0 %v5028_v46, %s5347_s3 }
 0xc2a   :  { %v5030_v10 = vpop.eup %5029 }
 0xc2b   :  { %1320 = vrot.lane.b32.xlu1 %v5030_v10, %s5347_s3  ;;  %v5032_v7 = vpop.eup %5031 }
 0xc2c   :  { %v1417_v54 = vadd.f32 1.0, %v5032_v7  ;;  %v5034_v45 = vpop.eup %5033 }
 0xc2d   :  { %v1311_v47 = vadd.f32 1.0, %v5034_v45 }
 0xc2e   :  { %5035 = vrcp.f32 %v1417_v54 }
 0xc2f   :  { %5037 = vrcp.f32 %v1311_v47 }
 0xc3b   :  { %v5036_v48 = vpop.eup %5035 }
 0xc3c   :  { %v5038_v52 = vpop.eup %5037  ;;  %v1424_v19 = vmul.f32 %v5036_v48, %v1422_v56 }
 0xc3d   :  { %v1318_v60 = vmul.f32 %v5038_v52, %v1316_v59 }
 0xc99   :  { %v1427_v49 = vpop.permute.xlu0 %1426 }
 0xc9a   :  { %v1429_v50 = vmul.f32 %v5036_v48, %v1427_v49 }
 0xc9c   :  { %1431 = vrot.lane.b32.xlu0 %v1429_v50, %s5348_s20 }
 0xc9d   :  { %v1321_v53 = vpop.permute.xlu1 %1320 }
 0xc9e   :  { %v1323_v55 = vmul.f32 %v5038_v52, %v1321_v53 }
 0xca0   :  { %1325 = vrot.lane.b32.xlu1 %v1323_v55, %s5348_s20 }
 0xd0e   :  { %v1432_v57 = vpop.permute.xlu0 %1431 }
 0xd0f   :  { %v5851_v58 = vadd.f32 %v1432_v57, %v1424_v19 }
 0xd11   :  { %5039 = vtanh.f32 %v5851_v58  ;;  %v1635_v7 = vrot.slane %v5851_v58, 2 }
 0xd12   :  { %v1326_v18 = vpop.permute.xlu1 %1325 }
 0xd13   :  { %v5855_v61 = vadd.f32 %v1326_v18, %v1318_v60 }
 0xd15   :  { %5041 = vtanh.f32 %v5855_v61  ;;  %v1528_v45 = vrot.slane %v5855_v61, 6  ;;  %v5227_v61 = vld [vmem:[#allocation5 + $0x38] sm:$0xff] }
 0xd1e   :  { %v5040_v62 = vpop.eup %5039 }
 0xd1f   :  { %1437 = vrot.lane.b32.xlu0 %v5040_v62, %s5347_s3 }
 0xd22   :  { %v5042_v63 = vpop.eup %5041 }
 0xd23   :  { %1331 = vrot.lane.b32.xlu1 %v5042_v63, %s5347_s3  ;;  %v5228_v63 = vld [vmem:[#allocation5 + $0x30] sm:$0xff] }
 0xd91   :  { %v1438_v2 = vpop.permute.xlu0 %1437 }
 0xd92   :  { %v5860_v3 = vmul.f32 %v5036_v48, %v1438_v2  ;;  %v5229_v2 = vld [vmem:[#allocation5 + $0x28] sm:$0xff] }
 0xd94   :  { %v1548_v6 = vrot.slane %v5860_v3, 6 }
 0xd95   :  { %v1332_v8 = vpop.permute.xlu1 %1331 }
 0xd96   :  { %1549 = vrot.lane.b32.xlu0 %v1548_v6, %s5348_s20  ;;  %v5864_v13 = vmul.f32 %v5038_v52, %v1332_v8  ;;  %v5230_v6 = vld [vmem:[#allocation5 + $0x20] sm:$0xff] }
 0xd98   :  { %1442 = vrot.lane.b32.xlu1 %v5864_v13, %s5348_s20 }
 0xe08   :  { %v1550_v14 = vpop.permute.xlu0 %1549 }
 0xe09   :  { %4695 = vmatmul.mubr.msk.f32.vlgmr.msra.gmra.mxu0 %vm304_vm8, %v1550_v14 }
 0xe0a   :  { %4709 = vmatpush3.msra.mxu0 %v5563_v34  ;;  %4716 = vmatprep.mubr.msk.f32.mxu0 %vm5346_vm0, %v5345_v4  ;;  %v1443_v16 = vpop.permute.xlu1 %1442  ;;  %v5883_v34 = vld [vmem:[#allocation5 + $0x8] sm:$0xff] }
 0xe0b   :  { %4710 = vmatprep.subr.mxu0 %v5345_v4  ;;  %4684 = vmatmul.mubr.msk.f32.vlgmr.msra.gmra.mxu1 %vm304_vm8, %v1443_v16 }
 0xe0c   :  { %4711 = vmatpush3.msra.mxu0 %v5569_v36  ;;  %4698 = vmatpush3.msra.mxu1 %v5829_v30  ;;  %v5890_v36 = vld [vmem:[#allocation5] sm:$0xff] }
 0xe0d   :  { %4712 = vmatprep.subr.mxu0 %v5345_v4  ;;  %4699 = vmatprep.subr.mxu1 %v5345_v4 }
 0xe0e   :  { %4713 = vmatpush3.msra.mxu0 %v5579_v37  ;;  %4700 = vmatpush3.msra.mxu1 %v5836_v31 }
 0xe0f   :  { %4714 = vmatprep.subr.mxu0 %v5345_v4  ;;  %4701 = vmatprep.subr.mxu1 %v5345_v4 }
 0xe10   :  { %4715 = vmatpush3.msra.mxu0 %v5585_v38  ;;  %4702 = vmatpush3.msra.mxu1 %v5883_v34 }
 0xe11   :  { %4705 = vmatprep.mubr.msk.f32.mxu1 %vm5346_vm0, %v5345_v4  ;;  %4703 = vmatprep.subr.mxu1 %v5345_v4 }
 0xe12   :  { %4730 = vmatprep.subr.mxu0 %v5345_v4  ;;  %4704 = vmatpush3.msra.mxu1 %v5890_v36 }
 0xe13   :  { %4719 = vmatprep.subr.mxu1 %v5345_v4 }
 0xec9   :  { %v1619_v37 = vpop.f32.mrf.mxu0 }
 0xeca   :  { %v1624_v17 = vrot.slane %v1619_v37, 4 }
 0xecb   :  { %v4696_v38 = vpop.f32.mrf.mxu0  ;;  %v1512_v21 = vpop.f32.mrf.mxu1 }
 0xecc   :  { %v1626_v20 = vadd.f32 %v1624_v17, %v5643_v9  ;;  %v1517_v22 = vrot.slane %v1512_v21, 6 }
 0xecd   :  { %v4685_v24 = vpop.f32.mrf.mxu1 }
 0xece   :  { %5043 = vtanh.f32 %v1626_v20  ;;  %v1519_v25 = vadd.f32 %v1517_v22, %v5648_v15  ;;  %v4311_v29 = vmul.f32 -1.442695, %v1626_v20 }
 0xed0   :  { %5045 = vtanh.f32 %v1519_v25  ;;  %v4309_v33 = vmul.f32 -1.442695, %v1519_v25 }
 0xed1   :  { %5047 = vpow2.f32 %v4311_v29 }
 0xed2   :  { %5049 = vpow2.f32 %v4309_v33 }
 0xedb   :  { %v5044_v26 = vpop.eup %5043 }
 0xedc   :  { %1639 = vrot.lane.b32.xlu0 %v5044_v26, %s5347_s3 }
 0xedd   :  { %v5046_v28 = vpop.eup %5045 }
 0xede   :  { %1532 = vrot.lane.b32.xlu1 %v5046_v28, %s5347_s3  ;;  %v5048_v35 = vpop.eup %5047 }
 0xedf   :  { %v5050_v39 = vpop.eup %5049  ;;  %v1630_v40 = vadd.f32 1.0, %v5048_v35 }
 0xee0   :  { %v1523_v41 = vadd.f32 1.0, %v5050_v39 }
 0xee1   :  { %5051 = vrcp.f32 %v1630_v40 }
 0xee2   :  { %5053 = vrcp.f32 %v1523_v41 }
 0xeee   :  { %v5052_v43 = vpop.eup %5051 }
 0xeef   :  { %v5054_v10 = vpop.eup %5053  ;;  %v1637_v54 = vmul.f32 %v5052_v43, %v1635_v7 }
 0xef0   :  { %v1530_v49 = vmul.f32 %v5054_v10, %v1528_v45 }
 0xf4e   :  { %v1640_v44 = vpop.permute.xlu0 %1639 }
 0xf4f   :  { %v1642_v46 = vmul.f32 %v5052_v43, %v1640_v44 }
 0xf50   :  { %v1533_v12 = vpop.permute.xlu1 %1532 }
 0xf51   :  { %1644 = vrot.lane.b32.xlu0 %v1642_v46, %s5348_s20  ;;  %v1535_v5 = vmul.f32 %v5054_v10, %v1533_v12 }
 0xf53   :  { %1537 = vrot.lane.b32.xlu1 %v1535_v5, %s5348_s20 }
 0xfc3   :  { %v1645_v47 = vpop.permute.xlu0 %1644 }
 0xfc4   :  { %v5902_v48 = vadd.f32 %v1645_v47, %v1637_v54 }
 0xfc5   :  { %v1538_v50 = vpop.permute.xlu1 %1537 }
 0xfc6   :  { %5055 = vtanh.f32 %v5902_v48  ;;  %v5905_v52 = vadd.f32 %v1538_v50, %v1530_v49  ;;  %v1849_v41 = vrot.slane %v5902_v48, 2 }
 0xfc8   :  { %5057 = vtanh.f32 %v5905_v52  ;;  %v1742_v44 = vrot.slane %v5905_v52, 6 }
 0xfd3   :  { %v5056_v53 = vpop.eup %5055 }
 0xfd4   :  { %1650 = vrot.lane.b32.xlu0 %v5056_v53, %s5347_s3 }
 0xfd5   :  { %v5058_v55 = vpop.eup %5057 }
 0xfd6   :  { %1543 = vrot.lane.b32.xlu1 %v5058_v55, %s5347_s3 }
0x1046   :  { %v1651_v56 = vpop.permute.xlu0 %1650 }
0x1047   :  { %v5910_v19 = vmul.f32 %v5052_v43, %v1651_v56 }
0x1048   :  { %v1544_v58 = vpop.permute.xlu1 %1543 }
0x1049   :  { %v1762_v57 = vrot.slane %v5910_v19, 4  ;;  %v5913_v59 = vmul.f32 %v5054_v10, %v1544_v58 }
0x104b   :  { %1763 = vrot.lane.b32.xlu0 %v1762_v57, %s5348_s20  ;;  %v1655_v60 = vrot.slane %v5913_v59, 2  ;;  %v2082_v53 = vsel %vm265_vm2, %v5864_v13, %v5913_v59 }
0x104d   :  { %1656 = vrot.lane.b32.xlu1 %v1655_v60, %s5348_s20 }
0x10bd   :  { %v1764_v18 = vpop.permute.xlu0 %1763 }
0x10be   :  { %4717 = vmatmul.mubr.msk.f32.vlgmr.msra.gmra.mxu0 %vm304_vm8, %v1764_v18 }
0x10bf   :  { %4731 = vmatpush3.msra.mxu0 %v5227_v61  ;;  %4738 = vmatprep.mubr.msk.f32.mxu0 %vm5346_vm0, %v5345_v4  ;;  %v1657_v62 = vpop.permute.xlu1 %1656 }
0x10c0   :  { %4732 = vmatprep.subr.mxu0 %v5345_v4  ;;  %4706 = vmatmul.mubr.msk.f32.vlgmr.msra.gmra.mxu1 %vm304_vm8, %v1657_v62 }
0x10c1   :  { %4733 = vmatpush3.msra.mxu0 %v5228_v63  ;;  %4720 = vmatpush3.msra.mxu1 %v5829_v30 }
0x10c2   :  { %4734 = vmatprep.subr.mxu0 %v5345_v4  ;;  %4721 = vmatprep.subr.mxu1 %v5345_v4 }
0x10c3   :  { %4735 = vmatpush3.msra.mxu0 %v5229_v2  ;;  %4722 = vmatpush3.msra.mxu1 %v5836_v31 }
0x10c4   :  { %4736 = vmatprep.subr.mxu0 %v5345_v4  ;;  %4723 = vmatprep.subr.mxu1 %v5345_v4 }
0x10c5   :  { %4737 = vmatpush3.msra.mxu0 %v5230_v6  ;;  %4724 = vmatpush3.msra.mxu1 %v5883_v34 }
0x10c6   :  { %4727 = vmatprep.mubr.msk.f32.mxu1 %vm5346_vm0, %v5345_v4  ;;  %4725 = vmatprep.subr.mxu1 %v5345_v4 }
0x10c7   :  { %4741 = vmatprep.subr.mxu0 %v5345_v4  ;;  %4726 = vmatpush3.msra.mxu1 %v5890_v36 }
0x117e   :  { %v1833_v30 = vpop.f32.mrf.mxu0 }
0x117f   :  { %v1838_v8 = vrot.slane %v1833_v30, 6 }
0x1180   :  { %v4718_v31 = vpop.f32.mrf.mxu0  ;;  %v1726_v16 = vpop.f32.mrf.mxu1 }
0x1181   :  { %v1840_v14 = vadd.f32 %v1838_v8, %v5643_v9  ;;  %v1731_v37 = vrot.slane %v1726_v16, 4 }
0x1182   :  { %v4707_v17 = vpop.f32.mrf.mxu1 }
0x1183   :  { %5059 = vtanh.f32 %v1840_v14  ;;  %v1733_v34 = vadd.f32 %v1731_v37, %v5648_v15  ;;  %v4315_v21 = vmul.f32 -1.442695, %v1840_v14 }
0x1185   :  { %5061 = vtanh.f32 %v1733_v34  ;;  %v4313_v36 = vmul.f32 -1.442695, %v1733_v34 }
0x1186   :  { %5063 = vpow2.f32 %v4315_v21 }
0x1187   :  { %5065 = vpow2.f32 %v4313_v36 }
0x1190   :  { %v5060_v38 = vpop.eup %5059 }
0x1191   :  { %1853 = vrot.lane.b32.xlu0 %v5060_v38, %s5347_s3 }
0x1192   :  { %v5062_v20 = vpop.eup %5061 }
0x1193   :  { %1746 = vrot.lane.b32.xlu1 %v5062_v20, %s5347_s3  ;;  %v5064_v22 = vpop.eup %5063 }
0x1194   :  { %v5066_v24 = vpop.eup %5065  ;;  %v1844_v25 = vadd.f32 1.0, %v5064_v22 }
0x1195   :  { %v1737_v26 = vadd.f32 1.0, %v5066_v24 }
0x1196   :  { %5067 = vrcp.f32 %v1844_v25 }
0x1197   :  { %5069 = vrcp.f32 %v1737_v26 }
0x11a3   :  { %v5068_v28 = vpop.eup %5067 }
0x11a4   :  { %v5070_v35 = vpop.eup %5069  ;;  %v1851_v43 = vmul.f32 %v5068_v28, %v1849_v41  ;;  %v2120_v41 = vld [vmem:[#allocation6 + $0x58] sm:$0xff] }
0x11a5   :  { %v1744_v12 = vmul.f32 %v5070_v35, %v1742_v44 }
0x1203   :  { %v1854_v29 = vpop.permute.xlu0 %1853 }
0x1204   :  { %v1856_v33 = vmul.f32 %v5068_v28, %v1854_v29 }
0x1205   :  { %v1747_v39 = vpop.permute.xlu1 %1746 }
0x1206   :  { %1858 = vrot.lane.b32.xlu0 %v1856_v33, %s5348_s20  ;;  %v1749_v40 = vmul.f32 %v5070_v35, %v1747_v39  ;;  %v2124_v33 = vld [vmem:[#allocation6 + $0x78] sm:$0xff]  ;;  %v2122_v39 = vld [vmem:[#allocation6 + $0x68] sm:$0xff] }
0x1207   :  { %2160 = vmatprep.subr.mxu1 %v2124_v33 }
0x1208   :  { %1751 = vrot.lane.b32.xlu1 %v1749_v40, %s5348_s20  ;;  %v2121_v40 = vld [vmem:[#allocation6 + $0x60] sm:$0xff] }
0x1278   :  { %v1859_v46 = vpop.permute.xlu0 %1858 }
0x1279   :  { %v1861_v10 = vadd.f32 %v1859_v46, %v1851_v43  ;;  %v5975_v43 = vld [vmem:[#allocation8 + $0x18] sm:$0xff]  ;;  %v2119_v46 = vld [vmem:[#allocation6 + $0x50] sm:$0xff] }
0x127a   :  { %v1752_v5 = vpop.permute.xlu1 %1751 }
0x127b   :  { %5071 = vtanh.f32 %v1861_v10  ;;  %v1754_v7 = vadd.f32 %v1752_v5, %v1744_v12  ;;  %v2060_v21 = vrot.slane %v1861_v10, 2  ;;  %v5978_v10 = vld [vmem:[#allocation8 + $0x10] sm:$0xff]  ;;  %v2118_v12 = vld [vmem:[#allocation6 + $0x48] sm:$0xff]  ;;  %v2117_v5 = vld [vmem:[#allocation6 + $0x40] sm:$0xff] }
0x127d   :  { %5073 = vtanh.f32 %v1754_v7  ;;  %v1956_v25 = vrot.slane %v1754_v7, 6  ;;  %v2116_v7 = vld [vmem:[#allocation6 + $0x38] sm:$0xff] }
0x1288   :  { %v5072_v54 = vpop.eup %5071 }
0x1289   :  { %1864 = vrot.lane.b32.xlu0 %v5072_v54, %s5347_s3  ;;  %v2115_v54 = vld [vmem:[#allocation6 + $0x30] sm:$0xff] }
0x128a   :  { %v5074_v45 = vpop.eup %5073 }
0x128b   :  { %1757 = vrot.lane.b32.xlu1 %v5074_v45, %s5347_s3  ;;  %v5984_v45 = vld [vmem:[#allocation8 + $0x8] sm:$0xff] }
0x12fb   :  { %v1865_v47 = vpop.permute.xlu0 %1864 }
0x12fc   :  { %v5945_v49 = vmul.f32 %v5068_v28, %v1865_v47 }
0x12fd   :  { %v1758_v50 = vpop.permute.xlu1 %1757 }
0x12fe   :  { %v1976_v48 = vrot.slane %v5945_v49, 2  ;;  %v1760_v52 = vmul.f32 %v5070_v35, %v1758_v50  ;;  %v2123_v35 = vld [vmem:[#allocation6 + $0x70] sm:$0xff]  ;;  %v2113_v50 = vld [vmem:[#allocation6 + $0x20] sm:$0xff] }
0x1300   :  { %1977 = vrot.lane.b32.xlu0 %v1976_v48, %s5348_s20  ;;  %v1869_v55 = vrot.slane %v1760_v52, 4  ;;  %v5953_v56 = vsel %vm269_vm4, %v2082_v53, %v1760_v52  ;;  %v2114_v48 = vld [vmem:[#allocation6 + $0x28] sm:$0xff]  ;;  %v5989_v52 = vld [vmem:[#allocation8] sm:$0xff]  ;;  %v2112_v53 = vld [vmem:[#allocation6 + $0x18] sm:$0xff] }
0x1302   :  { %1870 = vrot.lane.b32.xlu1 %v1869_v55, %s5348_s20  ;;  %v2111_v55 = vld [vmem:[#allocation6 + $0x10] sm:$0xff] }
0x1372   :  { %v1978_v57 = vpop.permute.xlu0 %1977 }
0x1373   :  { %4739 = vmatmul.mubr.msk.f32.vlgmr.msra.gmra.mxu0 %vm304_vm8, %v1978_v57  ;;  %v2110_v57 = vld [vmem:[#allocation6 + $0x8] sm:$0xff] }
0x1374   :  { %4749 = vmatprep.mubr.msk.f32.mxu0 %vm5346_vm0, %v5345_v4  ;;  %v1871_v58 = vpop.permute.xlu1 %1870  ;;  %4742 = vmatpush3.msra.mxu0 %v5975_v43 }
0x1375   :  { %4728 = vmatmul.mubr.msk.f32.vlgmr.msra.gmra.mxu1 %vm304_vm8, %v1871_v58  ;;  %4743 = vmatprep.subr.mxu0 %v5345_v4  ;;  %v2109_v58 = vld [vmem:[#allocation6] sm:$0xff] }
0x1376   :  { %2208 = vmatprep.mubr.f32.mxu1 %v5345_v4  ;;  %2161 = vmatpush1.msra.mxu1 %v2123_v35 }
0x1377   :  { %2162 = vmatprep.subr.mxu1 %v2122_v39  ;;  %4744 = vmatpush3.msra.mxu0 %v5978_v10 }
0x1378   :  { %2163 = vmatpush1.msra.mxu1 %v2121_v40  ;;  %4745 = vmatprep.subr.mxu0 %v5345_v4 }
0x1379   :  { %2164 = vmatprep.subr.mxu1 %v2120_v41  ;;  %4746 = vmatpush3.msra.mxu0 %v5984_v45 }
0x137a   :  { %2165 = vmatpush1.msra.mxu1 %v2119_v46  ;;  %4747 = vmatprep.subr.mxu0 %v5345_v4 }
0x137b   :  { %2166 = vmatprep.subr.mxu1 %v2118_v12  ;;  %4748 = vmatpush3.msra.mxu0 %v5989_v52 }
0x137c   :  { %2167 = vmatpush1.msra.mxu1 %v2117_v5  ;;  %4752 = vmatprep.subr.mxu0 %v5345_v4 }
0x137d   :  { %2168 = vmatprep.subr.mxu1 %v2116_v7  ;;  %4750 = vmatmul.mubr.f32.vlgmr.msra.gmra.mxu0 %v5345_v4 }
0x137e   :  { %2169 = vmatpush1.msra.mxu1 %v2115_v54  ;;  %4760 = vmatprep.mubr.msk.f32.mxu0 %vm5346_vm0, %v5345_v4 }
0x137f   :  { %2170 = vmatprep.subr.mxu1 %v2114_v48 }
0x1380   :  { %2171 = vmatpush1.msra.mxu1 %v2113_v50 }
0x1381   :  { %2172 = vmatprep.subr.mxu1 %v2112_v53 }
0x1382   :  { %2173 = vmatpush1.msra.mxu1 %v2111_v55 }
0x1383   :  { %2174 = vmatprep.subr.mxu1 %v2110_v57 }
0x1384   :  { %2175 = vmatpush1.msra.mxu1 %v2109_v58 }
0x1385   :  { %4763 = vmatprep.subr.mxu1 %v5345_v4 }
0x1433   :  { %v2047_v13 = vpop.f32.mrf.mxu0 }
0x1434   :  { %v2051_v59 = vadd.f32 %v2047_v13, %v5643_v9  ;;  %v6002_v13 = vld [vmem:[#allocation8 + $0x30] sm:$0xff] }
0x1435   :  { %v4740_v60 = vpop.f32.mrf.mxu0  ;;  %v1940_v18 = vpop.f32.mrf.mxu1 }
0x1436   :  { %5075 = vtanh.f32 %v2051_v59  ;;  %v1945_v61 = vrot.slane %v1940_v18, 2  ;;  %v4319_v30 = vmul.f32 -1.442695, %v2051_v59  ;;  %v6006_v59 = vld [vmem:[#allocation8 + $0x28] sm:$0xff]  ;;  %v6011_v60 = vld [vmem:[#allocation8 + $0x20] sm:$0xff] }
0x1437   :  { %v4729_v62 = vpop.f32.mrf.mxu1 }
0x1438   :  { %v1947_v63 = vadd.f32 %v1945_v61, %v5648_v15 }
0x143a   :  { %5077 = vtanh.f32 %v1947_v63  ;;  %v4317_v8 = vmul.f32 -1.442695, %v1947_v63  ;;  %v2088_v63 = vsel %vm265_vm2, %v5809_v23, %v5760_v32 }
0x143b   :  { %5079 = vpow2.f32 %v4319_v30  ;;  %v2089_v32 = vsel %vm269_vm4, %v2088_v63, %v5714_v42 }
0x143c   :  { %5081 = vpow2.f32 %v4317_v8 }
0x1443   :  { %v5076_v2 = vpop.eup %5075 }
0x1444   :  { %2064 = vrot.lane.b32.xlu0 %v5076_v2, %s5347_s3 }
0x1447   :  { %v5078_v6 = vpop.eup %5077 }
0x1448   :  { %1960 = vrot.lane.b32.xlu1 %v5078_v6, %s5347_s3  ;;  %v5080_v31 = vpop.eup %5079 }
0x1449   :  { %v2055_v9 = vadd.f32 1.0, %v5080_v31  ;;  %v5082_v14 = vpop.eup %5081 }
0x144a   :  { %v1951_v16 = vadd.f32 1.0, %v5082_v14 }
0x144b   :  { %5083 = vrcp.f32 %v2055_v9 }
0x144c   :  { %5085 = vrcp.f32 %v1951_v16 }
0x1458   :  { %v5965_v37 = vpop.eup %5083 }
0x1459   :  { %v5969_v34 = vpop.eup %5085  ;;  %v2062_v36 = vmul.f32 %v5965_v37, %v2060_v21 }
0x145a   :  { %v1958_v26 = vmul.f32 %v5969_v34, %v1956_v25 }
0x14b6   :  { %v2065_v15 = vpop.permute.xlu0 %2064 }
0x14b7   :  { %v2067_v17 = vmul.f32 %v5965_v37, %v2065_v15  ;;  %v2125_v15 = vld [vmem:[%s6377_s6] sm:$0x3] }
0x14b9   :  { %2069 = vrot.lane.b32.xlu0 %v2067_v17, %s5348_s20  ;;  %v2130_v17 = vrot.slane %v2125_v15, %v296_v11 }
0x14ba   :  { %v1961_v38 = vpop.permute.xlu1 %1960 }
0x14bb   :  { %v1963_v20 = vmul.f32 %v5969_v34, %v1961_v38 }
0x14bd   :  { %1965 = vrot.lane.b32.xlu1 %v1963_v20, %s5348_s20 }
0x152b   :  { %v2070_v22 = vpop.permute.xlu0 %2069 }
0x152c   :  { %v2072_v24 = vadd.f32 %v2070_v22, %v2062_v36 }
0x152e   :  { %5087 = vtanh.f32 %v2072_v24 }
0x152f   :  { %v1966_v28 = vpop.permute.xlu1 %1965 }
0x1530   :  { %v1968_v29 = vadd.f32 %v1966_v28, %v1958_v26 }
0x1532   :  { %5089 = vtanh.f32 %v1968_v29 }
0x153b   :  { %v5088_v44 = vpop.eup %5087 }
0x153c   :  { %2075 = vrot.lane.b32.xlu0 %v5088_v44, %s5347_s3 }
0x153f   :  { %v5090_v47 = vpop.eup %5089 }
0x1540   :  { %2093 = vrot.lane.b32.xlu0 %v5815_v27, %s5348_s20  ;;  %1971 = vrot.lane.b32.xlu1 %v5090_v47, %s5347_s3  ;;  %v5994_v27 = vld [vmem:[#allocation8 + $0x38] sm:$0xff] }
0x1541   :  { %4753 = vmatpush3.msra.mxu0 %v5994_v27 }
0x1542   :  { %4754 = vmatprep.subr.mxu0 %v5345_v4 }
0x1543   :  { %4755 = vmatpush3.msra.mxu0 %v6002_v13 }
0x1544   :  { %4756 = vmatprep.subr.mxu0 %v5345_v4 }
0x1545   :  { %4757 = vmatpush3.msra.mxu0 %v6006_v59 }
0x1546   :  { %4758 = vmatprep.subr.mxu0 %v5345_v4 }
0x1547   :  { %4759 = vmatpush3.msra.mxu0 %v6011_v60 }
0x1548   :  { %4761 = vmatmul.mubr.f32.vlgmr.msra.gmra.mxu0 %v5345_v4  ;;  %4774 = vmatprep.subr.mxu0 %v5345_v4 }
0x1549   :  { %4775 = vmatpush3.msra.mxu0 %v5994_v27  ;;  %4782 = vmatprep.mubr.msk.f32.mxu0 %vm5346_vm0, %v5345_v4 }
0x154a   :  { %4776 = vmatprep.subr.mxu0 %v5345_v4 }
0x154b   :  { %4777 = vmatpush3.msra.mxu0 %v6002_v13 }
0x154c   :  { %4778 = vmatprep.subr.mxu0 %v5345_v4 }
0x154d   :  { %4779 = vmatpush3.msra.mxu0 %v6006_v59 }
0x154e   :  { %4780 = vmatprep.subr.mxu0 %v5345_v4 }
0x154f   :  { %4781 = vmatpush3.msra.mxu0 %v6011_v60 }
0x1550   :  { %4796 = vmatprep.subr.mxu0 %v5345_v4 }
0x15ae   :  { %v2076_v18 = vpop.permute.xlu0 %2075 }
0x15af   :  { %v2078_v61 = vmul.f32 %v5965_v37, %v2076_v18 }
0x15b1   :  { %v2085_v62 = vsel %vm265_vm2, %v2078_v61, %v5945_v49 }
0x15b2   :  { %v2086_v2 = vsel %vm269_vm4, %v2085_v62, %v5910_v19  ;;  %v1972_v6 = vpop.permute.xlu1 %1971  ;;  %v2296_v19 = vpop.f32.mrf.mxu0 }
0x15b3   :  { %v2087_v30 = vsel %vm273_vm6, %v2086_v2, %v5860_v3  ;;  %v1974_v8 = vmul.f32 %v5969_v34, %v1972_v6  ;;  %v2090_v3 = vsel %vm273_vm6, %v2089_v32, %v5668_v51  ;;  %v2094_v31 = vpop.permute.xlu0 %2093  ;;  %v2134_v34 = vrot.slane %v2125_v15, %v300_v1 }
0x15b4   :  { %2101 = vrot.lane.b32.xlu1 %v2087_v30, %s5347_s3  ;;  %v4751_v49 = vpop.f32.mrf.mxu0 }
0x15b5   :  { %v2084_v23 = vsel %vm273_vm6, %v5953_v56, %v1974_v8 }
0x15b6   :  { %2095 = vrot.lane.b32.xlu0 %v2084_v23, %s5348_s20 }
0x15b8   :  { %2103 = vrot.lane.b32.xlu1 %v2090_v3, %s5347_s3 }
0x1608   :  { %v2391_v16 = vpop.f32.mrf.mxu0 }
0x1609   :  { %v2396_v26 = vrot.slane %v2391_v16, 2 }
0x160a   :  { %v4762_v37 = vpop.f32.mrf.mxu0 }
0x1626   :  { %v2102_v9 = vpop.permute.xlu1 %2101 }
0x1627   :  { %v2107_v42 = vsel %vm304_vm8, %v2094_v31, %v2102_v9 }
0x1628   :  { %4320 = vmatmul.mubr.msk.f32.vlgmr.msra.gmra.mxu1 %vm2137_vm9, %v2107_v42  ;;  %v2096_v56 = vpop.permute.xlu0 %2095 }
0x1629   :  { %2214 = vmatprep.mubr.f32.mxu1 %v5345_v4  ;;  %4764 = vmatpush3.msra.mxu1 %v5975_v43 }
0x162a   :  { %v2104_v14 = vpop.permute.xlu1 %2103  ;;  %4765 = vmatprep.subr.mxu1 %v5345_v4 }
0x162b   :  { %v2108_v51 = vsel %vm304_vm8, %v2096_v56, %v2104_v14  ;;  %4766 = vmatpush3.msra.mxu1 %v5978_v10 }
0x162c   :  { %4321 = vmatmul.mubr.msk.f32.gmra.mxu1 %vm2137_vm9, %v2108_v51  ;;  %4767 = vmatprep.subr.mxu1 %v5345_v4 }
0x162d   :  { %4768 = vmatpush3.msra.mxu1 %v5984_v45  ;;  %4771 = vmatprep.mubr.msk.f32.mxu1 %vm5346_vm0, %v5345_v4 }
0x162e   :  { %4769 = vmatprep.subr.mxu1 %v5345_v4 }
0x162f   :  { %4770 = vmatpush3.msra.mxu1 %v5989_v52 }
0x1630   :  { %4785 = vmatprep.subr.mxu1 %v5345_v4 }
0x16e8   :  { %v2210_v38 = vpop.f32.mrf.mxu1 }
0x16e9   :  { %v6066_v20 = vadd.f32 %v2210_v38, %v2130_v17 }
0x16ea   :  { %v2212_v21 = vpop.f32.mrf.mxu1 }
0x16eb   :  { %v2300_v36 = vadd.f32 %v2296_v19, %v6066_v20  ;;  %v6069_v22 = vadd.f32 %v2212_v21, %v2134_v34 }
0x16ec   :  { %v2216_v24 = vpop.f32.mrf.mxu1 }
0x16ed   :  { %5091 = vtanh.f32 %v2300_v36  ;;  %v6071_v25 = vadd.f32 %v2216_v24, %v2130_v17  ;;  %v4322_v33 = vmul.f32 -1.442695, %v2300_v36 }
0x16ee   :  { %v2218_v28 = vpop.f32.mrf.mxu1 }
0x16ef   :  { %v6073_v29 = vadd.f32 %v2218_v28, %v2134_v34 }
0x16f1   :  { %v2398_v11 = vadd.f32 %v2396_v26, %v6073_v29 }
0x16f3   :  { %5093 = vtanh.f32 %v2398_v11  ;;  %v4323_v35 = vmul.f32 -1.442695, %v2398_v11 }
0x16f4   :  { %5095 = vpow2.f32 %v4322_v33 }
0x16f5   :  { %5097 = vpow2.f32 %v4323_v35 }
0x16fa   :  { %v5092_v0 = vpop.eup %5091 }
0x16fb   :  { %2310 = vrot.lane.b32.xlu0 %v5092_v0, %s5347_s3 }
0x1700   :  { %v5094_v1 = vpop.eup %5093 }
0x1701   :  { %2408 = vrot.lane.b32.xlu1 %v5094_v1, %s5347_s3  ;;  %v5096_v39 = vpop.eup %5095 }
0x1702   :  { %v2304_v40 = vadd.f32 1.0, %v5096_v39  ;;  %v5098_v41 = vpop.eup %5097 }
0x1703   :  { %v2402_v44 = vadd.f32 1.0, %v5098_v41 }
0x1704   :  { %5099 = vrcp.f32 %v2304_v40 }
0x1705   :  { %5101 = vrcp.f32 %v2402_v44 }
0x1711   :  { %v5100_v46 = vpop.eup %5099 }
0x1712   :  { %v5102_v7 = vpop.eup %5101  ;;  %v2308_v48 = vmul.f32 0.0, %v5100_v46 }
0x1713   :  { %v2406_v55 = vmul.f32 0.0, %v5102_v7 }
0x176d   :  { %v2311_v12 = vpop.permute.xlu0 %2310 }
0x176e   :  { %v2313_v5 = vmul.f32 %v5100_v46, %v2311_v12 }
0x1770   :  { %2315 = vrot.lane.b32.xlu0 %v2313_v5, %s5348_s20 }
0x1773   :  { %v2409_v54 = vpop.permute.xlu1 %2408 }
0x1774   :  { %v2411_v47 = vmul.f32 %v5102_v7, %v2409_v54 }
0x1776   :  { %2413 = vrot.lane.b32.xlu1 %v2411_v47, %s5348_s20 }
0x17e2   :  { %v2316_v50 = vpop.permute.xlu0 %2315 }
0x17e3   :  { %v6080_v53 = vadd.f32 %v2316_v50, %v2308_v48 }
0x17e5   :  { %5103 = vtanh.f32 %v6080_v53  ;;  %v2510_v0 = vrot.slane %v6080_v53, 6 }
0x17e8   :  { %v2414_v57 = vpop.permute.xlu1 %2413 }
0x17e9   :  { %v6083_v58 = vadd.f32 %v2414_v57, %v2406_v55 }
0x17eb   :  { %5105 = vtanh.f32 %v6083_v58  ;;  %v2617_v39 = vrot.slane %v6083_v58, 2 }
0x17f2   :  { %v5104_v18 = vpop.eup %5103 }
0x17f3   :  { %2321 = vrot.lane.b32.xlu0 %v5104_v18, %s5347_s3 }
0x17f8   :  { %v5106_v61 = vpop.eup %5105 }
0x17f9   :  { %2419 = vrot.lane.b32.xlu1 %v5106_v61, %s5347_s3 }
0x1865   :  { %v2322_v62 = vpop.permute.xlu0 %2321 }
0x1866   :  { %v2324_v63 = vmul.f32 %v5100_v46, %v2322_v62 }
0x1868   :  { %2424 = vrot.lane.b32.xlu0 %v2324_v63, %s5348_s20 }
0x186b   :  { %v2420_v2 = vpop.permute.xlu1 %2419 }
0x186c   :  { %v2422_v6 = vmul.f32 %v5102_v7, %v2420_v2 }
0x186e   :  { %v2530_v30 = vrot.slane %v2422_v6, 6 }
0x1870   :  { %2531 = vrot.lane.b32.xlu1 %v2530_v30, %s5348_s20 }
0x18da   :  { %v2425_v8 = vpop.permute.xlu0 %2424 }
0x18db   :  { %4772 = vmatmul.mubr.msk.f32.vlgmr.msra.gmra.mxu1 %vm304_vm8, %v2425_v8 }
0x18dc   :  { %4786 = vmatpush3.msra.mxu1 %v5975_v43  ;;  %4793 = vmatprep.mubr.msk.f32.mxu1 %vm5346_vm0, %v5345_v4 }
0x18dd   :  { %4787 = vmatprep.subr.mxu1 %v5345_v4 }
0x18de   :  { %4788 = vmatpush3.msra.mxu1 %v5978_v10 }
0x18df   :  { %4789 = vmatprep.subr.mxu1 %v5345_v4 }
0x18e0   :  { %4790 = vmatpush3.msra.mxu1 %v5984_v45 }
0x18e1   :  { %4791 = vmatprep.subr.mxu1 %v5345_v4 }
0x18e2   :  { %v2532_v32 = vpop.permute.xlu1 %2531  ;;  %4792 = vmatpush3.msra.mxu1 %v5989_v52 }
0x18e3   :  { %4783 = vmatmul.mubr.msk.f32.vlgmr.msra.gmra.mxu0 %vm304_vm8, %v2532_v32  ;;  %4807 = vmatprep.subr.mxu1 %v5345_v4 }
0x18e4   :  { %4797 = vmatpush3.msra.mxu0 %v5994_v27  ;;  %4804 = vmatprep.mubr.msk.f32.mxu0 %vm5346_vm0, %v5345_v4 }
0x18e5   :  { %4798 = vmatprep.subr.mxu0 %v5345_v4 }
0x18e6   :  { %4799 = vmatpush3.msra.mxu0 %v6002_v13 }
0x18e7   :  { %4800 = vmatprep.subr.mxu0 %v5345_v4 }
0x18e8   :  { %4801 = vmatpush3.msra.mxu0 %v6006_v59 }
0x18e9   :  { %4802 = vmatprep.subr.mxu0 %v5345_v4 }
0x18ea   :  { %4803 = vmatpush3.msra.mxu0 %v6011_v60 }
0x18eb   :  { %4818 = vmatprep.subr.mxu0 %v5345_v4 }
0x199b   :  { %v2494_v23 = vpop.f32.mrf.mxu1 }
0x199c   :  { %v2499_v3 = vrot.slane %v2494_v23, 6 }
0x199d   :  { %v4773_v19 = vpop.f32.mrf.mxu1 }
0x199e   :  { %v2501_v49 = vadd.f32 %v2499_v3, %v6066_v20 }
0x19a0   :  { %5107 = vtanh.f32 %v2501_v49  ;;  %v4325_v16 = vmul.f32 -1.442695, %v2501_v49 }
0x19a3   :  { %v2601_v31 = vpop.f32.mrf.mxu0 }
0x19a4   :  { %v2606_v9 = vrot.slane %v2601_v31, 4 }
0x19a5   :  { %v4784_v42 = vpop.f32.mrf.mxu0 }
0x19a6   :  { %v2608_v56 = vadd.f32 %v2606_v9, %v6073_v29 }
0x19a8   :  { %5109 = vtanh.f32 %v2608_v56  ;;  %v4327_v37 = vmul.f32 -1.442695, %v2608_v56 }
0x19a9   :  { %5111 = vpow2.f32 %v4325_v16 }
0x19aa   :  { %5113 = vpow2.f32 %v4327_v37 }
0x19ad   :  { %v5108_v14 = vpop.eup %5107 }
0x19ae   :  { %2514 = vrot.lane.b32.xlu0 %v5108_v14, %s5347_s3 }
0x19b5   :  { %v5110_v51 = vpop.eup %5109 }
0x19b6   :  { %2621 = vrot.lane.b32.xlu1 %v5110_v51, %s5347_s3  ;;  %v5112_v15 = vpop.eup %5111 }
0x19b7   :  { %v2505_v17 = vadd.f32 1.0, %v5112_v15  ;;  %v5114_v34 = vpop.eup %5113 }
0x19b8   :  { %v2612_v38 = vadd.f32 1.0, %v5114_v34 }
0x19b9   :  { %5115 = vrcp.f32 %v2505_v17 }
0x19ba   :  { %5117 = vrcp.f32 %v2612_v38 }
0x19c6   :  { %v5116_v21 = vpop.eup %5115 }
0x19c7   :  { %v5118_v26 = vpop.eup %5117  ;;  %v2512_v1 = vmul.f32 %v5116_v21, %v2510_v0 }
0x19c8   :  { %v2619_v40 = vmul.f32 %v5118_v26, %v2617_v39 }
0x1a20   :  { %v2515_v36 = vpop.permute.xlu0 %2514 }
0x1a21   :  { %v2517_v24 = vmul.f32 %v5116_v21, %v2515_v36 }
0x1a23   :  { %2519 = vrot.lane.b32.xlu0 %v2517_v24, %s5348_s20 }
0x1a28   :  { %v2622_v28 = vpop.permute.xlu1 %2621 }
0x1a29   :  { %v2624_v11 = vmul.f32 %v5118_v26, %v2622_v28 }
0x1a2b   :  { %2626 = vrot.lane.b32.xlu1 %v2624_v11, %s5348_s20 }
0x1a95   :  { %v2520_v33 = vpop.permute.xlu0 %2519 }
0x1a96   :  { %v6119_v35 = vadd.f32 %v2520_v33, %v2512_v1 }
0x1a98   :  { %5119 = vtanh.f32 %v6119_v35  ;;  %v2724_v37 = vrot.slane %v6119_v35, 6 }
0x1a9d   :  { %v2627_v41 = vpop.permute.xlu1 %2626 }
0x1a9e   :  { %v6123_v44 = vadd.f32 %v2627_v41, %v2619_v40 }
0x1aa0   :  { %5121 = vtanh.f32 %v6123_v44  ;;  %v2831_v38 = vrot.slane %v6123_v44, 2 }
0x1aa5   :  { %v5120_v46 = vpop.eup %5119 }
0x1aa6   :  { %2525 = vrot.lane.b32.xlu0 %v5120_v46, %s5347_s3 }
0x1aad   :  { %v5122_v12 = vpop.eup %5121 }
0x1aae   :  { %2632 = vrot.lane.b32.xlu1 %v5122_v12, %s5347_s3 }
0x1b18   :  { %v2526_v5 = vpop.permute.xlu0 %2525 }
0x1b19   :  { %v2528_v7 = vmul.f32 %v5116_v21, %v2526_v5 }
0x1b1b   :  { %v2637_v54 = vrot.slane %v2528_v7, 2 }
0x1b1d   :  { %2638 = vrot.lane.b32.xlu0 %v2637_v54, %s5348_s20 }
0x1b20   :  { %v2633_v47 = vpop.permute.xlu1 %2632 }
0x1b21   :  { %v2635_v48 = vmul.f32 %v5118_v26, %v2633_v47 }
0x1b23   :  { %v2744_v50 = vrot.slane %v2635_v48, 4 }
0x1b25   :  { %2745 = vrot.lane.b32.xlu1 %v2744_v50, %s5348_s20 }
0x1b8f   :  { %v2639_v53 = vpop.permute.xlu0 %2638 }
0x1b90   :  { %4794 = vmatmul.mubr.msk.f32.vlgmr.msra.gmra.mxu1 %vm304_vm8, %v2639_v53 }
0x1b91   :  { %4808 = vmatpush3.msra.mxu1 %v5975_v43  ;;  %4815 = vmatprep.mubr.msk.f32.mxu1 %vm5346_vm0, %v5345_v4 }
0x1b92   :  { %4809 = vmatprep.subr.mxu1 %v5345_v4 }
0x1b93   :  { %4810 = vmatpush3.msra.mxu1 %v5978_v10 }
0x1b94   :  { %4811 = vmatprep.subr.mxu1 %v5345_v4 }
0x1b95   :  { %4812 = vmatpush3.msra.mxu1 %v5984_v45 }
0x1b96   :  { %4813 = vmatprep.subr.mxu1 %v5345_v4 }
0x1b97   :  { %v2746_v55 = vpop.permute.xlu1 %2745  ;;  %4814 = vmatpush3.msra.mxu1 %v5989_v52 }
0x1b98   :  { %4805 = vmatmul.mubr.msk.f32.vlgmr.msra.gmra.mxu0 %vm304_vm8, %v2746_v55  ;;  %4829 = vmatprep.subr.mxu1 %v5345_v4 }
0x1b99   :  { %4819 = vmatpush3.msra.mxu0 %v5994_v27  ;;  %4826 = vmatprep.mubr.msk.f32.mxu0 %vm5346_vm0, %v5345_v4 }
0x1b9a   :  { %4820 = vmatprep.subr.mxu0 %v5345_v4 }
0x1b9b   :  { %4821 = vmatpush3.msra.mxu0 %v6002_v13 }
0x1b9c   :  { %4822 = vmatprep.subr.mxu0 %v5345_v4 }
0x1b9d   :  { %4823 = vmatpush3.msra.mxu0 %v6006_v59 }
0x1b9e   :  { %4824 = vmatprep.subr.mxu0 %v5345_v4 }
0x1b9f   :  { %4825 = vmatpush3.msra.mxu0 %v6011_v60 }
0x1ba0   :  { %4840 = vmatprep.subr.mxu0 %v5345_v4 }
0x1c50   :  { %v2708_v57 = vpop.f32.mrf.mxu1 }
0x1c51   :  { %v2713_v58 = vrot.slane %v2708_v57, 4 }
0x1c52   :  { %v4795_v18 = vpop.f32.mrf.mxu1 }
0x1c53   :  { %v2715_v61 = vadd.f32 %v2713_v58, %v6066_v20 }
0x1c55   :  { %5123 = vtanh.f32 %v2715_v61  ;;  %v4329_v32 = vmul.f32 -1.442695, %v2715_v61 }
0x1c58   :  { %v2815_v62 = vpop.f32.mrf.mxu0 }
0x1c59   :  { %v2820_v63 = vrot.slane %v2815_v62, 6 }
0x1c5a   :  { %v4806_v2 = vpop.f32.mrf.mxu0 }
0x1c5b   :  { %v2822_v6 = vadd.f32 %v2820_v63, %v6073_v29 }
0x1c5d   :  { %5125 = vtanh.f32 %v2822_v6  ;;  %v4331_v23 = vmul.f32 -1.442695, %v2822_v6 }
0x1c5e   :  { %5127 = vpow2.f32 %v4329_v32 }
0x1c5f   :  { %5129 = vpow2.f32 %v4331_v23 }
0x1c62   :  { %v5124_v30 = vpop.eup %5123 }
0x1c63   :  { %2728 = vrot.lane.b32.xlu0 %v5124_v30, %s5347_s3 }
0x1c6a   :  { %v5126_v8 = vpop.eup %5125 }
0x1c6b   :  { %2835 = vrot.lane.b32.xlu1 %v5126_v8, %s5347_s3  ;;  %v5128_v3 = vpop.eup %5127 }
0x1c6c   :  { %v2719_v19 = vadd.f32 1.0, %v5128_v3  ;;  %v5130_v49 = vpop.eup %5129 }
0x1c6d   :  { %v2826_v31 = vadd.f32 1.0, %v5130_v49 }
0x1c6e   :  { %5131 = vrcp.f32 %v2719_v19 }
0x1c6f   :  { %5133 = vrcp.f32 %v2826_v31 }
0x1c7b   :  { %v5132_v9 = vpop.eup %5131 }
0x1c7c   :  { %v5134_v14 = vpop.eup %5133  ;;  %v2726_v15 = vmul.f32 %v5132_v9, %v2724_v37 }
0x1c7d   :  { %v2833_v21 = vmul.f32 %v5134_v14, %v2831_v38 }
0x1cd5   :  { %v2729_v42 = vpop.permute.xlu0 %2728 }
0x1cd6   :  { %v2731_v56 = vmul.f32 %v5132_v9, %v2729_v42 }
0x1cd8   :  { %2733 = vrot.lane.b32.xlu0 %v2731_v56, %s5348_s20 }
0x1cdd   :  { %v2836_v51 = vpop.permute.xlu1 %2835 }
0x1cde   :  { %v2838_v16 = vmul.f32 %v5134_v14, %v2836_v51 }
0x1ce0   :  { %2840 = vrot.lane.b32.xlu1 %v2838_v16, %s5348_s20 }
0x1d4a   :  { %v2734_v17 = vpop.permute.xlu0 %2733 }
0x1d4b   :  { %v6159_v34 = vadd.f32 %v2734_v17, %v2726_v15 }
0x1d4d   :  { %5135 = vtanh.f32 %v6159_v34  ;;  %v2938_v30 = vrot.slane %v6159_v34, 6 }
0x1d52   :  { %v2841_v36 = vpop.permute.xlu1 %2840 }
0x1d53   :  { %v6163_v24 = vadd.f32 %v2841_v36, %v2833_v21 }
0x1d55   :  { %5137 = vtanh.f32 %v6163_v24  ;;  %v3042_v3 = vrot.slane %v6163_v24, 2 }
0x1d5a   :  { %v5136_v26 = vpop.eup %5135 }
0x1d5b   :  { %2739 = vrot.lane.b32.xlu0 %v5136_v26, %s5347_s3 }
0x1d62   :  { %v5138_v28 = vpop.eup %5137 }
0x1d63   :  { %2846 = vrot.lane.b32.xlu1 %v5138_v28, %s5347_s3 }
0x1dcd   :  { %v2740_v11 = vpop.permute.xlu0 %2739 }
0x1dce   :  { %v2742_v0 = vmul.f32 %v5132_v9, %v2740_v11 }
0x1dd0   :  { %v2851_v1 = vrot.slane %v2742_v0, 4 }
0x1dd2   :  { %2852 = vrot.lane.b32.xlu0 %v2851_v1, %s5348_s20 }
0x1dd5   :  { %v2847_v33 = vpop.permute.xlu1 %2846 }
0x1dd6   :  { %v2849_v35 = vmul.f32 %v5134_v14, %v2847_v33 }
0x1dd8   :  { %v2958_v39 = vrot.slane %v2849_v35, 2 }
0x1dda   :  { %2959 = vrot.lane.b32.xlu1 %v2958_v39, %s5348_s20 }
0x1e44   :  { %v2853_v40 = vpop.permute.xlu0 %2852 }
0x1e45   :  { %4816 = vmatmul.mubr.msk.f32.vlgmr.msra.gmra.mxu1 %vm304_vm8, %v2853_v40 }
0x1e46   :  { %4830 = vmatpush3.msra.mxu1 %v5975_v43  ;;  %4837 = vmatprep.mubr.msk.f32.mxu1 %vm5346_vm0, %v5345_v4 }
0x1e47   :  { %4831 = vmatprep.subr.mxu1 %v5345_v4 }
0x1e48   :  { %4832 = vmatpush3.msra.mxu1 %v5978_v10 }
0x1e49   :  { %4833 = vmatprep.subr.mxu1 %v5345_v4 }
0x1e4a   :  { %4834 = vmatpush3.msra.mxu1 %v5984_v45 }
0x1e4b   :  { %4835 = vmatprep.subr.mxu1 %v5345_v4 }
0x1e4c   :  { %v2960_v41 = vpop.permute.xlu1 %2959  ;;  %4836 = vmatpush3.msra.mxu1 %v5989_v52 }
0x1e4d   :  { %4827 = vmatmul.mubr.msk.f32.vlgmr.msra.gmra.mxu0 %vm304_vm8, %v2960_v41  ;;  %4851 = vmatprep.subr.mxu1 %v5345_v4 }
0x1e4e   :  { %4841 = vmatpush3.msra.mxu0 %v5994_v27  ;;  %4848 = vmatprep.mubr.msk.f32.mxu0 %vm5346_vm0, %v5345_v4 }
0x1e4f   :  { %4842 = vmatprep.subr.mxu0 %v5345_v4 }
0x1e50   :  { %4843 = vmatpush3.msra.mxu0 %v6002_v13 }
0x1e51   :  { %4844 = vmatprep.subr.mxu0 %v5345_v4 }
0x1e52   :  { %4845 = vmatpush3.msra.mxu0 %v6006_v59 }
0x1e53   :  { %4846 = vmatprep.subr.mxu0 %v5345_v4 }
0x1e54   :  { %4847 = vmatpush3.msra.mxu0 %v6011_v60 }
0x1e55   :  { %4862 = vmatprep.subr.mxu0 %v5345_v4 }
0x1f05   :  { %v2922_v44 = vpop.f32.mrf.mxu1 }
0x1f06   :  { %v2927_v46 = vrot.slane %v2922_v44, 2 }
0x1f07   :  { %v4817_v12 = vpop.f32.mrf.mxu1 }
0x1f08   :  { %v2929_v5 = vadd.f32 %v2927_v46, %v6066_v20 }
0x1f0a   :  { %5139 = vtanh.f32 %v2929_v5  ;;  %v4333_v53 = vmul.f32 -1.442695, %v2929_v5 }
0x1f0d   :  { %v3029_v7 = vpop.f32.mrf.mxu0 }
0x1f0e   :  { %v3033_v54 = vadd.f32 %v3029_v7, %v6073_v29 }
0x1f0f   :  { %v4828_v47 = vpop.f32.mrf.mxu0 }
0x1f10   :  { %5141 = vtanh.f32 %v3033_v54  ;;  %v4335_v55 = vmul.f32 -1.442695, %v3033_v54 }
0x1f11   :  { %5143 = vpow2.f32 %v4333_v53 }
0x1f12   :  { %5145 = vpow2.f32 %v4335_v55 }
0x1f17   :  { %v5140_v48 = vpop.eup %5139 }
0x1f18   :  { %2942 = vrot.lane.b32.xlu0 %v5140_v48, %s5347_s3 }
0x1f1d   :  { %v5142_v50 = vpop.eup %5141 }
0x1f1e   :  { %3046 = vrot.lane.b32.xlu1 %v5142_v50, %s5347_s3  ;;  %v5144_v57 = vpop.eup %5143 }
0x1f1f   :  { %v2933_v58 = vadd.f32 1.0, %v5144_v57  ;;  %v5146_v18 = vpop.eup %5145 }
0x1f20   :  { %v3037_v20 = vadd.f32 1.0, %v5146_v18 }
0x1f21   :  { %5147 = vrcp.f32 %v2933_v58 }
0x1f22   :  { %5149 = vrcp.f32 %v3037_v20 }
0x1f2e   :  { %v5148_v61 = vpop.eup %5147 }
0x1f2f   :  { %v5150_v63 = vpop.eup %5149  ;;  %v2940_v8 = vmul.f32 %v5148_v61, %v2938_v30 }
0x1f30   :  { %v3044_v19 = vmul.f32 %v5150_v63, %v3042_v3 }
0x1f8a   :  { %v2943_v29 = vpop.permute.xlu0 %2942 }
0x1f8b   :  { %v2945_v62 = vmul.f32 %v5148_v61, %v2943_v29 }
0x1f8d   :  { %2947 = vrot.lane.b32.xlu0 %v2945_v62, %s5348_s20 }
0x1f90   :  { %v3047_v2 = vpop.permute.xlu1 %3046 }
0x1f91   :  { %v3049_v6 = vmul.f32 %v5150_v63, %v3047_v2 }
0x1f93   :  { %3051 = vrot.lane.b32.xlu1 %v3049_v6, %s5348_s20 }
0x1fff   :  { %v2948_v32 = vpop.permute.xlu0 %2947 }
0x2000   :  { %v6199_v23 = vadd.f32 %v2948_v32, %v2940_v8 }
0x2002   :  { %5151 = vtanh.f32 %v6199_v23  ;;  %v3146_v47 = vrot.slane %v6199_v23, 6 }
0x2005   :  { %v3052_v49 = vpop.permute.xlu1 %3051 }
0x2006   :  { %v6203_v31 = vadd.f32 %v3052_v49, %v3044_v19 }
0x2008   :  { %5153 = vtanh.f32 %v6203_v31  ;;  %v3252_v55 = vrot.slane %v6203_v31, 2 }
0x200f   :  { %v5152_v9 = vpop.eup %5151 }
0x2010   :  { %2953 = vrot.lane.b32.xlu0 %v5152_v9, %s5347_s3 }
0x2015   :  { %v5154_v42 = vpop.eup %5153 }
0x2016   :  { %3057 = vrot.lane.b32.xlu1 %v5154_v42, %s5347_s3 }
0x2082   :  { %v2954_v56 = vpop.permute.xlu0 %2953 }
0x2083   :  { %v2956_v14 = vmul.f32 %v5148_v61, %v2954_v56 }
0x2085   :  { %v3062_v51 = vrot.slane %v2956_v14, 6 }
0x2087   :  { %3063 = vrot.lane.b32.xlu0 %v3062_v51, %s5348_s20 }
0x2088   :  { %v3058_v16 = vpop.permute.xlu1 %3057 }
0x2089   :  { %v3060_v37 = vmul.f32 %v5150_v63, %v3058_v16 }
0x208b   :  { %3166 = vrot.lane.b32.xlu1 %v3060_v37, %s5348_s20 }
0x20f9   :  { %v3064_v15 = vpop.permute.xlu0 %3063 }
0x20fa   :  { %4838 = vmatmul.mubr.msk.f32.vlgmr.msra.gmra.mxu1 %vm304_vm8, %v3064_v15 }
0x20fb   :  { %4852 = vmatpush3.msra.mxu1 %v5975_v43  ;;  %4859 = vmatprep.mubr.msk.f32.mxu1 %vm5346_vm0, %v5345_v4 }
0x20fc   :  { %4853 = vmatprep.subr.mxu1 %v5345_v4 }
0x20fd   :  { %v3167_v17 = vpop.permute.xlu1 %3166  ;;  %4854 = vmatpush3.msra.mxu1 %v5978_v10 }
0x20fe   :  { %4849 = vmatmul.mubr.msk.f32.vlgmr.msra.gmra.mxu0 %vm304_vm8, %v3167_v17  ;;  %4855 = vmatprep.subr.mxu1 %v5345_v4 }
0x20ff   :  { %4856 = vmatpush3.msra.mxu1 %v5984_v45  ;;  %4863 = vmatpush3.msra.mxu0 %v5994_v27 }
0x2100   :  { %4857 = vmatprep.subr.mxu1 %v5345_v4  ;;  %4864 = vmatprep.subr.mxu0 %v5345_v4 }
0x2101   :  { %4858 = vmatpush3.msra.mxu1 %v5989_v52  ;;  %4865 = vmatpush3.msra.mxu0 %v6002_v13 }
0x2102   :  { %4866 = vmatprep.subr.mxu0 %v5345_v4  ;;  %4870 = vmatprep.mubr.msk.f32.mxu0 %vm5346_vm0, %v5345_v4 }
0x2103   :  { %4867 = vmatpush3.msra.mxu0 %v6006_v59  ;;  %4873 = vmatprep.subr.mxu1 %v5345_v4 }
0x2104   :  { %4868 = vmatprep.subr.mxu0 %v5345_v4 }
0x2105   :  { %4869 = vmatpush3.msra.mxu0 %v6011_v60 }
0x2106   :  { %4884 = vmatprep.subr.mxu0 %v5345_v4 }
0x21ba   :  { %v3133_v34 = vpop.f32.mrf.mxu1 }
0x21bb   :  { %v3137_v38 = vadd.f32 %v3133_v34, %v6071_v25 }
0x21bc   :  { %v4839_v21 = vpop.f32.mrf.mxu1 }
0x21bd   :  { %5155 = vtanh.f32 %v3137_v38  ;;  %v4337_v1 = vmul.f32 -1.442695, %v3137_v38 }
0x21be   :  { %v3236_v36 = vpop.f32.mrf.mxu0 }
0x21bf   :  { %v3241_v24 = vrot.slane %v3236_v36, 2 }
0x21c0   :  { %v4850_v26 = vpop.f32.mrf.mxu0 }
0x21c1   :  { %v3243_v28 = vadd.f32 %v3241_v24, %v6069_v22 }
0x21c3   :  { %5157 = vtanh.f32 %v3243_v28  ;;  %v4339_v33 = vmul.f32 -1.442695, %v3243_v28 }
0x21c4   :  { %5159 = vpow2.f32 %v4337_v1 }
0x21c5   :  { %5161 = vpow2.f32 %v4339_v33 }
0x21ca   :  { %v5156_v11 = vpop.eup %5155 }
0x21cb   :  { %3150 = vrot.lane.b32.xlu0 %v5156_v11, %s5347_s3 }
0x21d0   :  { %v5158_v0 = vpop.eup %5157 }
0x21d1   :  { %3256 = vrot.lane.b32.xlu1 %v5158_v0, %s5347_s3  ;;  %v5160_v35 = vpop.eup %5159 }
0x21d2   :  { %v3141_v39 = vadd.f32 1.0, %v5160_v35  ;;  %v5162_v40 = vpop.eup %5161 }
0x21d3   :  { %v3247_v41 = vadd.f32 1.0, %v5162_v40 }
0x21d4   :  { %5163 = vrcp.f32 %v3141_v39 }
0x21d5   :  { %5165 = vrcp.f32 %v3247_v41 }
0x21e1   :  { %v5164_v44 = vpop.eup %5163 }
0x21e2   :  { %v5166_v5 = vpop.eup %5165  ;;  %v3148_v48 = vmul.f32 %v5164_v44, %v3146_v47  ;;  %v5233_v47 = vld [vmem:[#allocation8 + $0x8] sm:$0xff] }
0x21e3   :  { %v3254_v57 = vmul.f32 %v5166_v5, %v3252_v55 }
0x223d   :  { %v3151_v46 = vpop.permute.xlu0 %3150 }
0x223e   :  { %v3153_v12 = vmul.f32 %v5164_v44, %v3151_v46 }
0x2240   :  { %3155 = vrot.lane.b32.xlu0 %v3153_v12, %s5348_s20 }
0x2243   :  { %v3257_v7 = vpop.permute.xlu1 %3256 }
0x2244   :  { %v3259_v54 = vmul.f32 %v5166_v5, %v3257_v7  ;;  %v5231_v7 = vld [vmem:[#allocation8 + $0x18] sm:$0xff] }
0x2246   :  { %3261 = vrot.lane.b32.xlu1 %v3259_v54, %s5348_s20  ;;  %v5232_v54 = vld [vmem:[#allocation8 + $0x10] sm:$0xff] }
0x22b2   :  { %v3156_v50 = vpop.permute.xlu0 %3155 }
0x22b3   :  { %v6239_v53 = vadd.f32 %v3156_v50, %v3148_v48  ;;  %v5234_v50 = vld [vmem:[#allocation8] sm:$0xff] }
0x22b5   :  { %5167 = vtanh.f32 %v6239_v53  ;;  %v3358_v21 = vrot.slane %v6239_v53, 6  ;;  %v5235_v53 = vld [vmem:[#allocation8 + $0x38] sm:$0xff] }
0x22b8   :  { %v3262_v58 = vpop.permute.xlu1 %3261 }
0x22b9   :  { %v6243_v18 = vadd.f32 %v3262_v58, %v3254_v57 }
0x22bb   :  { %5169 = vtanh.f32 %v6243_v18  ;;  %v3465_v28 = vrot.slane %v6243_v18, 2 }
0x22c2   :  { %v5168_v20 = vpop.eup %5167 }
0x22c3   :  { %3161 = vrot.lane.b32.xlu0 %v5168_v20, %s5347_s3 }
0x22c8   :  { %v5170_v61 = vpop.eup %5169 }
0x22c9   :  { %3267 = vrot.lane.b32.xlu1 %v5170_v61, %s5347_s3 }
0x2335   :  { %v3162_v29 = vpop.permute.xlu0 %3161 }
0x2336   :  { %v3164_v62 = vmul.f32 %v5164_v44, %v3162_v29 }
0x2338   :  { %3272 = vrot.lane.b32.xlu0 %v3164_v62, %s5348_s20 }
0x233b   :  { %v3268_v63 = vpop.permute.xlu1 %3267 }
0x233c   :  { %v3270_v2 = vmul.f32 %v5166_v5, %v3268_v63 }
0x233e   :  { %v3378_v6 = vrot.slane %v3270_v2, 6 }
0x2340   :  { %3379 = vrot.lane.b32.xlu1 %v3378_v6, %s5348_s20 }
0x23aa   :  { %v3273_v30 = vpop.permute.xlu0 %3272 }
0x23ab   :  { %4860 = vmatmul.mubr.msk.f32.vlgmr.msra.gmra.mxu1 %vm304_vm8, %v3273_v30 }
0x23ac   :  { %4874 = vmatpush3.msra.mxu1 %v5975_v43  ;;  %4881 = vmatprep.mubr.msk.f32.mxu1 %vm5346_vm0, %v5345_v4 }
0x23ad   :  { %4875 = vmatprep.subr.mxu1 %v5345_v4 }
0x23ae   :  { %4876 = vmatpush3.msra.mxu1 %v5978_v10 }
0x23af   :  { %4877 = vmatprep.subr.mxu1 %v5345_v4 }
0x23b0   :  { %4878 = vmatpush3.msra.mxu1 %v5984_v45 }
0x23b1   :  { %4879 = vmatprep.subr.mxu1 %v5345_v4 }
0x23b2   :  { %v3380_v8 = vpop.permute.xlu1 %3379  ;;  %4880 = vmatpush3.msra.mxu1 %v5989_v52 }
0x23b3   :  { %4871 = vmatmul.mubr.msk.f32.vlgmr.msra.gmra.mxu0 %vm304_vm8, %v3380_v8  ;;  %4895 = vmatprep.subr.mxu1 %v5345_v4 }
0x23b4   :  { %4885 = vmatpush3.msra.mxu0 %v5994_v27  ;;  %4892 = vmatprep.mubr.msk.f32.mxu0 %vm5346_vm0, %v5345_v4 }
0x23b5   :  { %4886 = vmatprep.subr.mxu0 %v5345_v4 }
0x23b6   :  { %4887 = vmatpush3.msra.mxu0 %v6002_v13 }
0x23b7   :  { %4888 = vmatprep.subr.mxu0 %v5345_v4 }
0x23b8   :  { %4889 = vmatpush3.msra.mxu0 %v6006_v59 }
0x23b9   :  { %4890 = vmatprep.subr.mxu0 %v5345_v4 }
0x23ba   :  { %4891 = vmatpush3.msra.mxu0 %v6011_v60 }
0x23bb   :  { %4906 = vmatprep.subr.mxu0 %v5345_v4 }
0x246b   :  { %v3342_v43 = vpop.f32.mrf.mxu1 }
0x246c   :  { %v3347_v10 = vrot.slane %v3342_v43, 6 }
0x246d   :  { %v4861_v45 = vpop.f32.mrf.mxu1 }
0x246e   :  { %v3349_v52 = vadd.f32 %v3347_v10, %v6071_v25 }
0x2470   :  { %5171 = vtanh.f32 %v3349_v52  ;;  %v4341_v31 = vmul.f32 -1.442695, %v3349_v52 }
0x2473   :  { %v3449_v27 = vpop.f32.mrf.mxu0 }
0x2474   :  { %v3454_v32 = vrot.slane %v3449_v27, 4 }
0x2475   :  { %v4872_v23 = vpop.f32.mrf.mxu0 }
0x2476   :  { %v3456_v3 = vadd.f32 %v3454_v32, %v6069_v22 }
0x2478   :  { %5173 = vtanh.f32 %v3456_v3  ;;  %v4343_v9 = vmul.f32 -1.442695, %v3456_v3 }
0x2479   :  { %5175 = vpow2.f32 %v4341_v31 }
0x247a   :  { %5177 = vpow2.f32 %v4343_v9 }
0x247d   :  { %v5172_v19 = vpop.eup %5171 }
0x247e   :  { %3362 = vrot.lane.b32.xlu0 %v5172_v19, %s5347_s3 }
0x2485   :  { %v5174_v49 = vpop.eup %5173 }
0x2486   :  { %3469 = vrot.lane.b32.xlu1 %v5174_v49, %s5347_s3  ;;  %v5176_v42 = vpop.eup %5175 }
0x2487   :  { %v3353_v56 = vadd.f32 1.0, %v5176_v42  ;;  %v5178_v14 = vpop.eup %5177 }
0x2488   :  { %v3460_v51 = vadd.f32 1.0, %v5178_v14 }
0x2489   :  { %5179 = vrcp.f32 %v3353_v56 }
0x248a   :  { %5181 = vrcp.f32 %v3460_v51 }
0x2496   :  { %v5180_v16 = vpop.eup %5179 }
0x2497   :  { %v5182_v17 = vpop.eup %5181  ;;  %v3360_v36 = vmul.f32 %v5180_v16, %v3358_v21 }
0x2498   :  { %v3467_v11 = vmul.f32 %v5182_v17, %v3465_v28 }
0x24f0   :  { %v3363_v37 = vpop.permute.xlu0 %3362 }
0x24f1   :  { %v3365_v15 = vmul.f32 %v5180_v16, %v3363_v37 }
0x24f3   :  { %3367 = vrot.lane.b32.xlu0 %v3365_v15, %s5348_s20 }
0x24f8   :  { %v3470_v34 = vpop.permute.xlu1 %3469 }
0x24f9   :  { %v3472_v38 = vmul.f32 %v5182_v17, %v3470_v34 }
0x24fb   :  { %3474 = vrot.lane.b32.xlu1 %v3472_v38, %s5348_s20 }
0x2565   :  { %v3368_v24 = vpop.permute.xlu0 %3367 }
0x2566   :  { %v6279_v26 = vadd.f32 %v3368_v24, %v3360_v36 }
0x2568   :  { %5183 = vtanh.f32 %v6279_v26  ;;  %v3572_v23 = vrot.slane %v6279_v26, 6 }
0x256d   :  { %v3475_v0 = vpop.permute.xlu1 %3474 }
0x256e   :  { %v6283_v1 = vadd.f32 %v3475_v0, %v3467_v11 }
0x2570   :  { %5185 = vtanh.f32 %v6283_v1  ;;  %v3679_v31 = vrot.slane %v6283_v1, 2 }
0x2575   :  { %v5184_v33 = vpop.eup %5183 }
0x2576   :  { %3373 = vrot.lane.b32.xlu0 %v5184_v33, %s5347_s3 }
0x257d   :  { %v5186_v35 = vpop.eup %5185 }
0x257e   :  { %3480 = vrot.lane.b32.xlu1 %v5186_v35, %s5347_s3 }
0x25e8   :  { %v3374_v39 = vpop.permute.xlu0 %3373 }
0x25e9   :  { %v3376_v40 = vmul.f32 %v5180_v16, %v3374_v39 }
0x25eb   :  { %v3485_v41 = vrot.slane %v3376_v40, 2 }
0x25ed   :  { %3486 = vrot.lane.b32.xlu0 %v3485_v41, %s5348_s20 }
0x25f0   :  { %v3481_v44 = vpop.permute.xlu1 %3480 }
0x25f1   :  { %v3483_v46 = vmul.f32 %v5182_v17, %v3481_v44 }
0x25f3   :  { %v3592_v12 = vrot.slane %v3483_v46, 4 }
0x25f5   :  { %3593 = vrot.lane.b32.xlu1 %v3592_v12, %s5348_s20 }
0x265f   :  { %v3487_v5 = vpop.permute.xlu0 %3486 }
0x2660   :  { %4882 = vmatmul.mubr.msk.f32.vlgmr.msra.gmra.mxu1 %vm304_vm8, %v3487_v5 }
0x2661   :  { %4896 = vmatpush3.msra.mxu1 %v5231_v7  ;;  %4903 = vmatprep.mubr.msk.f32.mxu1 %vm5346_vm0, %v5345_v4 }
0x2662   :  { %4897 = vmatprep.subr.mxu1 %v5345_v4 }
0x2663   :  { %4898 = vmatpush3.msra.mxu1 %v5232_v54 }
0x2664   :  { %4899 = vmatprep.subr.mxu1 %v5345_v4 }
0x2665   :  { %4900 = vmatpush3.msra.mxu1 %v5233_v47 }
0x2666   :  { %4901 = vmatprep.subr.mxu1 %v5345_v4 }
0x2667   :  { %v3594_v48 = vpop.permute.xlu1 %3593  ;;  %4902 = vmatpush3.msra.mxu1 %v5234_v50 }
0x2668   :  { %4893 = vmatmul.mubr.msk.f32.vlgmr.msra.gmra.mxu0 %vm304_vm8, %v3594_v48  ;;  %4917 = vmatprep.subr.mxu1 %v5345_v4 }
0x2669   :  { %4907 = vmatpush3.msra.mxu0 %v5235_v53  ;;  %4914 = vmatprep.mubr.msk.f32.mxu0 %vm5346_vm0, %v5345_v4 }
0x266a   :  { %4908 = vmatprep.subr.mxu0 %v5345_v4 }
0x266b   :  { %4909 = vmatpush3.msra.mxu0 %v6002_v13 }
0x266c   :  { %4910 = vmatprep.subr.mxu0 %v5345_v4 }
0x266d   :  { %4911 = vmatpush3.msra.mxu0 %v6006_v59 }
0x266e   :  { %4912 = vmatprep.subr.mxu0 %v5345_v4 }
0x266f   :  { %4913 = vmatpush3.msra.mxu0 %v6011_v60 }
0x2670   :  { %4928 = vmatprep.subr.mxu0 %v5345_v4 }
0x2720   :  { %v3556_v55 = vpop.f32.mrf.mxu1 }
0x2721   :  { %v3561_v57 = vrot.slane %v3556_v55, 4 }
0x2722   :  { %v4883_v58 = vpop.f32.mrf.mxu1 }
0x2723   :  { %v3563_v18 = vadd.f32 %v3561_v57, %v6071_v25 }
0x2725   :  { %5187 = vtanh.f32 %v3563_v18  ;;  %v4345_v60 = vmul.f32 -1.442695, %v3563_v18 }
0x2728   :  { %v3663_v20 = vpop.f32.mrf.mxu0 }
0x2729   :  { %v3668_v61 = vrot.slane %v3663_v20, 6 }
0x272a   :  { %v4894_v29 = vpop.f32.mrf.mxu0 }
0x272b   :  { %v3670_v13 = vadd.f32 %v3668_v61, %v6069_v22  ;;  %v3912_v29 = vld [vmem:[#allocation9 + $0x18] sm:$0xff] }
0x272d   :  { %5189 = vtanh.f32 %v3670_v13  ;;  %v4347_v63 = vmul.f32 -1.442695, %v3670_v13  ;;  %v3911_v13 = vld [vmem:[#allocation9 + $0x10] sm:$0xff] }
0x272e   :  { %5191 = vpow2.f32 %v4345_v60  ;;  %v3910_v60 = vld [vmem:[#allocation9 + $0x8] sm:$0xff] }
0x272f   :  { %5193 = vpow2.f32 %v4347_v63 }
0x2732   :  { %v5188_v62 = vpop.eup %5187 }
0x2733   :  { %3576 = vrot.lane.b32.xlu0 %v5188_v62, %s5347_s3  ;;  %v3917_v62 = vld [vmem:[#allocation9 + $0x38] sm:$0xff] }
0x273a   :  { %v5190_v59 = vpop.eup %5189 }
0x273b   :  { %3683 = vrot.lane.b32.xlu1 %v5190_v59, %s5347_s3  ;;  %v5192_v2 = vpop.eup %5191  ;;  %v3916_v59 = vld [vmem:[#allocation9 + $0x30] sm:$0xff] }
0x273c   :  { %v3567_v6 = vadd.f32 1.0, %v5192_v2  ;;  %v5194_v30 = vpop.eup %5193  ;;  %v3909_v2 = vld [vmem:[#allocation9] sm:$0xff] }
0x273d   :  { %v3674_v8 = vadd.f32 1.0, %v5194_v30  ;;  %v3915_v30 = vld [vmem:[#allocation9 + $0x28] sm:$0xff] }
0x273e   :  { %5195 = vrcp.f32 %v3567_v6 }
0x273f   :  { %5197 = vrcp.f32 %v3674_v8  ;;  %v3914_v8 = vld [vmem:[#allocation9 + $0x20] sm:$0xff] }
0x274b   :  { %v5196_v43 = vpop.eup %5195 }
0x274c   :  { %v5198_v52 = vpop.eup %5197  ;;  %v3574_v3 = vmul.f32 %v5196_v43, %v3572_v23 }
0x274d   :  { %v3681_v9 = vmul.f32 %v5198_v52, %v3679_v31  ;;  %v4078_v31 = vld [vmem:[%s6381_s10] sm:$0xff] }
0x27a5   :  { %v3577_v10 = vpop.permute.xlu0 %3576 }
0x27a6   :  { %v3579_v45 = vmul.f32 %v5196_v43, %v3577_v10 }
0x27a8   :  { %3581 = vrot.lane.b32.xlu0 %v3579_v45, %s5348_s20 }
0x27ad   :  { %v3684_v27 = vpop.permute.xlu1 %3683 }
0x27ae   :  { %v3686_v32 = vmul.f32 %v5198_v52, %v3684_v27 }
0x27b0   :  { %3688 = vrot.lane.b32.xlu1 %v3686_v32, %s5348_s20 }
0x281a   :  { %v3582_v19 = vpop.permute.xlu0 %3581 }
0x281b   :  { %v3584_v49 = vadd.f32 %v3582_v19, %v3574_v3  ;;  %v4081_v3 = vld [vmem:[%s6381_s10 + $0x18] sm:$0xff]  ;;  %v4080_v19 = vld [vmem:[%s6381_s10 + $0x10] sm:$0xff] }
0x281d   :  { %5199 = vtanh.f32 %v3584_v49  ;;  %v3786_v50 = vrot.slane %v3584_v49, 6  ;;  %v4079_v49 = vld [vmem:[%s6381_s10 + $0x8] sm:$0xff] }
0x2822   :  { %v3689_v42 = vpop.permute.xlu1 %3688 }
0x2823   :  { %v3691_v56 = vadd.f32 %v3689_v42, %v3681_v9 }
0x2825   :  { %5201 = vtanh.f32 %v3691_v56  ;;  %v3890_v58 = vrot.slane %v3691_v56, 2 }
0x282a   :  { %v5200_v14 = vpop.eup %5199 }
0x282b   :  { %3587 = vrot.lane.b32.xlu0 %v5200_v14, %s5347_s3  ;;  %v4354_v14 = vld [vmem:[%s6380_s9] ss:$0 sm:$0xff] }
0x2832   :  { %v5202_v51 = vpop.eup %5201 }
0x2833   :  { %3694 = vrot.lane.b32.xlu1 %v5202_v51, %s5347_s3 }
0x289d   :  { %v3588_v16 = vpop.permute.xlu0 %3587 }
0x289e   :  { %v3590_v37 = vmul.f32 %v5196_v43, %v3588_v16 }
0x28a0   :  { %v3699_v15 = vrot.slane %v3590_v37, 4 }
0x28a2   :  { %3700 = vrot.lane.b32.xlu0 %v3699_v15, %s5348_s20 }
0x28a5   :  { %v3695_v17 = vpop.permute.xlu1 %3694 }
0x28a6   :  { %v3697_v34 = vmul.f32 %v5198_v52, %v3695_v17  ;;  %v4355_v17 = vld [vmem:[%s6382_s11] ss:$0 sm:$0xff] }
0x28a8   :  { %v3806_v38 = vrot.slane %v3697_v34, 2 }
0x28aa   :  { %3807 = vrot.lane.b32.xlu1 %v3806_v38, %s5348_s20 }
0x2914   :  { %v3701_v21 = vpop.permute.xlu0 %3700 }
0x2915   :  { %4904 = vmatmul.mubr.msk.f32.vlgmr.msra.gmra.mxu1 %vm304_vm8, %v3701_v21 }
0x2916   :  { %4925 = vmatprep.mubr.msk.f32.mxu1 %vm5346_vm0, %v5345_v4  ;;  %4918 = vmatpush3.msra.mxu1 %v3917_v62 }
0x2917   :  { %4919 = vmatprep.subr.mxu1 %v5345_v4 }
0x2918   :  { %4920 = vmatpush3.msra.mxu1 %v3916_v59 }
0x2919   :  { %4921 = vmatprep.subr.mxu1 %v5345_v4 }
0x291a   :  { %4922 = vmatpush3.msra.mxu1 %v3915_v30 }
0x291b   :  { %4923 = vmatprep.subr.mxu1 %v5345_v4 }
0x291c   :  { %v3808_v36 = vpop.permute.xlu1 %3807  ;;  %4924 = vmatpush3.msra.mxu1 %v3914_v8 }
0x291d   :  { %4915 = vmatmul.mubr.msk.f32.vlgmr.msra.gmra.mxu0 %vm304_vm8, %v3808_v36  ;;  %4939 = vmatprep.subr.mxu1 %v5345_v4 }
0x291e   :  { %4936 = vmatprep.mubr.msk.f32.mxu0 %vm5346_vm0, %v5345_v4  ;;  %4929 = vmatpush3.msra.mxu0 %v3912_v29 }
0x291f   :  { %4930 = vmatprep.subr.mxu0 %v5345_v4 }
0x2920   :  { %4931 = vmatpush3.msra.mxu0 %v3911_v13 }
0x2921   :  { %4932 = vmatprep.subr.mxu0 %v5345_v4 }
0x2922   :  { %4933 = vmatpush3.msra.mxu0 %v3910_v60 }
0x2923   :  { %4934 = vmatprep.subr.mxu0 %v5345_v4 }
0x2924   :  { %4935 = vmatpush3.msra.mxu0 %v3909_v2 }
0x29d5   :  { %v3770_v24 = vpop.f32.mrf.mxu1 }
0x29d6   :  { %v3775_v26 = vrot.slane %v3770_v24, 2 }
0x29d7   :  { %v4905_v28 = vpop.f32.mrf.mxu1 }
0x29d8   :  { %v3777_v11 = vadd.f32 %v3775_v26, %v6071_v25 }
0x29da   :  { %5203 = vtanh.f32 %v3777_v11  ;;  %v4349_v40 = vmul.f32 -1.442695, %v3777_v11 }
0x29dd   :  { %v3877_v0 = vpop.f32.mrf.mxu0 }
0x29de   :  { %v3881_v1 = vadd.f32 %v3877_v0, %v6069_v22 }
0x29df   :  { %v4916_v33 = vpop.f32.mrf.mxu0 }
0x29e0   :  { %5205 = vtanh.f32 %v3881_v1  ;;  %v4351_v41 = vmul.f32 -1.442695, %v3881_v1 }
0x29e1   :  { %5207 = vpow2.f32 %v4349_v40 }
0x29e2   :  { %5209 = vpow2.f32 %v4351_v41 }
0x29e7   :  { %v5204_v35 = vpop.eup %5203 }
0x29e8   :  { %3790 = vrot.lane.b32.xlu0 %v5204_v35, %s5347_s3 }
0x29ed   :  { %v5206_v39 = vpop.eup %5205 }
0x29ee   :  { %3894 = vrot.lane.b32.xlu1 %v5206_v39, %s5347_s3  ;;  %v5208_v44 = vpop.eup %5207 }
0x29ef   :  { %v3781_v46 = vadd.f32 1.0, %v5208_v44  ;;  %v5210_v12 = vpop.eup %5209 }
0x29f0   :  { %v3885_v25 = vadd.f32 1.0, %v5210_v12 }
0x29f1   :  { %5211 = vrcp.f32 %v3781_v46 }
0x29f2   :  { %5213 = vrcp.f32 %v3885_v25 }
0x29fe   :  { %v5212_v5 = vpop.eup %5211 }
0x29ff   :  { %v5214_v54 = vpop.eup %5213  ;;  %v3788_v53 = vmul.f32 %v5212_v5, %v3786_v50 }
0x2a00   :  { %v3892_v18 = vmul.f32 %v5214_v54, %v3890_v58 }
0x2a5a   :  { %v3791_v22 = vpop.permute.xlu0 %3790 }
0x2a5b   :  { %v3793_v7 = vmul.f32 %v5212_v5, %v3791_v22 }
0x2a5d   :  { %3795 = vrot.lane.b32.xlu0 %v3793_v7, %s5348_s20 }
0x2a60   :  { %v3895_v47 = vpop.permute.xlu1 %3894 }
0x2a61   :  { %v3897_v48 = vmul.f32 %v5214_v54, %v3895_v47 }
0x2a63   :  { %3899 = vrot.lane.b32.xlu1 %v3897_v48, %s5348_s20 }
0x2acf   :  { %v3796_v55 = vpop.permute.xlu0 %3795 }
0x2ad0   :  { %v3798_v57 = vadd.f32 %v3796_v55, %v3788_v53 }
0x2ad2   :  { %5215 = vtanh.f32 %v3798_v57 }
0x2ad5   :  { %v3900_v20 = vpop.permute.xlu1 %3899 }
0x2ad6   :  { %v3902_v61 = vadd.f32 %v3900_v20, %v3892_v18 }
0x2ad8   :  { %5217 = vtanh.f32 %v3902_v61 }
0x2adf   :  { %v5216_v63 = vpop.eup %5215 }
0x2ae0   :  { %3801 = vrot.lane.b32.xlu0 %v5216_v63, %s5347_s3 }
0x2ae5   :  { %v5218_v6 = vpop.eup %5217 }
0x2ae6   :  { %3905 = vrot.lane.b32.xlu1 %v5218_v6, %s5347_s3 }
0x2b52   :  { %v3802_v43 = vpop.permute.xlu0 %3801 }
0x2b53   :  { %v3804_v10 = vmul.f32 %v5212_v5, %v3802_v43 }
0x2b55   :  { %v3994_v45 = vrot.slane %v3804_v10, 6 }
0x2b57   :  { %3995 = vrot.lane.b32.xlu1 %v3994_v45, %s5348_s20 }
0x2b58   :  { %v3906_v52 = vpop.permute.xlu1 %3905 }
0x2b59   :  { %v3908_v27 = vmul.f32 %v5214_v54, %v3906_v52 }
0x2b5b   :  { %3919 = vrot.lane.b32.xlu0 %v3908_v27, %s5348_s20 }
0x2bc9   :  { %v3996_v32 = vpop.permute.xlu1 %3995 }
0x2bca   :  { %4937 = vmatmul.mubr.msk.f32.vlgmr.msra.gmra.mxu0 %vm304_vm8, %v3996_v32 }
0x2bcd   :  { %v3920_v23 = vpop.permute.xlu0 %3919 }
0x2bce   :  { %4926 = vmatmul.mubr.msk.f32.vlgmr.msra.gmra.mxu1 %vm304_vm8, %v3920_v23 }
0x2bcf   :  { %4947 = vmatprep.mubr.msk.f32.mxu1 %vm5346_vm0, %v5345_v4  ;;  %4940 = vmatpush3.msra.mxu1 %v4081_v3 }
0x2bd0   :  { %4941 = vmatprep.subr.mxu1 %v5345_v4 }
0x2bd1   :  { %4942 = vmatpush3.msra.mxu1 %v4080_v19 }
0x2bd2   :  { %4943 = vmatprep.subr.mxu1 %v5345_v4 }
0x2bd3   :  { %4944 = vmatpush3.msra.mxu1 %v4079_v49 }
0x2bd4   :  { %4945 = vmatprep.subr.mxu1 %v5345_v4 }
0x2bd5   :  { %4946 = vmatpush3.msra.mxu1 %v4078_v31 }
0x2c8a   :  { %v4065_v9 = vpop.f32.mrf.mxu0 }
0x2c8c   :  { %v4938_v42 = vpop.f32.mrf.mxu0 }
0x2c8e   :  { %v3989_v56 = vpop.f32.mrf.mxu1 }
0x2c8f   :  { %v4066_v51 = vadd.f32 %v4065_v9, %v3989_v56 }
0x2c90   :  { %v4927_v16 = vpop.f32.mrf.mxu1 }
0x2c91   :  { %v4076_v37 = vadd.f32 %v4354_v14, %v4066_v51 }
0x2c93   :  { %v4077_v15 = vmax.f32 %v4076_v37, 0.0 }
0x2c95   :  { %4948 = vmatmul.mubr.msk.f32.vlgmr.msra.gmra.mxu1 %vm304_vm8, %v4077_v15 }
0x2d55   :  { %v4158_v34 = vpop.f32.mrf.mxu1 }
0x2d56   :  { %v4159_v4 = vadd.f32 %v4355_v17, %v4158_v34 }
0x2d57   :  { %v4949_v38 = vpop.f32.mrf.mxu1 }
0x2d58   :  { %v4357_v21 = vmul.f32 -1.442695, %v4159_v4 }
0x2d5a   :  { %5219 = vpow2.f32 %v4357_v21 }
0x2d67   :  { %v5220_v36 = vpop.eup %5219 }
0x2d68   :  { %v4165_v24 = vadd.f32 1.0, %v5220_v36 }
0x2d6a   :  { %5221 = vrcp.f32 %v4165_v24 }
0x2d77   :  { %v5222_v26 = vpop.eup %5221 }
0x2d78   :  { %4168 = vst [vmem:[%s6383_s12] sm:$0x3] %v5222_v26 }
0x2d79   :  { %4173 = vsyncpa [#allocation3], 1 }
0x2d7a   :  { %4174 = vsyncpa [#allocation7], 1 }
0x2d7b   :  { %4175 = vsyncpa [#allocation10], 1 }
0x2d7c   :  { %4176 = vsyncpa [#allocation4], 1 }

</bundles_post_ra>
